<compile_context>
chip_gen: v5e
topology: v5e:2x2
jax: 0.10.0
libtpu: 0.0.40
codegen_flags: <defaults>
</compile_context>

<pallas_src>
import math
import functools

import jax
import jax.numpy as jnp
from jax import lax
from jax.experimental import pallas as pl
from jax.experimental.pallas import tpu as pltpu


# ----------------------------------------------------------------------------
# In-kernel helpers (pure JAX, traced inside the Pallas kernel bodies)
# ----------------------------------------------------------------------------
def _layernorm(y, g, b):
    """Row-wise LayerNorm in f32 (eps matches PyTorch default 1e-5)."""
    mu = jnp.mean(y, axis=-1, keepdims=True)
    var = jnp.mean((y - mu) ** 2, axis=-1, keepdims=True)
    return (y - mu) * lax.rsqrt(var + 1e-5) * g + b


def _mm(x, w):
    """Matmul with operands in the weight's (compute) dtype, f32 accumulation."""
    return jnp.dot(x.astype(w.dtype), w, preferred_element_type=jnp.float32)


def _attention(q3, k3, v3, wo_h, bo, nhead, bias):
    """Multi-head attention + output projection.

    q3: (B, Sq, D) f32, k3/v3: (B, Sk, D) f32,
    wo_h: (H, dh, D) compute dtype (out-projection, split per head),
    bo: (1, D) f32, bias: optional additive (Sq, Sk) mask.
    Returns (B*Sq, D) f32.  The 1/sqrt(dh) scale is pre-folded into the Q
    projection weights at init time.
    """
    B, Sq, D = q3.shape
    Sk = k3.shape[1]
    H = nhead
    dh = D // H
    cd = wo_h.dtype
    outs = []
    for b in range(B):  # static, small batch; attention never mixes batches
        # head-major stacks (H, S, dh): leading-axis stack of static slices.
        qh = jnp.stack([q3[b, :, h * dh:(h + 1) * dh] for h in range(H)], axis=0).astype(cd)
        kh = jnp.stack([k3[b, :, h * dh:(h + 1) * dh] for h in range(H)], axis=0).astype(cd)
        vh = jnp.stack([v3[b, :, h * dh:(h + 1) * dh] for h in range(H)], axis=0).astype(cd)

        # batched score / softmax / context — one einsum over all heads.
        s = jnp.einsum("hqd,hkd->hqk", qh, kh, preferred_element_type=jnp.float32)
        if bias is not None:
            s = s + bias
        s = s - jnp.max(s, axis=-1, keepdims=True)
        p = jnp.exp(s)
        p = p * pl.reciprocal(jnp.sum(p, axis=-1, keepdims=True), approx=True)
        o = jnp.einsum("hqk,hkd->hqd", p.astype(cd), vh,
                       preferred_element_type=jnp.float32)        # (H, Sq, dh)

        # output projection with the head-concat folded in:
        #   concat_h(o_h) @ Wo == sum_h o_h @ Wo[h]
        proj = jnp.einsum("hqd,hde->hqe", o.astype(cd), wo_h,
                          preferred_element_type=jnp.float32)     # (H, Sq, D)
        outs.append(jnp.sum(proj, axis=0))                        # (Sq, D)
    return jnp.concatenate(outs, axis=0) + bo                     # (B*Sq, D)


# ----------------------------------------------------------------------------
# Fused stack kernels (one pallas_call per stack; grid = (nlayers,))
# ----------------------------------------------------------------------------
def _encoder_stack_kernel(x_ref,
                          wqkv_ref, bqkv_ref, wo_ref, bo_ref, g1_ref, be1_ref,
                          w1_ref, b1_ref, w2_ref, b2_ref, g2_ref, be2_ref,
                          o_ref, act_ref, *, nhead):
    l = pl.program_id(0)

    @pl.when(l == 0)
    def _():
        act_ref[...] = x_ref[...]          # load activation into the VMEM carry

    B, S, D = act_ref.shape
    x2 = act_ref[...].reshape(B * S, D)    # batch folded into rows

    # --- self attention (single fused QKV matmul, all heads batched) ---
    qkv = _mm(x2, wqkv_ref[0]) + bqkv_ref[0]                       # (B*S, 3D)
    qkv3 = qkv.reshape(B, S, 3 * D)
    attn = _attention(qkv3[:, :, 0:D], qkv3[:, :, D:2 * D], qkv3[:, :, 2 * D:3 * D],
                      wo_ref[0], bo_ref[0], nhead, None)

    # --- add & norm ---
    h1 = _layernorm(x2 + attn, g1_ref[0], be1_ref[0])

    # --- feed-forward ---
    ff = jnp.maximum(_mm(h1, w1_ref[0]) + b1_ref[0], 0.0)
    ff = _mm(ff, w2_ref[0]) + b2_ref[0]

    # --- add & norm ---
    y3 = _layernorm(h1 + ff, g2_ref[0], be2_ref[0]).reshape(B, S, D)
    act_ref[...] = y3

    @pl.when(l == pl.num_programs(0) - 1)
    def _():
        o_ref[...] = y3                    # single HBM write-back per stack


def _decoder_stack_kernel(x_ref, mem_ref,
                          sa_wqkv_ref, sa_bqkv_ref, sa_wo_ref, sa_bo_ref, g1_ref, be1_ref,
                          ca_wq_ref, ca_bq_ref, ca_wkv_ref, ca_bkv_ref, ca_wo_ref, ca_bo_ref,
                          g2_ref, be2_ref,
                          w1_ref, b1_ref, w2_ref, b2_ref, g3_ref, be3_ref,
                          o_ref, act_ref, mask_ref, *, nhead):
    l = pl.program_id(0)
    B, St, D = act_ref.shape
    Ss = mem_ref.shape[1]

    @pl.when(l == 0)
    def _():
        act_ref[...] = x_ref[...]
        # causal mask built once into VMEM scratch and reused by every layer.
        row = lax.broadcasted_iota(jnp.int32, (St, St), 0)
        col = lax.broadcasted_iota(jnp.int32, (St, St), 1)
        mask_ref[...] = jnp.where(col <= row, 0.0, -1e30).astype(jnp.float32)

    x2 = act_ref[...].reshape(B * St, D)
    mem2 = mem_ref[...].reshape(B * Ss, D)
    causal = mask_ref[...]

    # --- masked self attention ---
    qkv = _mm(x2, sa_wqkv_ref[0]) + sa_bqkv_ref[0]
    qkv3 = qkv.reshape(B, St, 3 * D)
    sa = _attention(qkv3[:, :, 0:D], qkv3[:, :, D:2 * D], qkv3[:, :, 2 * D:3 * D],
                    sa_wo_ref[0], sa_bo_ref[0], nhead, causal)
    h1 = _layernorm(x2 + sa, g1_ref[0], be1_ref[0])

    # --- cross attention (Q from decoder state, K/V from encoder memory) ---
    q3 = (_mm(h1, ca_wq_ref[0]) + ca_bq_ref[0]).reshape(B, St, D)
    kv = _mm(mem2, ca_wkv_ref[0]) + ca_bkv_ref[0]
    kv3 = kv.reshape(B, Ss, 2 * D)
    ca = _attention(q3, kv3[:, :, 0:D], kv3[:, :, D:2 * D],
                    ca_wo_ref[0], ca_bo_ref[0], nhead, None)
    h2 = _layernorm(h1 + ca, g2_ref[0], be2_ref[0])

    # --- feed-forward ---
    ff = jnp.maximum(_mm(h2, w1_ref[0]) + b1_ref[0], 0.0)
    ff = _mm(ff, w2_ref[0]) + b2_ref[0]

    y3 = _layernorm(h2 + ff, g3_ref[0], be3_ref[0]).reshape(B, St, D)
    act_ref[...] = y3

    @pl.when(l == pl.num_programs(0) - 1)
    def _():
        o_ref[...] = y3


# ----------------------------------------------------------------------------
# BlockSpec helpers and pallas_call wrappers (one call per stack)
# ----------------------------------------------------------------------------
def _rep_spec(shape):
    """Block that is the whole array, same block index at every layer step."""
    z = (0,) * len(shape)
    return pl.BlockSpec(tuple(shape), lambda l, z=z: z)


def _layer_spec(shape):
    """Per-layer slice of a weight stacked with a leading `layer` axis."""
    z = (0,) * len(shape)
    return pl.BlockSpec((1,) + tuple(shape), lambda l, z=z: (l,) + z)


def encoder_stack(x_bsd, p, nhead):
    """x_bsd: (B, S, D) -> (B, S, D); runs all encoder layers in one kernel."""
    B, S, D = x_bsd.shape
    L = p["wqkv"].shape[0]
    F = p["w1"].shape[-1]
    H = nhead
    dh = D // H
    kernel = functools.partial(_encoder_stack_kernel, nhead=nhead)
    return pl.pallas_call(
        kernel,
        out_shape=jax.ShapeDtypeStruct((B, S, D), jnp.float32),
        grid=(L,),
        in_specs=[
            _rep_spec((B, S, D)),
            _layer_spec((D, 3 * D)), _layer_spec((1, 3 * D)),
            _layer_spec((H, dh, D)), _layer_spec((1, D)),
            _layer_spec((1, D)), _layer_spec((1, D)),
            _layer_spec((D, F)), _layer_spec((1, F)),
            _layer_spec((F, D)), _layer_spec((1, D)),
            _layer_spec((1, D)), _layer_spec((1, D)),
        ],
        out_specs=_rep_spec((B, S, D)),
        scratch_shapes=[pltpu.VMEM((B, S, D), jnp.float32)],
        compiler_params=pltpu.CompilerParams(dimension_semantics=("arbitrary",)),
    )(x_bsd,
      p["wqkv"], p["bqkv"], p["wo"], p["bo"], p["g1"], p["be1"],
      p["w1"], p["b1"], p["w2"], p["b2"], p["g2"], p["be2"])


def decoder_stack(x_bsd, mem_bsd, p, nhead):
    """x_bsd: (B, St, D), mem_bsd: (B, Ss, D) -> (B, St, D)."""
    B, St, D = x_bsd.shape
    Ss = mem_bsd.shape[1]
    L = p["sa_wqkv"].shape[0]
    F = p["w1"].shape[-1]
    H = nhead
    dh = D // H
    kernel = functools.partial(_decoder_stack_kernel, nhead=nhead)
    return pl.pallas_call(
        kernel,
        out_shape=jax.ShapeDtypeStruct((B, St, D), jnp.float32),
        grid=(L,),
        in_specs=[
            _rep_spec((B, St, D)),
            _rep_spec((B, Ss, D)),
            _layer_spec((D, 3 * D)), _layer_spec((1, 3 * D)),
            _layer_spec((H, dh, D)), _layer_spec((1, D)),
            _layer_spec((1, D)), _layer_spec((1, D)),
            _layer_spec((D, D)), _layer_spec((1, D)),
            _layer_spec((D, 2 * D)), _layer_spec((1, 2 * D)),
            _layer_spec((H, dh, D)), _layer_spec((1, D)),
            _layer_spec((1, D)), _layer_spec((1, D)),
            _layer_spec((D, F)), _layer_spec((1, F)),
            _layer_spec((F, D)), _layer_spec((1, D)),
            _layer_spec((1, D)), _layer_spec((1, D)),
        ],
        out_specs=_rep_spec((B, St, D)),
        scratch_shapes=[pltpu.VMEM((B, St, D), jnp.float32),
                        pltpu.VMEM((St, St), jnp.float32)],
        compiler_params=pltpu.CompilerParams(dimension_semantics=("arbitrary",)),
    )(x_bsd, mem_bsd,
      p["sa_wqkv"], p["sa_bqkv"], p["sa_wo"], p["sa_bo"], p["g1"], p["be1"],
      p["ca_wq"], p["ca_bq"], p["ca_wkv"], p["ca_bkv"], p["ca_wo"], p["ca_bo"],
      p["g2"], p["be2"],
      p["w1"], p["b1"], p["w2"], p["b2"], p["g3"], p["be3"])


# ----------------------------------------------------------------------------
# Model glue (PE add + layout changes are plain JAX; everything else Pallas)
# ----------------------------------------------------------------------------
def make_positional_encoding(d_model, max_len=100):
    position = jnp.arange(max_len, dtype=jnp.float32)[:, None]
    div_term = jnp.exp(
        jnp.arange(0, d_model, 2, dtype=jnp.float32) * (-math.log(10000.0) / d_model)
    )
    pe = jnp.zeros((max_len, d_model), jnp.float32)
    pe = pe.at[:, 0::2].set(jnp.sin(position * div_term))
    cos = jnp.cos(position * div_term)
    if d_model % 2 != 0:
        cos = cos[:, :-1]
    pe = pe.at[:, 1::2].set(cos)
    return pe[:, None, :]  # (max_len, 1, d_model)


def transformer_forward(params, src, tar, *, nhead):
    """src/tar: (S, B, D) (PyTorch non-batch-first layout). Returns (S_tgt, B, D)."""
    pe = params["pe"]
    src = src + pe[: src.shape[0]]     # positional encoding (dropout = identity)
    tar = tar + pe[: tar.shape[0]]

    # (S, B, D) -> (B, S, D) batch-major for the fused stack kernels.
    src_b = jnp.transpose(src, (1, 0, 2))
    tar_b = jnp.transpose(tar, (1, 0, 2))

    memory = encoder_stack(src_b, params["encoder"], nhead)
    out = decoder_stack(tar_b, memory, params["decoder"], nhead)

    return jnp.transpose(out, (1, 0, 2))  # back to (S, B, D)


# ----------------------------------------------------------------------------
# Deterministic parameter initialization.
#   * weights are stored in "x @ W" layout and stacked over layers,
#   * QKV fused into one (D, 3D) matrix, out-projection stored per head (H,dh,D),
#   * 1/sqrt(dh) softmax scale folded into the Q projection weights,
#   * matmul weights stored in compute_dtype (bf16 by default).
# ----------------------------------------------------------------------------
def init_params(key, ninp, nhead, nhid, nlayers, compute_dtype=jnp.bfloat16):
    D, H, F, L = ninp, nhead, nhid, nlayers
    dh = D // H
    q_scale = 1.0 / math.sqrt(dh)

    def nrm(k, shape, scale=0.05):
        return scale * jax.random.normal(k, shape, jnp.float32)

    def ones(shape):
        return jnp.ones(shape, jnp.float32)

    def zeros(shape):
        return jnp.zeros(shape, jnp.float32)

    k_enc, k_dec = jax.random.split(key)
    ke = jax.random.split(k_enc, 4)
    kd = jax.random.split(k_dec, 7)

    e_wqkv = nrm(ke[0], (L, D, 3 * D)).at[:, :, :D].multiply(q_scale)
    encoder = {
        "wqkv": e_wqkv.astype(compute_dtype),
        "bqkv": zeros((L, 1, 3 * D)),
        "wo": nrm(ke[1], (L, H, dh, D)).astype(compute_dtype),
        "bo": zeros((L, 1, D)),
        "g1": ones((L, 1, D)), "be1": zeros((L, 1, D)),
        "w1": nrm(ke[2], (L, D, F)).astype(compute_dtype),
        "b1": zeros((L, 1, F)),
        "w2": nrm(ke[3], (L, F, D)).astype(compute_dtype),
        "b2": zeros((L, 1, D)),
        "g2": ones((L, 1, D)), "be2": zeros((L, 1, D)),
    }

    d_wqkv = nrm(kd[0], (L, D, 3 * D)).at[:, :, :D].multiply(q_scale)
    decoder = {
        "sa_wqkv": d_wqkv.astype(compute_dtype),
        "sa_bqkv": zeros((L, 1, 3 * D)),
        "sa_wo": nrm(kd[1], (L, H, dh, D)).astype(compute_dtype),
        "sa_bo": zeros((L, 1, D)),
        "g1": ones((L, 1, D)), "be1": zeros((L, 1, D)),
        "ca_wq": (nrm(kd[2], (L, D, D)) * q_scale).astype(compute_dtype),
        "ca_bq": zeros((L, 1, D)),
        "ca_wkv": nrm(kd[3], (L, D, 2 * D)).astype(compute_dtype),
        "ca_bkv": zeros((L, 1, 2 * D)),
        "ca_wo": nrm(kd[4], (L, H, dh, D)).astype(compute_dtype),
        "ca_bo": zeros((L, 1, D)),
        "g2": ones((L, 1, D)), "be2": zeros((L, 1, D)),
        "w1": nrm(kd[5], (L, D, F)).astype(compute_dtype),
        "b1": zeros((L, 1, F)),
        "w2": nrm(kd[6], (L, F, D)).astype(compute_dtype),
        "b2": zeros((L, 1, D)),
        "g3": ones((L, 1, D)), "be3": zeros((L, 1, D)),
    }
    return {"pe": make_positional_encoding(D), "encoder": encoder, "decoder": decoder}


# ----------------------------------------------------------------------------
if __name__ == "__main__":
    ninp, nhead, nhid, nlayers = 32, 4, 64, 2
    S, B = 8, 2

    key = jax.random.PRNGKey(0)
    k_src, k_tar, k_par = jax.random.split(key, 3)
    src = jax.random.normal(k_src, (S, B, ninp), jnp.float32)
    tar = jax.random.normal(k_tar, (S, B, ninp), jnp.float32)
    params = init_params(k_par, ninp, nhead, nhid, nlayers)

    fwd = jax.jit(functools.partial(transformer_forward, nhead=nhead))
    out = jax.block_until_ready(fwd(params, src, tar))

    assert out.shape == (S, B, ninp)
    assert bool(jnp.all(jnp.isfinite(out)))
    print("KERNEL_OK")
</pallas_src>

<mosaic_0001>
module attributes {stable_mosaic.version = 11 : i64} {
  func.func @_encoder_stack_kernel(%arg0: i32, %arg1: memref<2x8x32xf32, #tpu.memory_space<vmem>>, %arg2: memref<1x32x96xbf16, #tpu.memory_space<vmem>>, %arg3: memref<1x1x96xf32, #tpu.memory_space<vmem>>, %arg4: memref<1x4x8x32xbf16, #tpu.memory_space<vmem>>, %arg5: memref<1x1x32xf32, #tpu.memory_space<vmem>>, %arg6: memref<1x1x32xf32, #tpu.memory_space<vmem>>, %arg7: memref<1x1x32xf32, #tpu.memory_space<vmem>>, %arg8: memref<1x32x64xbf16, #tpu.memory_space<vmem>>, %arg9: memref<1x1x64xf32, #tpu.memory_space<vmem>>, %arg10: memref<1x64x32xbf16, #tpu.memory_space<vmem>>, %arg11: memref<1x1x32xf32, #tpu.memory_space<vmem>>, %arg12: memref<1x1x32xf32, #tpu.memory_space<vmem>>, %arg13: memref<1x1x32xf32, #tpu.memory_space<vmem>>, %arg14: memref<2x8x32xf32, #tpu.memory_space<vmem>>, %arg15: memref<2x8x32xf32, #tpu.memory_space<vmem>>) attributes {dimension_semantics = [#tpu.dimension_semantics<arbitrary>], iteration_bounds = array<i64: 2>, scalar_prefetch = 0 : i64, scratch_operands = 1 : i64, tpu.core_type = #tpu.core_type<tc>, window_params = [{pipeline_mode = #tpu.pipeline_mode<synchronous>, transform_indices = @transform_0, window_bounds = array<i64: 2, 8, 32>}, {transform_indices = @transform_1, window_bounds = array<i64: 1, 32, 96>}, {transform_indices = @transform_2, window_bounds = array<i64: 1, 1, 96>}, {transform_indices = @transform_3, window_bounds = array<i64: 1, 4, 8, 32>}, {transform_indices = @transform_4, window_bounds = array<i64: 1, 1, 32>}, {transform_indices = @transform_5, window_bounds = array<i64: 1, 1, 32>}, {transform_indices = @transform_6, window_bounds = array<i64: 1, 1, 32>}, {transform_indices = @transform_7, window_bounds = array<i64: 1, 32, 64>}, {transform_indices = @transform_8, window_bounds = array<i64: 1, 1, 64>}, {transform_indices = @transform_9, window_bounds = array<i64: 1, 64, 32>}, {transform_indices = @transform_10, window_bounds = array<i64: 1, 1, 32>}, {transform_indices = @transform_11, window_bounds = array<i64: 1, 1, 32>}, {transform_indices = @transform_12, window_bounds = array<i64: 1, 1, 32>}, {pipeline_mode = #tpu.pipeline_mode<synchronous>, transform_indices = @transform_13, window_bounds = array<i64: 2, 8, 32>}]} {
    %c0_i32 = arith.constant 0 : i32
    %0 = arith.cmpi eq, %arg0, %c0_i32 : i32
    %1 = arith.extui %0 : i1 to i32
    %c0_i32_0 = arith.constant 0 : i32
    %2 = arith.cmpi ne, %1, %c0_i32_0 : i32
    scf.if %2 {
      %c0_69 = arith.constant 0 : index
      %c0_70 = arith.constant 0 : index
      %c0_71 = arith.constant 0 : index
      %217 = vector.load %arg1[%c0_69, %c0_70, %c0_71] : memref<2x8x32xf32, #tpu.memory_space<vmem>>, vector<2x8x32xf32>
      %c0_72 = arith.constant 0 : index
      %c0_73 = arith.constant 0 : index
      %c0_74 = arith.constant 0 : index
      %218 = vector.load %arg15[%c0_72, %c0_73, %c0_74] : memref<2x8x32xf32, #tpu.memory_space<vmem>>, vector<2x8x32xf32>
      tpu.vector_store %arg15[%c0_72, %c0_73, %c0_74], %217 {strides = array<i32>} : memref<2x8x32xf32, #tpu.memory_space<vmem>>, vector<2x8x32xf32>,
    } else {
    }
    %c0 = arith.constant 0 : index
    %c0_1 = arith.constant 0 : index
    %c0_2 = arith.constant 0 : index
    %3 = vector.load %arg15[%c0, %c0_1, %c0_2] : memref<2x8x32xf32, #tpu.memory_space<vmem>>, vector<2x8x32xf32>
    %4 = vector.shape_cast %3 : vector<2x8x32xf32> to vector<16x32xf32>
    %c0_3 = arith.constant 0 : index
    %c0_4 = arith.constant 0 : index
    %c0_5 = arith.constant 0 : index
    %5 = vector.load %arg2[%c0_3, %c0_4, %c0_5] : memref<1x32x96xbf16, #tpu.memory_space<vmem>>, vector<1x32x96xbf16>
    %6 = vector.shape_cast %5 : vector<1x32x96xbf16> to vector<32x96xbf16>
    %7 = arith.truncf %4 : vector<16x32xf32> to vector<16x32xbf16>
    %cst = arith.constant dense<0.000000e+00> : vector<16x96xf32>
    %8 = tpu.matmul %7, %6, %cst {dimension_numbers = #tpu.dot_dimension_numbers<[1], [0], [0], [1], [0, 0, 1, 1], [], []>} : vector<16x32xbf16>, vector<32x96xbf16>, vector<16x96xf32> -> vector<16x96xf32>
    %c0_6 = arith.constant 0 : index
    %c0_7 = arith.constant 0 : index
    %c0_8 = arith.constant 0 : index
    %9 = vector.load %arg3[%c0_6, %c0_7, %c0_8] : memref<1x1x96xf32, #tpu.memory_space<vmem>>, vector<1x1x96xf32>
    %10 = vector.shape_cast %9 : vector<1x1x96xf32> to vector<1x96xf32>
    %11 = vector.broadcast %10 : vector<1x96xf32> to vector<16x96xf32>
    %12 = arith.addf %8, %11 : vector<16x96xf32>
    %13 = vector.shape_cast %12 : vector<16x96xf32> to vector<2x8x96xf32>
    %14 = vector.extract_strided_slice %13 {offsets = [0, 0, 0], sizes = [2, 8, 32], strides = [1, 1, 1]} : vector<2x8x96xf32> to vector<2x8x32xf32>
    %15 = vector.extract_strided_slice %13 {offsets = [0, 0, 32], sizes = [2, 8, 32], strides = [1, 1, 1]} : vector<2x8x96xf32> to vector<2x8x32xf32>
    %16 = vector.extract_strided_slice %13 {offsets = [0, 0, 64], sizes = [2, 8, 32], strides = [1, 1, 1]} : vector<2x8x96xf32> to vector<2x8x32xf32>
    %c0_9 = arith.constant 0 : index
    %c0_10 = arith.constant 0 : index
    %c0_11 = arith.constant 0 : index
    %c0_12 = arith.constant 0 : index
    %17 = vector.load %arg4[%c0_9, %c0_10, %c0_11, %c0_12] : memref<1x4x8x32xbf16, #tpu.memory_space<vmem>>, vector<1x4x8x32xbf16>
    %18 = vector.shape_cast %17 : vector<1x4x8x32xbf16> to vector<4x8x32xbf16>
    %c0_13 = arith.constant 0 : index
    %c0_14 = arith.constant 0 : index
    %c0_15 = arith.constant 0 : index
    %19 = vector.load %arg5[%c0_13, %c0_14, %c0_15] : memref<1x1x32xf32, #tpu.memory_space<vmem>>, vector<1x1x32xf32>
    %20 = vector.shape_cast %19 : vector<1x1x32xf32> to vector<1x32xf32>
    %21 = vector.extract_strided_slice %14 {offsets = [0, 0, 0], sizes = [1, 8, 8], strides = [1, 1, 1]} : vector<2x8x32xf32> to vector<1x8x8xf32>
    %22 = vector.shape_cast %21 : vector<1x8x8xf32> to vector<8x8xf32>
    %23 = vector.extract_strided_slice %14 {offsets = [0, 0, 8], sizes = [1, 8, 8], strides = [1, 1, 1]} : vector<2x8x32xf32> to vector<1x8x8xf32>
    %24 = vector.shape_cast %23 : vector<1x8x8xf32> to vector<8x8xf32>
    %25 = vector.extract_strided_slice %14 {offsets = [0, 0, 16], sizes = [1, 8, 8], strides = [1, 1, 1]} : vector<2x8x32xf32> to vector<1x8x8xf32>
    %26 = vector.shape_cast %25 : vector<1x8x8xf32> to vector<8x8xf32>
    %27 = vector.extract_strided_slice %14 {offsets = [0, 0, 24], sizes = [1, 8, 8], strides = [1, 1, 1]} : vector<2x8x32xf32> to vector<1x8x8xf32>
    %28 = vector.shape_cast %27 : vector<1x8x8xf32> to vector<8x8xf32>
    %29 = vector.shape_cast %22 : vector<8x8xf32> to vector<1x8x8xf32>
    %30 = vector.shape_cast %24 : vector<8x8xf32> to vector<1x8x8xf32>
    %31 = vector.shape_cast %26 : vector<8x8xf32> to vector<1x8x8xf32>
    %32 = vector.shape_cast %28 : vector<8x8xf32> to vector<1x8x8xf32>
    %33 = tpu.concatenate %29, %30, %31, %32 in 0 : vector<1x8x8xf32>, vector<1x8x8xf32>, vector<1x8x8xf32>, vector<1x8x8xf32> -> vector<4x8x8xf32>
    %34 = arith.truncf %33 : vector<4x8x8xf32> to vector<4x8x8xbf16>
    %35 = vector.extract_strided_slice %15 {offsets = [0, 0, 0], sizes = [1, 8, 8], strides = [1, 1, 1]} : vector<2x8x32xf32> to vector<1x8x8xf32>
    %36 = vector.shape_cast %35 : vector<1x8x8xf32> to vector<8x8xf32>
    %37 = vector.extract_strided_slice %15 {offsets = [0, 0, 8], sizes = [1, 8, 8], strides = [1, 1, 1]} : vector<2x8x32xf32> to vector<1x8x8xf32>
    %38 = vector.shape_cast %37 : vector<1x8x8xf32> to vector<8x8xf32>
    %39 = vector.extract_strided_slice %15 {offsets = [0, 0, 16], sizes = [1, 8, 8], strides = [1, 1, 1]} : vector<2x8x32xf32> to vector<1x8x8xf32>
    %40 = vector.shape_cast %39 : vector<1x8x8xf32> to vector<8x8xf32>
    %41 = vector.extract_strided_slice %15 {offsets = [0, 0, 24], sizes = [1, 8, 8], strides = [1, 1, 1]} : vector<2x8x32xf32> to vector<1x8x8xf32>
    %42 = vector.shape_cast %41 : vector<1x8x8xf32> to vector<8x8xf32>
    %43 = vector.shape_cast %36 : vector<8x8xf32> to vector<1x8x8xf32>
    %44 = vector.shape_cast %38 : vector<8x8xf32> to vector<1x8x8xf32>
    %45 = vector.shape_cast %40 : vector<8x8xf32> to vector<1x8x8xf32>
    %46 = vector.shape_cast %42 : vector<8x8xf32> to vector<1x8x8xf32>
    %47 = tpu.concatenate %43, %44, %45, %46 in 0 : vector<1x8x8xf32>, vector<1x8x8xf32>, vector<1x8x8xf32>, vector<1x8x8xf32> -> vector<4x8x8xf32>
    %48 = arith.truncf %47 : vector<4x8x8xf32> to vector<4x8x8xbf16>
    %49 = vector.extract_strided_slice %16 {offsets = [0, 0, 0], sizes = [1, 8, 8], strides = [1, 1, 1]} : vector<2x8x32xf32> to vector<1x8x8xf32>
    %50 = vector.shape_cast %49 : vector<1x8x8xf32> to vector<8x8xf32>
    %51 = vector.extract_strided_slice %16 {offsets = [0, 0, 8], sizes = [1, 8, 8], strides = [1, 1, 1]} : vector<2x8x32xf32> to vector<1x8x8xf32>
    %52 = vector.shape_cast %51 : vector<1x8x8xf32> to vector<8x8xf32>
    %53 = vector.extract_strided_slice %16 {offsets = [0, 0, 16], sizes = [1, 8, 8], strides = [1, 1, 1]} : vector<2x8x32xf32> to vector<1x8x8xf32>
    %54 = vector.shape_cast %53 : vector<1x8x8xf32> to vector<8x8xf32>
    %55 = vector.extract_strided_slice %16 {offsets = [0, 0, 24], sizes = [1, 8, 8], strides = [1, 1, 1]} : vector<2x8x32xf32> to vector<1x8x8xf32>
    %56 = vector.shape_cast %55 : vector<1x8x8xf32> to vector<8x8xf32>
    %57 = vector.shape_cast %50 : vector<8x8xf32> to vector<1x8x8xf32>
    %58 = vector.shape_cast %52 : vector<8x8xf32> to vector<1x8x8xf32>
    %59 = vector.shape_cast %54 : vector<8x8xf32> to vector<1x8x8xf32>
    %60 = vector.shape_cast %56 : vector<8x8xf32> to vector<1x8x8xf32>
    %61 = tpu.concatenate %57, %58, %59, %60 in 0 : vector<1x8x8xf32>, vector<1x8x8xf32>, vector<1x8x8xf32>, vector<1x8x8xf32> -> vector<4x8x8xf32>
    %62 = arith.truncf %61 : vector<4x8x8xf32> to vector<4x8x8xbf16>
    "tpu.trace_start"() <{level = 10 : i32, message = "hqd,hkd->hqk"}> : () -> ()
    %cst_16 = arith.constant dense<0.000000e+00> : vector<4x8x8xf32>
    %63 = tpu.matmul %34, %48, %cst_16 {dimension_numbers = #tpu.dot_dimension_numbers<[2], [2], [1], [1], [0, 0, 0, 1, 1, 1], [0], [0]>} : vector<4x8x8xbf16>, vector<4x8x8xbf16>, vector<4x8x8xf32> -> vector<4x8x8xf32>
    "tpu.trace_stop"() : () -> ()
    %cst_17 = arith.constant dense<0xFF800000> : vector<4x8xf32>
    %64 = vector.multi_reduction <maximumf>, %63, %cst_17 [2] : vector<4x8x8xf32> to vector<4x8xf32>
    %65 = vector.shape_cast %64 : vector<4x8xf32> to vector<4x8x1xf32>
    %66 = vector.broadcast %65 : vector<4x8x1xf32> to vector<4x8x8xf32>
    %67 = arith.subf %63, %66 : vector<4x8x8xf32>
    %68 = math.exp %67 : vector<4x8x8xf32>
    %cst_18 = arith.constant dense<0.000000e+00> : vector<4x8xf32>
    %69 = vector.multi_reduction <add>, %68, %cst_18 [2] : vector<4x8x8xf32> to vector<4x8xf32>
    %70 = vector.shape_cast %69 : vector<4x8xf32> to vector<4x8x1xf32>
    %71 = tpu.reciprocal %70 {approx = true} : vector<4x8x1xf32> -> vector<4x8x1xf32>
    %72 = vector.broadcast %71 : vector<4x8x1xf32> to vector<4x8x8xf32>
    %73 = arith.mulf %68, %72 : vector<4x8x8xf32>
    %74 = arith.truncf %73 : vector<4x8x8xf32> to vector<4x8x8xbf16>
    "tpu.trace_start"() <{level = 10 : i32, message = "hqk,hkd->hqd"}> : () -> ()
    %cst_19 = arith.constant dense<0.000000e+00> : vector<4x8x8xf32>
    %75 = tpu.matmul %74, %62, %cst_19 {dimension_numbers = #tpu.dot_dimension_numbers<[2], [1], [1], [2], [0, 0, 0, 1, 1, 2], [0], [0]>} : vector<4x8x8xbf16>, vector<4x8x8xbf16>, vector<4x8x8xf32> -> vector<4x8x8xf32>
    "tpu.trace_stop"() : () -> ()
    %76 = arith.truncf %75 : vector<4x8x8xf32> to vector<4x8x8xbf16>
    "tpu.trace_start"() <{level = 10 : i32, message = "hqd,hde->hqe"}> : () -> ()
    %cst_20 = arith.constant dense<0.000000e+00> : vector<4x8x32xf32>
    %77 = tpu.matmul %76, %18, %cst_20 {dimension_numbers = #tpu.dot_dimension_numbers<[2], [1], [1], [2], [0, 0, 0, 1, 1, 2], [0], [0]>} : vector<4x8x8xbf16>, vector<4x8x32xbf16>, vector<4x8x32xf32> -> vector<4x8x32xf32>
    "tpu.trace_stop"() : () -> ()
    %cst_21 = arith.constant dense<0.000000e+00> : vector<8x32xf32>
    %78 = vector.multi_reduction <add>, %77, %cst_21 [0] : vector<4x8x32xf32> to vector<8x32xf32>
    %79 = vector.extract_strided_slice %14 {offsets = [1, 0, 0], sizes = [1, 8, 8], strides = [1, 1, 1]} : vector<2x8x32xf32> to vector<1x8x8xf32>
    %80 = vector.shape_cast %79 : vector<1x8x8xf32> to vector<8x8xf32>
    %81 = vector.extract_strided_slice %14 {offsets = [1, 0, 8], sizes = [1, 8, 8], strides = [1, 1, 1]} : vector<2x8x32xf32> to vector<1x8x8xf32>
    %82 = vector.shape_cast %81 : vector<1x8x8xf32> to vector<8x8xf32>
    %83 = vector.extract_strided_slice %14 {offsets = [1, 0, 16], sizes = [1, 8, 8], strides = [1, 1, 1]} : vector<2x8x32xf32> to vector<1x8x8xf32>
    %84 = vector.shape_cast %83 : vector<1x8x8xf32> to vector<8x8xf32>
    %85 = vector.extract_strided_slice %14 {offsets = [1, 0, 24], sizes = [1, 8, 8], strides = [1, 1, 1]} : vector<2x8x32xf32> to vector<1x8x8xf32>
    %86 = vector.shape_cast %85 : vector<1x8x8xf32> to vector<8x8xf32>
    %87 = vector.shape_cast %80 : vector<8x8xf32> to vector<1x8x8xf32>
    %88 = vector.shape_cast %82 : vector<8x8xf32> to vector<1x8x8xf32>
    %89 = vector.shape_cast %84 : vector<8x8xf32> to vector<1x8x8xf32>
    %90 = vector.shape_cast %86 : vector<8x8xf32> to vector<1x8x8xf32>
    %91 = tpu.concatenate %87, %88, %89, %90 in 0 : vector<1x8x8xf32>, vector<1x8x8xf32>, vector<1x8x8xf32>, vector<1x8x8xf32> -> vector<4x8x8xf32>
    %92 = arith.truncf %91 : vector<4x8x8xf32> to vector<4x8x8xbf16>
    %93 = vector.extract_strided_slice %15 {offsets = [1, 0, 0], sizes = [1, 8, 8], strides = [1, 1, 1]} : vector<2x8x32xf32> to vector<1x8x8xf32>
    %94 = vector.shape_cast %93 : vector<1x8x8xf32> to vector<8x8xf32>
    %95 = vector.extract_strided_slice %15 {offsets = [1, 0, 8], sizes = [1, 8, 8], strides = [1, 1, 1]} : vector<2x8x32xf32> to vector<1x8x8xf32>
    %96 = vector.shape_cast %95 : vector<1x8x8xf32> to vector<8x8xf32>
    %97 = vector.extract_strided_slice %15 {offsets = [1, 0, 16], sizes = [1, 8, 8], strides = [1, 1, 1]} : vector<2x8x32xf32> to vector<1x8x8xf32>
    %98 = vector.shape_cast %97 : vector<1x8x8xf32> to vector<8x8xf32>
    %99 = vector.extract_strided_slice %15 {offsets = [1, 0, 24], sizes = [1, 8, 8], strides = [1, 1, 1]} : vector<2x8x32xf32> to vector<1x8x8xf32>
    %100 = vector.shape_cast %99 : vector<1x8x8xf32> to vector<8x8xf32>
    %101 = vector.shape_cast %94 : vector<8x8xf32> to vector<1x8x8xf32>
    %102 = vector.shape_cast %96 : vector<8x8xf32> to vector<1x8x8xf32>
    %103 = vector.shape_cast %98 : vector<8x8xf32> to vector<1x8x8xf32>
    %104 = vector.shape_cast %100 : vector<8x8xf32> to vector<1x8x8xf32>
    %105 = tpu.concatenate %101, %102, %103, %104 in 0 : vector<1x8x8xf32>, vector<1x8x8xf32>, vector<1x8x8xf32>, vector<1x8x8xf32> -> vector<4x8x8xf32>
    %106 = arith.truncf %105 : vector<4x8x8xf32> to vector<4x8x8xbf16>
    %107 = vector.extract_strided_slice %16 {offsets = [1, 0, 0], sizes = [1, 8, 8], strides = [1, 1, 1]} : vector<2x8x32xf32> to vector<1x8x8xf32>
    %108 = vector.shape_cast %107 : vector<1x8x8xf32> to vector<8x8xf32>
    %109 = vector.extract_strided_slice %16 {offsets = [1, 0, 8], sizes = [1, 8, 8], strides = [1, 1, 1]} : vector<2x8x32xf32> to vector<1x8x8xf32>
    %110 = vector.shape_cast %109 : vector<1x8x8xf32> to vector<8x8xf32>
    %111 = vector.extract_strided_slice %16 {offsets = [1, 0, 16], sizes = [1, 8, 8], strides = [1, 1, 1]} : vector<2x8x32xf32> to vector<1x8x8xf32>
    %112 = vector.shape_cast %111 : vector<1x8x8xf32> to vector<8x8xf32>
    %113 = vector.extract_strided_slice %16 {offsets = [1, 0, 24], sizes = [1, 8, 8], strides = [1, 1, 1]} : vector<2x8x32xf32> to vector<1x8x8xf32>
    %114 = vector.shape_cast %113 : vector<1x8x8xf32> to vector<8x8xf32>
    %115 = vector.shape_cast %108 : vector<8x8xf32> to vector<1x8x8xf32>
    %116 = vector.shape_cast %110 : vector<8x8xf32> to vector<1x8x8xf32>
    %117 = vector.shape_cast %112 : vector<8x8xf32> to vector<1x8x8xf32>
    %118 = vector.shape_cast %114 : vector<8x8xf32> to vector<1x8x8xf32>
    %119 = tpu.concatenate %115, %116, %117, %118 in 0 : vector<1x8x8xf32>, vector<1x8x8xf32>, vector<1x8x8xf32>, vector<1x8x8xf32> -> vector<4x8x8xf32>
    %120 = arith.truncf %119 : vector<4x8x8xf32> to vector<4x8x8xbf16>
    "tpu.trace_start"() <{level = 10 : i32, message = "hqd,hkd->hqk"}> : () -> ()
    %cst_22 = arith.constant dense<0.000000e+00> : vector<4x8x8xf32>
    %121 = tpu.matmul %92, %106, %cst_22 {dimension_numbers = #tpu.dot_dimension_numbers<[2], [2], [1], [1], [0, 0, 0, 1, 1, 1], [0], [0]>} : vector<4x8x8xbf16>, vector<4x8x8xbf16>, vector<4x8x8xf32> -> vector<4x8x8xf32>
    "tpu.trace_stop"() : () -> ()
    %cst_23 = arith.constant dense<0xFF800000> : vector<4x8xf32>
    %122 = vector.multi_reduction <maximumf>, %121, %cst_23 [2] : vector<4x8x8xf32> to vector<4x8xf32>
    %123 = vector.shape_cast %122 : vector<4x8xf32> to vector<4x8x1xf32>
    %124 = vector.broadcast %123 : vector<4x8x1xf32> to vector<4x8x8xf32>
    %125 = arith.subf %121, %124 : vector<4x8x8xf32>
    %126 = math.exp %125 : vector<4x8x8xf32>
    %cst_24 = arith.constant dense<0.000000e+00> : vector<4x8xf32>
    %127 = vector.multi_reduction <add>, %126, %cst_24 [2] : vector<4x8x8xf32> to vector<4x8xf32>
    %128 = vector.shape_cast %127 : vector<4x8xf32> to vector<4x8x1xf32>
    %129 = tpu.reciprocal %128 {approx = true} : vector<4x8x1xf32> -> vector<4x8x1xf32>
    %130 = vector.broadcast %129 : vector<4x8x1xf32> to vector<4x8x8xf32>
    %131 = arith.mulf %126, %130 : vector<4x8x8xf32>
    %132 = arith.truncf %131 : vector<4x8x8xf32> to vector<4x8x8xbf16>
    "tpu.trace_start"() <{level = 10 : i32, message = "hqk,hkd->hqd"}> : () -> ()
    %cst_25 = arith.constant dense<0.000000e+00> : vector<4x8x8xf32>
    %133 = tpu.matmul %132, %120, %cst_25 {dimension_numbers = #tpu.dot_dimension_numbers<[2], [1], [1], [2], [0, 0, 0, 1, 1, 2], [0], [0]>} : vector<4x8x8xbf16>, vector<4x8x8xbf16>, vector<4x8x8xf32> -> vector<4x8x8xf32>
    "tpu.trace_stop"() : () -> ()
    %134 = arith.truncf %133 : vector<4x8x8xf32> to vector<4x8x8xbf16>
    "tpu.trace_start"() <{level = 10 : i32, message = "hqd,hde->hqe"}> : () -> ()
    %cst_26 = arith.constant dense<0.000000e+00> : vector<4x8x32xf32>
    %135 = tpu.matmul %134, %18, %cst_26 {dimension_numbers = #tpu.dot_dimension_numbers<[2], [1], [1], [2], [0, 0, 0, 1, 1, 2], [0], [0]>} : vector<4x8x8xbf16>, vector<4x8x32xbf16>, vector<4x8x32xf32> -> vector<4x8x32xf32>
    "tpu.trace_stop"() : () -> ()
    %cst_27 = arith.constant dense<0.000000e+00> : vector<8x32xf32>
    %136 = vector.multi_reduction <add>, %135, %cst_27 [0] : vector<4x8x32xf32> to vector<8x32xf32>
    %137 = tpu.concatenate %78, %136 in 0 : vector<8x32xf32>, vector<8x32xf32> -> vector<16x32xf32>
    %138 = vector.broadcast %20 : vector<1x32xf32> to vector<16x32xf32>
    %139 = arith.addf %137, %138 : vector<16x32xf32>
    %140 = arith.addf %4, %139 : vector<16x32xf32>
    %c0_28 = arith.constant 0 : index
    %c0_29 = arith.constant 0 : index
    %c0_30 = arith.constant 0 : index
    %141 = vector.load %arg6[%c0_28, %c0_29, %c0_30] : memref<1x1x32xf32, #tpu.memory_space<vmem>>, vector<1x1x32xf32>
    %142 = vector.shape_cast %141 : vector<1x1x32xf32> to vector<1x32xf32>
    %c0_31 = arith.constant 0 : index
    %c0_32 = arith.constant 0 : index
    %c0_33 = arith.constant 0 : index
    %143 = vector.load %arg7[%c0_31, %c0_32, %c0_33] : memref<1x1x32xf32, #tpu.memory_space<vmem>>, vector<1x1x32xf32>
    %144 = vector.shape_cast %143 : vector<1x1x32xf32> to vector<1x32xf32>
    %cst_34 = arith.constant dense<0.000000e+00> : vector<16xf32>
    %145 = vector.multi_reduction <add>, %140, %cst_34 [1] : vector<16x32xf32> to vector<16xf32>
    %146 = vector.shape_cast %145 : vector<16xf32> to vector<16x1xf32>
    %cst_35 = arith.constant 3.200000e+01 : f32
    %147 = vector.broadcast %cst_35 : f32 to vector<16x1xf32>
    %148 = arith.divf %146, %147 : vector<16x1xf32>
    %149 = vector.broadcast %148 : vector<16x1xf32> to vector<16x32xf32>
    %150 = arith.subf %140, %149 : vector<16x32xf32>
    %151 = arith.mulf %150, %150 : vector<16x32xf32>
    %cst_36 = arith.constant dense<0.000000e+00> : vector<16xf32>
    %152 = vector.multi_reduction <add>, %151, %cst_36 [1] : vector<16x32xf32> to vector<16xf32>
    %153 = vector.shape_cast %152 : vector<16xf32> to vector<16x1xf32>
    %cst_37 = arith.constant 3.200000e+01 : f32
    %154 = vector.broadcast %cst_37 : f32 to vector<16x1xf32>
    %155 = arith.divf %153, %154 : vector<16x1xf32>
    %156 = vector.broadcast %148 : vector<16x1xf32> to vector<16x32xf32>
    %157 = arith.subf %140, %156 : vector<16x32xf32>
    %cst_38 = arith.constant 9.99999974E-6 : f32
    %158 = vector.broadcast %cst_38 : f32 to vector<16x1xf32>
    %159 = arith.addf %155, %158 : vector<16x1xf32>
    %160 = math.rsqrt %159 : vector<16x1xf32>
    %161 = vector.broadcast %160 : vector<16x1xf32> to vector<16x32xf32>
    %162 = arith.mulf %157, %161 : vector<16x32xf32>
    %163 = vector.broadcast %142 : vector<1x32xf32> to vector<16x32xf32>
    %164 = arith.mulf %162, %163 : vector<16x32xf32>
    %165 = vector.broadcast %144 : vector<1x32xf32> to vector<16x32xf32>
    %166 = arith.addf %164, %165 : vector<16x32xf32>
    %c0_39 = arith.constant 0 : index
    %c0_40 = arith.constant 0 : index
    %c0_41 = arith.constant 0 : index
    %167 = vector.load %arg8[%c0_39, %c0_40, %c0_41] : memref<1x32x64xbf16, #tpu.memory_space<vmem>>, vector<1x32x64xbf16>
    %168 = vector.shape_cast %167 : vector<1x32x64xbf16> to vector<32x64xbf16>
    %169 = arith.truncf %166 : vector<16x32xf32> to vector<16x32xbf16>
    %cst_42 = arith.constant dense<0.000000e+00> : vector<16x64xf32>
    %170 = tpu.matmul %169, %168, %cst_42 {dimension_numbers = #tpu.dot_dimension_numbers<[1], [0], [0], [1], [0, 0, 1, 1], [], []>} : vector<16x32xbf16>, vector<32x64xbf16>, vector<16x64xf32> -> vector<16x64xf32>
    %c0_43 = arith.constant 0 : index
    %c0_44 = arith.constant 0 : index
    %c0_45 = arith.constant 0 : index
    %171 = vector.load %arg9[%c0_43, %c0_44, %c0_45] : memref<1x1x64xf32, #tpu.memory_space<vmem>>, vector<1x1x64xf32>
    %172 = vector.shape_cast %171 : vector<1x1x64xf32> to vector<1x64xf32>
    %173 = vector.broadcast %172 : vector<1x64xf32> to vector<16x64xf32>
    %174 = arith.addf %170, %173 : vector<16x64xf32>
    %cst_46 = arith.constant 0.000000e+00 : f32
    %175 = vector.broadcast %cst_46 : f32 to vector<16x64xf32>
    %176 = arith.maximumf %174, %175 : vector<16x64xf32>
    %c0_47 = arith.constant 0 : index
    %c0_48 = arith.constant 0 : index
    %c0_49 = arith.constant 0 : index
    %177 = vector.load %arg10[%c0_47, %c0_48, %c0_49] : memref<1x64x32xbf16, #tpu.memory_space<vmem>>, vector<1x64x32xbf16>
    %178 = vector.shape_cast %177 : vector<1x64x32xbf16> to vector<64x32xbf16>
    %179 = arith.truncf %176 : vector<16x64xf32> to vector<16x64xbf16>
    %cst_50 = arith.constant dense<0.000000e+00> : vector<16x32xf32>
    %180 = tpu.matmul %179, %178, %cst_50 {dimension_numbers = #tpu.dot_dimension_numbers<[1], [0], [0], [1], [0, 0, 1, 1], [], []>} : vector<16x64xbf16>, vector<64x32xbf16>, vector<16x32xf32> -> vector<16x32xf32>
    %c0_51 = arith.constant 0 : index
    %c0_52 = arith.constant 0 : index
    %c0_53 = arith.constant 0 : index
    %181 = vector.load %arg11[%c0_51, %c0_52, %c0_53] : memref<1x1x32xf32, #tpu.memory_space<vmem>>, vector<1x1x32xf32>
    %182 = vector.shape_cast %181 : vector<1x1x32xf32> to vector<1x32xf32>
    %183 = vector.broadcast %182 : vector<1x32xf32> to vector<16x32xf32>
    %184 = arith.addf %180, %183 : vector<16x32xf32>
    %185 = arith.addf %166, %184 : vector<16x32xf32>
    %c0_54 = arith.constant 0 : index
    %c0_55 = arith.constant 0 : index
    %c0_56 = arith.constant 0 : index
    %186 = vector.load %arg12[%c0_54, %c0_55, %c0_56] : memref<1x1x32xf32, #tpu.memory_space<vmem>>, vector<1x1x32xf32>
    %187 = vector.shape_cast %186 : vector<1x1x32xf32> to vector<1x32xf32>
    %c0_57 = arith.constant 0 : index
    %c0_58 = arith.constant 0 : index
    %c0_59 = arith.constant 0 : index
    %188 = vector.load %arg13[%c0_57, %c0_58, %c0_59] : memref<1x1x32xf32, #tpu.memory_space<vmem>>, vector<1x1x32xf32>
    %189 = vector.shape_cast %188 : vector<1x1x32xf32> to vector<1x32xf32>
    %cst_60 = arith.constant dense<0.000000e+00> : vector<16xf32>
    %190 = vector.multi_reduction <add>, %185, %cst_60 [1] : vector<16x32xf32> to vector<16xf32>
    %191 = vector.shape_cast %190 : vector<16xf32> to vector<16x1xf32>
    %cst_61 = arith.constant 3.200000e+01 : f32
    %192 = vector.broadcast %cst_61 : f32 to vector<16x1xf32>
    %193 = arith.divf %191, %192 : vector<16x1xf32>
    %194 = vector.broadcast %193 : vector<16x1xf32> to vector<16x32xf32>
    %195 = arith.subf %185, %194 : vector<16x32xf32>
    %196 = arith.mulf %195, %195 : vector<16x32xf32>
    %cst_62 = arith.constant dense<0.000000e+00> : vector<16xf32>
    %197 = vector.multi_reduction <add>, %196, %cst_62 [1] : vector<16x32xf32> to vector<16xf32>
    %198 = vector.shape_cast %197 : vector<16xf32> to vector<16x1xf32>
    %cst_63 = arith.constant 3.200000e+01 : f32
    %199 = vector.broadcast %cst_63 : f32 to vector<16x1xf32>
    %200 = arith.divf %198, %199 : vector<16x1xf32>
    %201 = vector.broadcast %193 : vector<16x1xf32> to vector<16x32xf32>
    %202 = arith.subf %185, %201 : vector<16x32xf32>
    %cst_64 = arith.constant 9.99999974E-6 : f32
    %203 = vector.broadcast %cst_64 : f32 to vector<16x1xf32>
    %204 = arith.addf %200, %203 : vector<16x1xf32>
    %205 = math.rsqrt %204 : vector<16x1xf32>
    %206 = vector.broadcast %205 : vector<16x1xf32> to vector<16x32xf32>
    %207 = arith.mulf %202, %206 : vector<16x32xf32>
    %208 = vector.broadcast %187 : vector<1x32xf32> to vector<16x32xf32>
    %209 = arith.mulf %207, %208 : vector<16x32xf32>
    %210 = vector.broadcast %189 : vector<1x32xf32> to vector<16x32xf32>
    %211 = arith.addf %209, %210 : vector<16x32xf32>
    %212 = vector.shape_cast %211 : vector<16x32xf32> to vector<2x8x32xf32>
    %c0_65 = arith.constant 0 : index
    %c0_66 = arith.constant 0 : index
    %c0_67 = arith.constant 0 : index
    %213 = vector.load %arg15[%c0_65, %c0_66, %c0_67] : memref<2x8x32xf32, #tpu.memory_space<vmem>>, vector<2x8x32xf32>
    tpu.vector_store %arg15[%c0_65, %c0_66, %c0_67], %212 {strides = array<i32>} : memref<2x8x32xf32, #tpu.memory_space<vmem>>, vector<2x8x32xf32>,
    %c1_i32 = arith.constant 1 : i32
    %214 = arith.cmpi eq, %arg0, %c1_i32 : i32
    %215 = arith.extui %214 : i1 to i32
    %c0_i32_68 = arith.constant 0 : i32
    %216 = arith.cmpi ne, %215, %c0_i32_68 : i32
    scf.if %216 {
      %c0_69 = arith.constant 0 : index
      %c0_70 = arith.constant 0 : index
      %c0_71 = arith.constant 0 : index
      %217 = vector.load %arg14[%c0_69, %c0_70, %c0_71] : memref<2x8x32xf32, #tpu.memory_space<vmem>>, vector<2x8x32xf32>
      tpu.vector_store %arg14[%c0_69, %c0_70, %c0_71], %212 {strides = array<i32>} : memref<2x8x32xf32, #tpu.memory_space<vmem>>, vector<2x8x32xf32>,
    } else {
    }
    return
  }
  func.func @transform_0(%arg0: i32) -> (i32, i32, i32) {
    %c0_i32 = arith.constant 0 : i32
    %c0_i32_0 = arith.constant 0 : i32
    %c0_i32_1 = arith.constant 0 : i32
    %c0_i32_2 = arith.constant 0 : i32
    return %c0_i32, %c0_i32_0, %c0_i32_1 : i32, i32, i32
  }
  func.func @transform_1(%arg0: i32) -> (i32, i32, i32) {
    %c0_i32 = arith.constant 0 : i32
    %c0_i32_0 = arith.constant 0 : i32
    %c0_i32_1 = arith.constant 0 : i32
    return %arg0, %c0_i32, %c0_i32_0 : i32, i32, i32
  }
  func.func @transform_2(%arg0: i32) -> (i32, i32, i32) {
    %c0_i32 = arith.constant 0 : i32
    %c0_i32_0 = arith.constant 0 : i32
    %c0_i32_1 = arith.constant 0 : i32
    return %arg0, %c0_i32, %c0_i32_0 : i32, i32, i32
  }
  func.func @transform_3(%arg0: i32) -> (i32, i32, i32, i32) {
    %c0_i32 = arith.constant 0 : i32
    %c0_i32_0 = arith.constant 0 : i32
    %c0_i32_1 = arith.constant 0 : i32
    %c0_i32_2 = arith.constant 0 : i32
    return %arg0, %c0_i32, %c0_i32_0, %c0_i32_1 : i32, i32, i32, i32
  }
  func.func @transform_4(%arg0: i32) -> (i32, i32, i32) {
    %c0_i32 = arith.constant 0 : i32
    %c0_i32_0 = arith.constant 0 : i32
    %c0_i32_1 = arith.constant 0 : i32
    return %arg0, %c0_i32, %c0_i32_0 : i32, i32, i32
  }
  func.func @transform_5(%arg0: i32) -> (i32, i32, i32) {
    %c0_i32 = arith.constant 0 : i32
    %c0_i32_0 = arith.constant 0 : i32
    %c0_i32_1 = arith.constant 0 : i32
    return %arg0, %c0_i32, %c0_i32_0 : i32, i32, i32
  }
  func.func @transform_6(%arg0: i32) -> (i32, i32, i32) {
    %c0_i32 = arith.constant 0 : i32
    %c0_i32_0 = arith.constant 0 : i32
    %c0_i32_1 = arith.constant 0 : i32
    return %arg0, %c0_i32, %c0_i32_0 : i32, i32, i32
  }
  func.func @transform_7(%arg0: i32) -> (i32, i32, i32) {
    %c0_i32 = arith.constant 0 : i32
    %c0_i32_0 = arith.constant 0 : i32
    %c0_i32_1 = arith.constant 0 : i32
    return %arg0, %c0_i32, %c0_i32_0 : i32, i32, i32
  }
  func.func @transform_8(%arg0: i32) -> (i32, i32, i32) {
    %c0_i32 = arith.constant 0 : i32
    %c0_i32_0 = arith.constant 0 : i32
    %c0_i32_1 = arith.constant 0 : i32
    return %arg0, %c0_i32, %c0_i32_0 : i32, i32, i32
  }
  func.func @transform_9(%arg0: i32) -> (i32, i32, i32) {
    %c0_i32 = arith.constant 0 : i32
    %c0_i32_0 = arith.constant 0 : i32
    %c0_i32_1 = arith.constant 0 : i32
    return %arg0, %c0_i32, %c0_i32_0 : i32, i32, i32
  }
  func.func @transform_10(%arg0: i32) -> (i32, i32, i32) {
    %c0_i32 = arith.constant 0 : i32
    %c0_i32_0 = arith.constant 0 : i32
    %c0_i32_1 = arith.constant 0 : i32
    return %arg0, %c0_i32, %c0_i32_0 : i32, i32, i32
  }
  func.func @transform_11(%arg0: i32) -> (i32, i32, i32) {
    %c0_i32 = arith.constant 0 : i32
    %c0_i32_0 = arith.constant 0 : i32
    %c0_i32_1 = arith.constant 0 : i32
    return %arg0, %c0_i32, %c0_i32_0 : i32, i32, i32
  }
  func.func @transform_12(%arg0: i32) -> (i32, i32, i32) {
    %c0_i32 = arith.constant 0 : i32
    %c0_i32_0 = arith.constant 0 : i32
    %c0_i32_1 = arith.constant 0 : i32
    return %arg0, %c0_i32, %c0_i32_0 : i32, i32, i32
  }
  func.func @transform_13(%arg0: i32) -> (i32, i32, i32) {
    %c0_i32 = arith.constant 0 : i32
    %c0_i32_0 = arith.constant 0 : i32
    %c0_i32_1 = arith.constant 0 : i32
    %c0_i32_2 = arith.constant 0 : i32
    return %c0_i32, %c0_i32_0, %c0_i32_1 : i32, i32, i32
  }
}

module attributes {stable_mosaic.version = 11 : i64} {
  func.func @_decoder_stack_kernel(%arg0: i32, %arg1: memref<2x8x32xf32, #tpu.memory_space<vmem>>, %arg2: memref<2x8x32xf32, #tpu.memory_space<vmem>>, %arg3: memref<1x32x96xbf16, #tpu.memory_space<vmem>>, %arg4: memref<1x1x96xf32, #tpu.memory_space<vmem>>, %arg5: memref<1x4x8x32xbf16, #tpu.memory_space<vmem>>, %arg6: memref<1x1x32xf32, #tpu.memory_space<vmem>>, %arg7: memref<1x1x32xf32, #tpu.memory_space<vmem>>, %arg8: memref<1x1x32xf32, #tpu.memory_space<vmem>>, %arg9: memref<1x32x32xbf16, #tpu.memory_space<vmem>>, %arg10: memref<1x1x32xf32, #tpu.memory_space<vmem>>, %arg11: memref<1x32x64xbf16, #tpu.memory_space<vmem>>, %arg12: memref<1x1x64xf32, #tpu.memory_space<vmem>>, %arg13: memref<1x4x8x32xbf16, #tpu.memory_space<vmem>>, %arg14: memref<1x1x32xf32, #tpu.memory_space<vmem>>, %arg15: memref<1x1x32xf32, #tpu.memory_space<vmem>>, %arg16: memref<1x1x32xf32, #tpu.memory_space<vmem>>, %arg17: memref<1x32x64xbf16, #tpu.memory_space<vmem>>, %arg18: memref<1x1x64xf32, #tpu.memory_space<vmem>>, %arg19: memref<1x64x32xbf16, #tpu.memory_space<vmem>>, %arg20: memref<1x1x32xf32, #tpu.memory_space<vmem>>, %arg21: memref<1x1x32xf32, #tpu.memory_space<vmem>>, %arg22: memref<1x1x32xf32, #tpu.memory_space<vmem>>, %arg23: memref<2x8x32xf32, #tpu.memory_space<vmem>>, %arg24: memref<2x8x32xf32, #tpu.memory_space<vmem>>, %arg25: memref<8x8xf32, #tpu.memory_space<vmem>>) attributes {dimension_semantics = [#tpu.dimension_semantics<arbitrary>], iteration_bounds = array<i64: 2>, scalar_prefetch = 0 : i64, scratch_operands = 2 : i64, tpu.core_type = #tpu.core_type<tc>, window_params = [{pipeline_mode = #tpu.pipeline_mode<synchronous>, transform_indices = @transform_0, window_bounds = array<i64: 2, 8, 32>}, {pipeline_mode = #tpu.pipeline_mode<synchronous>, transform_indices = @transform_1, window_bounds = array<i64: 2, 8, 32>}, {transform_indices = @transform_2, window_bounds = array<i64: 1, 32, 96>}, {transform_indices = @transform_3, window_bounds = array<i64: 1, 1, 96>}, {transform_indices = @transform_4, window_bounds = array<i64: 1, 4, 8, 32>}, {transform_indices = @transform_5, window_bounds = array<i64: 1, 1, 32>}, {transform_indices = @transform_6, window_bounds = array<i64: 1, 1, 32>}, {transform_indices = @transform_7, window_bounds = array<i64: 1, 1, 32>}, {transform_indices = @transform_8, window_bounds = array<i64: 1, 32, 32>}, {transform_indices = @transform_9, window_bounds = array<i64: 1, 1, 32>}, {transform_indices = @transform_10, window_bounds = array<i64: 1, 32, 64>}, {transform_indices = @transform_11, window_bounds = array<i64: 1, 1, 64>}, {transform_indices = @transform_12, window_bounds = array<i64: 1, 4, 8, 32>}, {transform_indices = @transform_13, window_bounds = array<i64: 1, 1, 32>}, {transform_indices = @transform_14, window_bounds = array<i64: 1, 1, 32>}, {transform_indices = @transform_15, window_bounds = array<i64: 1, 1, 32>}, {transform_indices = @transform_16, window_bounds = array<i64: 1, 32, 64>}, {transform_indices = @transform_17, window_bounds = array<i64: 1, 1, 64>}, {transform_indices = @transform_18, window_bounds = array<i64: 1, 64, 32>}, {transform_indices = @transform_19, window_bounds = array<i64: 1, 1, 32>}, {transform_indices = @transform_20, window_bounds = array<i64: 1, 1, 32>}, {transform_indices = @transform_21, window_bounds = array<i64: 1, 1, 32>}, {pipeline_mode = #tpu.pipeline_mode<synchronous>, transform_indices = @transform_22, window_bounds = array<i64: 2, 8, 32>}]} {
    %c0_i32 = arith.constant 0 : i32
    %0 = arith.cmpi eq, %arg0, %c0_i32 : i32
    %1 = arith.extui %0 : i1 to i32
    %c0_i32_0 = arith.constant 0 : i32
    %2 = arith.cmpi ne, %1, %c0_i32_0 : i32
    scf.if %2 {
      %c0_118 = arith.constant 0 : index
      %c0_119 = arith.constant 0 : index
      %c0_120 = arith.constant 0 : index
      %396 = vector.load %arg1[%c0_118, %c0_119, %c0_120] : memref<2x8x32xf32, #tpu.memory_space<vmem>>, vector<2x8x32xf32>
      %c0_121 = arith.constant 0 : index
      %c0_122 = arith.constant 0 : index
      %c0_123 = arith.constant 0 : index
      %397 = vector.load %arg24[%c0_121, %c0_122, %c0_123] : memref<2x8x32xf32, #tpu.memory_space<vmem>>, vector<2x8x32xf32>
      tpu.vector_store %arg24[%c0_121, %c0_122, %c0_123], %396 {strides = array<i32>} : memref<2x8x32xf32, #tpu.memory_space<vmem>>, vector<2x8x32xf32>,
      %398 = tpu.iota {dimensions = array<i32: 0>} : vector<8x8xi32>
      %399 = tpu.iota {dimensions = array<i32: 1>} : vector<8x8xi32>
      %400 = arith.cmpi sle, %399, %398 : vector<8x8xi32>
      %cst_124 = arith.constant 0.000000e+00 : f32
      %cst_125 = arith.constant -1.000000e+30 : f32
      %401 = vector.broadcast %cst_124 : f32 to vector<8x8xf32>
      %402 = vector.broadcast %cst_125 : f32 to vector<8x8xf32>
      %403 = arith.select %400, %401, %402 : vector<8x8xi1>, vector<8x8xf32>
      %c0_126 = arith.constant 0 : index
      %c0_127 = arith.constant 0 : index
      %404 = vector.load %arg25[%c0_126, %c0_127] : memref<8x8xf32, #tpu.memory_space<vmem>>, vector<8x8xf32>
      tpu.vector_store %arg25[%c0_126, %c0_127], %403 {strides = array<i32>} : memref<8x8xf32, #tpu.memory_space<vmem>>, vector<8x8xf32>,
    } else {
    }
    %c0 = arith.constant 0 : index
    %c0_1 = arith.constant 0 : index
    %c0_2 = arith.constant 0 : index
    %3 = vector.load %arg24[%c0, %c0_1, %c0_2] : memref<2x8x32xf32, #tpu.memory_space<vmem>>, vector<2x8x32xf32>
    %4 = vector.shape_cast %3 : vector<2x8x32xf32> to vector<16x32xf32>
    %c0_3 = arith.constant 0 : index
    %c0_4 = arith.constant 0 : index
    %c0_5 = arith.constant 0 : index
    %5 = vector.load %arg2[%c0_3, %c0_4, %c0_5] : memref<2x8x32xf32, #tpu.memory_space<vmem>>, vector<2x8x32xf32>
    %6 = vector.shape_cast %5 : vector<2x8x32xf32> to vector<16x32xf32>
    %c0_6 = arith.constant 0 : index
    %c0_7 = arith.constant 0 : index
    %7 = vector.load %arg25[%c0_6, %c0_7] : memref<8x8xf32, #tpu.memory_space<vmem>>, vector<8x8xf32>
    %c0_8 = arith.constant 0 : index
    %c0_9 = arith.constant 0 : index
    %c0_10 = arith.constant 0 : index
    %8 = vector.load %arg3[%c0_8, %c0_9, %c0_10] : memref<1x32x96xbf16, #tpu.memory_space<vmem>>, vector<1x32x96xbf16>
    %9 = vector.shape_cast %8 : vector<1x32x96xbf16> to vector<32x96xbf16>
    %10 = arith.truncf %4 : vector<16x32xf32> to vector<16x32xbf16>
    %cst = arith.constant dense<0.000000e+00> : vector<16x96xf32>
    %11 = tpu.matmul %10, %9, %cst {dimension_numbers = #tpu.dot_dimension_numbers<[1], [0], [0], [1], [0, 0, 1, 1], [], []>} : vector<16x32xbf16>, vector<32x96xbf16>, vector<16x96xf32> -> vector<16x96xf32>
    %c0_11 = arith.constant 0 : index
    %c0_12 = arith.constant 0 : index
    %c0_13 = arith.constant 0 : index
    %12 = vector.load %arg4[%c0_11, %c0_12, %c0_13] : memref<1x1x96xf32, #tpu.memory_space<vmem>>, vector<1x1x96xf32>
    %13 = vector.shape_cast %12 : vector<1x1x96xf32> to vector<1x96xf32>
    %14 = vector.broadcast %13 : vector<1x96xf32> to vector<16x96xf32>
    %15 = arith.addf %11, %14 : vector<16x96xf32>
    %16 = vector.shape_cast %15 : vector<16x96xf32> to vector<2x8x96xf32>
    %17 = vector.extract_strided_slice %16 {offsets = [0, 0, 0], sizes = [2, 8, 32], strides = [1, 1, 1]} : vector<2x8x96xf32> to vector<2x8x32xf32>
    %18 = vector.extract_strided_slice %16 {offsets = [0, 0, 32], sizes = [2, 8, 32], strides = [1, 1, 1]} : vector<2x8x96xf32> to vector<2x8x32xf32>
    %19 = vector.extract_strided_slice %16 {offsets = [0, 0, 64], sizes = [2, 8, 32], strides = [1, 1, 1]} : vector<2x8x96xf32> to vector<2x8x32xf32>
    %c0_14 = arith.constant 0 : index
    %c0_15 = arith.constant 0 : index
    %c0_16 = arith.constant 0 : index
    %c0_17 = arith.constant 0 : index
    %20 = vector.load %arg5[%c0_14, %c0_15, %c0_16, %c0_17] : memref<1x4x8x32xbf16, #tpu.memory_space<vmem>>, vector<1x4x8x32xbf16>
    %21 = vector.shape_cast %20 : vector<1x4x8x32xbf16> to vector<4x8x32xbf16>
    %c0_18 = arith.constant 0 : index
    %c0_19 = arith.constant 0 : index
    %c0_20 = arith.constant 0 : index
    %22 = vector.load %arg6[%c0_18, %c0_19, %c0_20] : memref<1x1x32xf32, #tpu.memory_space<vmem>>, vector<1x1x32xf32>
    %23 = vector.shape_cast %22 : vector<1x1x32xf32> to vector<1x32xf32>
    %24 = vector.extract_strided_slice %17 {offsets = [0, 0, 0], sizes = [1, 8, 8], strides = [1, 1, 1]} : vector<2x8x32xf32> to vector<1x8x8xf32>
    %25 = vector.shape_cast %24 : vector<1x8x8xf32> to vector<8x8xf32>
    %26 = vector.extract_strided_slice %17 {offsets = [0, 0, 8], sizes = [1, 8, 8], strides = [1, 1, 1]} : vector<2x8x32xf32> to vector<1x8x8xf32>
    %27 = vector.shape_cast %26 : vector<1x8x8xf32> to vector<8x8xf32>
    %28 = vector.extract_strided_slice %17 {offsets = [0, 0, 16], sizes = [1, 8, 8], strides = [1, 1, 1]} : vector<2x8x32xf32> to vector<1x8x8xf32>
    %29 = vector.shape_cast %28 : vector<1x8x8xf32> to vector<8x8xf32>
    %30 = vector.extract_strided_slice %17 {offsets = [0, 0, 24], sizes = [1, 8, 8], strides = [1, 1, 1]} : vector<2x8x32xf32> to vector<1x8x8xf32>
    %31 = vector.shape_cast %30 : vector<1x8x8xf32> to vector<8x8xf32>
    %32 = vector.shape_cast %25 : vector<8x8xf32> to vector<1x8x8xf32>
    %33 = vector.shape_cast %27 : vector<8x8xf32> to vector<1x8x8xf32>
    %34 = vector.shape_cast %29 : vector<8x8xf32> to vector<1x8x8xf32>
    %35 = vector.shape_cast %31 : vector<8x8xf32> to vector<1x8x8xf32>
    %36 = tpu.concatenate %32, %33, %34, %35 in 0 : vector<1x8x8xf32>, vector<1x8x8xf32>, vector<1x8x8xf32>, vector<1x8x8xf32> -> vector<4x8x8xf32>
    %37 = arith.truncf %36 : vector<4x8x8xf32> to vector<4x8x8xbf16>
    %38 = vector.extract_strided_slice %18 {offsets = [0, 0, 0], sizes = [1, 8, 8], strides = [1, 1, 1]} : vector<2x8x32xf32> to vector<1x8x8xf32>
    %39 = vector.shape_cast %38 : vector<1x8x8xf32> to vector<8x8xf32>
    %40 = vector.extract_strided_slice %18 {offsets = [0, 0, 8], sizes = [1, 8, 8], strides = [1, 1, 1]} : vector<2x8x32xf32> to vector<1x8x8xf32>
    %41 = vector.shape_cast %40 : vector<1x8x8xf32> to vector<8x8xf32>
    %42 = vector.extract_strided_slice %18 {offsets = [0, 0, 16], sizes = [1, 8, 8], strides = [1, 1, 1]} : vector<2x8x32xf32> to vector<1x8x8xf32>
    %43 = vector.shape_cast %42 : vector<1x8x8xf32> to vector<8x8xf32>
    %44 = vector.extract_strided_slice %18 {offsets = [0, 0, 24], sizes = [1, 8, 8], strides = [1, 1, 1]} : vector<2x8x32xf32> to vector<1x8x8xf32>
    %45 = vector.shape_cast %44 : vector<1x8x8xf32> to vector<8x8xf32>
    %46 = vector.shape_cast %39 : vector<8x8xf32> to vector<1x8x8xf32>
    %47 = vector.shape_cast %41 : vector<8x8xf32> to vector<1x8x8xf32>
    %48 = vector.shape_cast %43 : vector<8x8xf32> to vector<1x8x8xf32>
    %49 = vector.shape_cast %45 : vector<8x8xf32> to vector<1x8x8xf32>
    %50 = tpu.concatenate %46, %47, %48, %49 in 0 : vector<1x8x8xf32>, vector<1x8x8xf32>, vector<1x8x8xf32>, vector<1x8x8xf32> -> vector<4x8x8xf32>
    %51 = arith.truncf %50 : vector<4x8x8xf32> to vector<4x8x8xbf16>
    %52 = vector.extract_strided_slice %19 {offsets = [0, 0, 0], sizes = [1, 8, 8], strides = [1, 1, 1]} : vector<2x8x32xf32> to vector<1x8x8xf32>
    %53 = vector.shape_cast %52 : vector<1x8x8xf32> to vector<8x8xf32>
    %54 = vector.extract_strided_slice %19 {offsets = [0, 0, 8], sizes = [1, 8, 8], strides = [1, 1, 1]} : vector<2x8x32xf32> to vector<1x8x8xf32>
    %55 = vector.shape_cast %54 : vector<1x8x8xf32> to vector<8x8xf32>
    %56 = vector.extract_strided_slice %19 {offsets = [0, 0, 16], sizes = [1, 8, 8], strides = [1, 1, 1]} : vector<2x8x32xf32> to vector<1x8x8xf32>
    %57 = vector.shape_cast %56 : vector<1x8x8xf32> to vector<8x8xf32>
    %58 = vector.extract_strided_slice %19 {offsets = [0, 0, 24], sizes = [1, 8, 8], strides = [1, 1, 1]} : vector<2x8x32xf32> to vector<1x8x8xf32>
    %59 = vector.shape_cast %58 : vector<1x8x8xf32> to vector<8x8xf32>
    %60 = vector.shape_cast %53 : vector<8x8xf32> to vector<1x8x8xf32>
    %61 = vector.shape_cast %55 : vector<8x8xf32> to vector<1x8x8xf32>
    %62 = vector.shape_cast %57 : vector<8x8xf32> to vector<1x8x8xf32>
    %63 = vector.shape_cast %59 : vector<8x8xf32> to vector<1x8x8xf32>
    %64 = tpu.concatenate %60, %61, %62, %63 in 0 : vector<1x8x8xf32>, vector<1x8x8xf32>, vector<1x8x8xf32>, vector<1x8x8xf32> -> vector<4x8x8xf32>
    %65 = arith.truncf %64 : vector<4x8x8xf32> to vector<4x8x8xbf16>
    "tpu.trace_start"() <{level = 10 : i32, message = "hqd,hkd->hqk"}> : () -> ()
    %cst_21 = arith.constant dense<0.000000e+00> : vector<4x8x8xf32>
    %66 = tpu.matmul %37, %51, %cst_21 {dimension_numbers = #tpu.dot_dimension_numbers<[2], [2], [1], [1], [0, 0, 0, 1, 1, 1], [0], [0]>} : vector<4x8x8xbf16>, vector<4x8x8xbf16>, vector<4x8x8xf32> -> vector<4x8x8xf32>
    "tpu.trace_stop"() : () -> ()
    %67 = vector.shape_cast %7 : vector<8x8xf32> to vector<1x8x8xf32>
    %68 = vector.broadcast %67 : vector<1x8x8xf32> to vector<4x8x8xf32>
    %69 = arith.addf %66, %68 : vector<4x8x8xf32>
    %cst_22 = arith.constant dense<0xFF800000> : vector<4x8xf32>
    %70 = vector.multi_reduction <maximumf>, %69, %cst_22 [2] : vector<4x8x8xf32> to vector<4x8xf32>
    %71 = vector.shape_cast %70 : vector<4x8xf32> to vector<4x8x1xf32>
    %72 = vector.broadcast %71 : vector<4x8x1xf32> to vector<4x8x8xf32>
    %73 = arith.subf %69, %72 : vector<4x8x8xf32>
    %74 = math.exp %73 : vector<4x8x8xf32>
    %cst_23 = arith.constant dense<0.000000e+00> : vector<4x8xf32>
    %75 = vector.multi_reduction <add>, %74, %cst_23 [2] : vector<4x8x8xf32> to vector<4x8xf32>
    %76 = vector.shape_cast %75 : vector<4x8xf32> to vector<4x8x1xf32>
    %77 = tpu.reciprocal %76 {approx = true} : vector<4x8x1xf32> -> vector<4x8x1xf32>
    %78 = vector.broadcast %77 : vector<4x8x1xf32> to vector<4x8x8xf32>
    %79 = arith.mulf %74, %78 : vector<4x8x8xf32>
    %80 = arith.truncf %79 : vector<4x8x8xf32> to vector<4x8x8xbf16>
    "tpu.trace_start"() <{level = 10 : i32, message = "hqk,hkd->hqd"}> : () -> ()
    %cst_24 = arith.constant dense<0.000000e+00> : vector<4x8x8xf32>
    %81 = tpu.matmul %80, %65, %cst_24 {dimension_numbers = #tpu.dot_dimension_numbers<[2], [1], [1], [2], [0, 0, 0, 1, 1, 2], [0], [0]>} : vector<4x8x8xbf16>, vector<4x8x8xbf16>, vector<4x8x8xf32> -> vector<4x8x8xf32>
    "tpu.trace_stop"() : () -> ()
    %82 = arith.truncf %81 : vector<4x8x8xf32> to vector<4x8x8xbf16>
    "tpu.trace_start"() <{level = 10 : i32, message = "hqd,hde->hqe"}> : () -> ()
    %cst_25 = arith.constant dense<0.000000e+00> : vector<4x8x32xf32>
    %83 = tpu.matmul %82, %21, %cst_25 {dimension_numbers = #tpu.dot_dimension_numbers<[2], [1], [1], [2], [0, 0, 0, 1, 1, 2], [0], [0]>} : vector<4x8x8xbf16>, vector<4x8x32xbf16>, vector<4x8x32xf32> -> vector<4x8x32xf32>
    "tpu.trace_stop"() : () -> ()
    %cst_26 = arith.constant dense<0.000000e+00> : vector<8x32xf32>
    %84 = vector.multi_reduction <add>, %83, %cst_26 [0] : vector<4x8x32xf32> to vector<8x32xf32>
    %85 = vector.extract_strided_slice %17 {offsets = [1, 0, 0], sizes = [1, 8, 8], strides = [1, 1, 1]} : vector<2x8x32xf32> to vector<1x8x8xf32>
    %86 = vector.shape_cast %85 : vector<1x8x8xf32> to vector<8x8xf32>
    %87 = vector.extract_strided_slice %17 {offsets = [1, 0, 8], sizes = [1, 8, 8], strides = [1, 1, 1]} : vector<2x8x32xf32> to vector<1x8x8xf32>
    %88 = vector.shape_cast %87 : vector<1x8x8xf32> to vector<8x8xf32>
    %89 = vector.extract_strided_slice %17 {offsets = [1, 0, 16], sizes = [1, 8, 8], strides = [1, 1, 1]} : vector<2x8x32xf32> to vector<1x8x8xf32>
    %90 = vector.shape_cast %89 : vector<1x8x8xf32> to vector<8x8xf32>
    %91 = vector.extract_strided_slice %17 {offsets = [1, 0, 24], sizes = [1, 8, 8], strides = [1, 1, 1]} : vector<2x8x32xf32> to vector<1x8x8xf32>
    %92 = vector.shape_cast %91 : vector<1x8x8xf32> to vector<8x8xf32>
    %93 = vector.shape_cast %86 : vector<8x8xf32> to vector<1x8x8xf32>
    %94 = vector.shape_cast %88 : vector<8x8xf32> to vector<1x8x8xf32>
    %95 = vector.shape_cast %90 : vector<8x8xf32> to vector<1x8x8xf32>
    %96 = vector.shape_cast %92 : vector<8x8xf32> to vector<1x8x8xf32>
    %97 = tpu.concatenate %93, %94, %95, %96 in 0 : vector<1x8x8xf32>, vector<1x8x8xf32>, vector<1x8x8xf32>, vector<1x8x8xf32> -> vector<4x8x8xf32>
    %98 = arith.truncf %97 : vector<4x8x8xf32> to vector<4x8x8xbf16>
    %99 = vector.extract_strided_slice %18 {offsets = [1, 0, 0], sizes = [1, 8, 8], strides = [1, 1, 1]} : vector<2x8x32xf32> to vector<1x8x8xf32>
    %100 = vector.shape_cast %99 : vector<1x8x8xf32> to vector<8x8xf32>
    %101 = vector.extract_strided_slice %18 {offsets = [1, 0, 8], sizes = [1, 8, 8], strides = [1, 1, 1]} : vector<2x8x32xf32> to vector<1x8x8xf32>
    %102 = vector.shape_cast %101 : vector<1x8x8xf32> to vector<8x8xf32>
    %103 = vector.extract_strided_slice %18 {offsets = [1, 0, 16], sizes = [1, 8, 8], strides = [1, 1, 1]} : vector<2x8x32xf32> to vector<1x8x8xf32>
    %104 = vector.shape_cast %103 : vector<1x8x8xf32> to vector<8x8xf32>
    %105 = vector.extract_strided_slice %18 {offsets = [1, 0, 24], sizes = [1, 8, 8], strides = [1, 1, 1]} : vector<2x8x32xf32> to vector<1x8x8xf32>
    %106 = vector.shape_cast %105 : vector<1x8x8xf32> to vector<8x8xf32>
    %107 = vector.shape_cast %100 : vector<8x8xf32> to vector<1x8x8xf32>
    %108 = vector.shape_cast %102 : vector<8x8xf32> to vector<1x8x8xf32>
    %109 = vector.shape_cast %104 : vector<8x8xf32> to vector<1x8x8xf32>
    %110 = vector.shape_cast %106 : vector<8x8xf32> to vector<1x8x8xf32>
    %111 = tpu.concatenate %107, %108, %109, %110 in 0 : vector<1x8x8xf32>, vector<1x8x8xf32>, vector<1x8x8xf32>, vector<1x8x8xf32> -> vector<4x8x8xf32>
    %112 = arith.truncf %111 : vector<4x8x8xf32> to vector<4x8x8xbf16>
    %113 = vector.extract_strided_slice %19 {offsets = [1, 0, 0], sizes = [1, 8, 8], strides = [1, 1, 1]} : vector<2x8x32xf32> to vector<1x8x8xf32>
    %114 = vector.shape_cast %113 : vector<1x8x8xf32> to vector<8x8xf32>
    %115 = vector.extract_strided_slice %19 {offsets = [1, 0, 8], sizes = [1, 8, 8], strides = [1, 1, 1]} : vector<2x8x32xf32> to vector<1x8x8xf32>
    %116 = vector.shape_cast %115 : vector<1x8x8xf32> to vector<8x8xf32>
    %117 = vector.extract_strided_slice %19 {offsets = [1, 0, 16], sizes = [1, 8, 8], strides = [1, 1, 1]} : vector<2x8x32xf32> to vector<1x8x8xf32>
    %118 = vector.shape_cast %117 : vector<1x8x8xf32> to vector<8x8xf32>
    %119 = vector.extract_strided_slice %19 {offsets = [1, 0, 24], sizes = [1, 8, 8], strides = [1, 1, 1]} : vector<2x8x32xf32> to vector<1x8x8xf32>
    %120 = vector.shape_cast %119 : vector<1x8x8xf32> to vector<8x8xf32>
    %121 = vector.shape_cast %114 : vector<8x8xf32> to vector<1x8x8xf32>
    %122 = vector.shape_cast %116 : vector<8x8xf32> to vector<1x8x8xf32>
    %123 = vector.shape_cast %118 : vector<8x8xf32> to vector<1x8x8xf32>
    %124 = vector.shape_cast %120 : vector<8x8xf32> to vector<1x8x8xf32>
    %125 = tpu.concatenate %121, %122, %123, %124 in 0 : vector<1x8x8xf32>, vector<1x8x8xf32>, vector<1x8x8xf32>, vector<1x8x8xf32> -> vector<4x8x8xf32>
    %126 = arith.truncf %125 : vector<4x8x8xf32> to vector<4x8x8xbf16>
    "tpu.trace_start"() <{level = 10 : i32, message = "hqd,hkd->hqk"}> : () -> ()
    %cst_27 = arith.constant dense<0.000000e+00> : vector<4x8x8xf32>
    %127 = tpu.matmul %98, %112, %cst_27 {dimension_numbers = #tpu.dot_dimension_numbers<[2], [2], [1], [1], [0, 0, 0, 1, 1, 1], [0], [0]>} : vector<4x8x8xbf16>, vector<4x8x8xbf16>, vector<4x8x8xf32> -> vector<4x8x8xf32>
    "tpu.trace_stop"() : () -> ()
    %128 = vector.shape_cast %7 : vector<8x8xf32> to vector<1x8x8xf32>
    %129 = vector.broadcast %128 : vector<1x8x8xf32> to vector<4x8x8xf32>
    %130 = arith.addf %127, %129 : vector<4x8x8xf32>
    %cst_28 = arith.constant dense<0xFF800000> : vector<4x8xf32>
    %131 = vector.multi_reduction <maximumf>, %130, %cst_28 [2] : vector<4x8x8xf32> to vector<4x8xf32>
    %132 = vector.shape_cast %131 : vector<4x8xf32> to vector<4x8x1xf32>
    %133 = vector.broadcast %132 : vector<4x8x1xf32> to vector<4x8x8xf32>
    %134 = arith.subf %130, %133 : vector<4x8x8xf32>
    %135 = math.exp %134 : vector<4x8x8xf32>
    %cst_29 = arith.constant dense<0.000000e+00> : vector<4x8xf32>
    %136 = vector.multi_reduction <add>, %135, %cst_29 [2] : vector<4x8x8xf32> to vector<4x8xf32>
    %137 = vector.shape_cast %136 : vector<4x8xf32> to vector<4x8x1xf32>
    %138 = tpu.reciprocal %137 {approx = true} : vector<4x8x1xf32> -> vector<4x8x1xf32>
    %139 = vector.broadcast %138 : vector<4x8x1xf32> to vector<4x8x8xf32>
    %140 = arith.mulf %135, %139 : vector<4x8x8xf32>
    %141 = arith.truncf %140 : vector<4x8x8xf32> to vector<4x8x8xbf16>
    "tpu.trace_start"() <{level = 10 : i32, message = "hqk,hkd->hqd"}> : () -> ()
    %cst_30 = arith.constant dense<0.000000e+00> : vector<4x8x8xf32>
    %142 = tpu.matmul %141, %126, %cst_30 {dimension_numbers = #tpu.dot_dimension_numbers<[2], [1], [1], [2], [0, 0, 0, 1, 1, 2], [0], [0]>} : vector<4x8x8xbf16>, vector<4x8x8xbf16>, vector<4x8x8xf32> -> vector<4x8x8xf32>
    "tpu.trace_stop"() : () -> ()
    %143 = arith.truncf %142 : vector<4x8x8xf32> to vector<4x8x8xbf16>
    "tpu.trace_start"() <{level = 10 : i32, message = "hqd,hde->hqe"}> : () -> ()
    %cst_31 = arith.constant dense<0.000000e+00> : vector<4x8x32xf32>
    %144 = tpu.matmul %143, %21, %cst_31 {dimension_numbers = #tpu.dot_dimension_numbers<[2], [1], [1], [2], [0, 0, 0, 1, 1, 2], [0], [0]>} : vector<4x8x8xbf16>, vector<4x8x32xbf16>, vector<4x8x32xf32> -> vector<4x8x32xf32>
    "tpu.trace_stop"() : () -> ()
    %cst_32 = arith.constant dense<0.000000e+00> : vector<8x32xf32>
    %145 = vector.multi_reduction <add>, %144, %cst_32 [0] : vector<4x8x32xf32> to vector<8x32xf32>
    %146 = tpu.concatenate %84, %145 in 0 : vector<8x32xf32>, vector<8x32xf32> -> vector<16x32xf32>
    %147 = vector.broadcast %23 : vector<1x32xf32> to vector<16x32xf32>
    %148 = arith.addf %146, %147 : vector<16x32xf32>
    %149 = arith.addf %4, %148 : vector<16x32xf32>
    %c0_33 = arith.constant 0 : index
    %c0_34 = arith.constant 0 : index
    %c0_35 = arith.constant 0 : index
    %150 = vector.load %arg7[%c0_33, %c0_34, %c0_35] : memref<1x1x32xf32, #tpu.memory_space<vmem>>, vector<1x1x32xf32>
    %151 = vector.shape_cast %150 : vector<1x1x32xf32> to vector<1x32xf32>
    %c0_36 = arith.constant 0 : index
    %c0_37 = arith.constant 0 : index
    %c0_38 = arith.constant 0 : index
    %152 = vector.load %arg8[%c0_36, %c0_37, %c0_38] : memref<1x1x32xf32, #tpu.memory_space<vmem>>, vector<1x1x32xf32>
    %153 = vector.shape_cast %152 : vector<1x1x32xf32> to vector<1x32xf32>
    %cst_39 = arith.constant dense<0.000000e+00> : vector<16xf32>
    %154 = vector.multi_reduction <add>, %149, %cst_39 [1] : vector<16x32xf32> to vector<16xf32>
    %155 = vector.shape_cast %154 : vector<16xf32> to vector<16x1xf32>
    %cst_40 = arith.constant 3.200000e+01 : f32
    %156 = vector.broadcast %cst_40 : f32 to vector<16x1xf32>
    %157 = arith.divf %155, %156 : vector<16x1xf32>
    %158 = vector.broadcast %157 : vector<16x1xf32> to vector<16x32xf32>
    %159 = arith.subf %149, %158 : vector<16x32xf32>
    %160 = arith.mulf %159, %159 : vector<16x32xf32>
    %cst_41 = arith.constant dense<0.000000e+00> : vector<16xf32>
    %161 = vector.multi_reduction <add>, %160, %cst_41 [1] : vector<16x32xf32> to vector<16xf32>
    %162 = vector.shape_cast %161 : vector<16xf32> to vector<16x1xf32>
    %cst_42 = arith.constant 3.200000e+01 : f32
    %163 = vector.broadcast %cst_42 : f32 to vector<16x1xf32>
    %164 = arith.divf %162, %163 : vector<16x1xf32>
    %165 = vector.broadcast %157 : vector<16x1xf32> to vector<16x32xf32>
    %166 = arith.subf %149, %165 : vector<16x32xf32>
    %cst_43 = arith.constant 9.99999974E-6 : f32
    %167 = vector.broadcast %cst_43 : f32 to vector<16x1xf32>
    %168 = arith.addf %164, %167 : vector<16x1xf32>
    %169 = math.rsqrt %168 : vector<16x1xf32>
    %170 = vector.broadcast %169 : vector<16x1xf32> to vector<16x32xf32>
    %171 = arith.mulf %166, %170 : vector<16x32xf32>
    %172 = vector.broadcast %151 : vector<1x32xf32> to vector<16x32xf32>
    %173 = arith.mulf %171, %172 : vector<16x32xf32>
    %174 = vector.broadcast %153 : vector<1x32xf32> to vector<16x32xf32>
    %175 = arith.addf %173, %174 : vector<16x32xf32>
    %c0_44 = arith.constant 0 : index
    %c0_45 = arith.constant 0 : index
    %c0_46 = arith.constant 0 : index
    %176 = vector.load %arg9[%c0_44, %c0_45, %c0_46] : memref<1x32x32xbf16, #tpu.memory_space<vmem>>, vector<1x32x32xbf16>
    %177 = vector.shape_cast %176 : vector<1x32x32xbf16> to vector<32x32xbf16>
    %178 = arith.truncf %175 : vector<16x32xf32> to vector<16x32xbf16>
    %cst_47 = arith.constant dense<0.000000e+00> : vector<16x32xf32>
    %179 = tpu.matmul %178, %177, %cst_47 {dimension_numbers = #tpu.dot_dimension_numbers<[1], [0], [0], [1], [0, 0, 1, 1], [], []>} : vector<16x32xbf16>, vector<32x32xbf16>, vector<16x32xf32> -> vector<16x32xf32>
    %c0_48 = arith.constant 0 : index
    %c0_49 = arith.constant 0 : index
    %c0_50 = arith.constant 0 : index
    %180 = vector.load %arg10[%c0_48, %c0_49, %c0_50] : memref<1x1x32xf32, #tpu.memory_space<vmem>>, vector<1x1x32xf32>
    %181 = vector.shape_cast %180 : vector<1x1x32xf32> to vector<1x32xf32>
    %182 = vector.broadcast %181 : vector<1x32xf32> to vector<16x32xf32>
    %183 = arith.addf %179, %182 : vector<16x32xf32>
    %184 = vector.shape_cast %183 : vector<16x32xf32> to vector<2x8x32xf32>
    %c0_51 = arith.constant 0 : index
    %c0_52 = arith.constant 0 : index
    %c0_53 = arith.constant 0 : index
    %185 = vector.load %arg11[%c0_51, %c0_52, %c0_53] : memref<1x32x64xbf16, #tpu.memory_space<vmem>>, vector<1x32x64xbf16>
    %186 = vector.shape_cast %185 : vector<1x32x64xbf16> to vector<32x64xbf16>
    %187 = arith.truncf %6 : vector<16x32xf32> to vector<16x32xbf16>
    %cst_54 = arith.constant dense<0.000000e+00> : vector<16x64xf32>
    %188 = tpu.matmul %187, %186, %cst_54 {dimension_numbers = #tpu.dot_dimension_numbers<[1], [0], [0], [1], [0, 0, 1, 1], [], []>} : vector<16x32xbf16>, vector<32x64xbf16>, vector<16x64xf32> -> vector<16x64xf32>
    %c0_55 = arith.constant 0 : index
    %c0_56 = arith.constant 0 : index
    %c0_57 = arith.constant 0 : index
    %189 = vector.load %arg12[%c0_55, %c0_56, %c0_57] : memref<1x1x64xf32, #tpu.memory_space<vmem>>, vector<1x1x64xf32>
    %190 = vector.shape_cast %189 : vector<1x1x64xf32> to vector<1x64xf32>
    %191 = vector.broadcast %190 : vector<1x64xf32> to vector<16x64xf32>
    %192 = arith.addf %188, %191 : vector<16x64xf32>
    %193 = vector.shape_cast %192 : vector<16x64xf32> to vector<2x8x64xf32>
    %194 = vector.extract_strided_slice %193 {offsets = [0, 0, 0], sizes = [2, 8, 32], strides = [1, 1, 1]} : vector<2x8x64xf32> to vector<2x8x32xf32>
    %195 = vector.extract_strided_slice %193 {offsets = [0, 0, 32], sizes = [2, 8, 32], strides = [1, 1, 1]} : vector<2x8x64xf32> to vector<2x8x32xf32>
    %c0_58 = arith.constant 0 : index
    %c0_59 = arith.constant 0 : index
    %c0_60 = arith.constant 0 : index
    %c0_61 = arith.constant 0 : index
    %196 = vector.load %arg13[%c0_58, %c0_59, %c0_60, %c0_61] : memref<1x4x8x32xbf16, #tpu.memory_space<vmem>>, vector<1x4x8x32xbf16>
    %197 = vector.shape_cast %196 : vector<1x4x8x32xbf16> to vector<4x8x32xbf16>
    %c0_62 = arith.constant 0 : index
    %c0_63 = arith.constant 0 : index
    %c0_64 = arith.constant 0 : index
    %198 = vector.load %arg14[%c0_62, %c0_63, %c0_64] : memref<1x1x32xf32, #tpu.memory_space<vmem>>, vector<1x1x32xf32>
    %199 = vector.shape_cast %198 : vector<1x1x32xf32> to vector<1x32xf32>
    %200 = vector.extract_strided_slice %184 {offsets = [0, 0, 0], sizes = [1, 8, 8], strides = [1, 1, 1]} : vector<2x8x32xf32> to vector<1x8x8xf32>
    %201 = vector.shape_cast %200 : vector<1x8x8xf32> to vector<8x8xf32>
    %202 = vector.extract_strided_slice %184 {offsets = [0, 0, 8], sizes = [1, 8, 8], strides = [1, 1, 1]} : vector<2x8x32xf32> to vector<1x8x8xf32>
    %203 = vector.shape_cast %202 : vector<1x8x8xf32> to vector<8x8xf32>
    %204 = vector.extract_strided_slice %184 {offsets = [0, 0, 16], sizes = [1, 8, 8], strides = [1, 1, 1]} : vector<2x8x32xf32> to vector<1x8x8xf32>
    %205 = vector.shape_cast %204 : vector<1x8x8xf32> to vector<8x8xf32>
    %206 = vector.extract_strided_slice %184 {offsets = [0, 0, 24], sizes = [1, 8, 8], strides = [1, 1, 1]} : vector<2x8x32xf32> to vector<1x8x8xf32>
    %207 = vector.shape_cast %206 : vector<1x8x8xf32> to vector<8x8xf32>
    %208 = vector.shape_cast %201 : vector<8x8xf32> to vector<1x8x8xf32>
    %209 = vector.shape_cast %203 : vector<8x8xf32> to vector<1x8x8xf32>
    %210 = vector.shape_cast %205 : vector<8x8xf32> to vector<1x8x8xf32>
    %211 = vector.shape_cast %207 : vector<8x8xf32> to vector<1x8x8xf32>
    %212 = tpu.concatenate %208, %209, %210, %211 in 0 : vector<1x8x8xf32>, vector<1x8x8xf32>, vector<1x8x8xf32>, vector<1x8x8xf32> -> vector<4x8x8xf32>
    %213 = arith.truncf %212 : vector<4x8x8xf32> to vector<4x8x8xbf16>
    %214 = vector.extract_strided_slice %194 {offsets = [0, 0, 0], sizes = [1, 8, 8], strides = [1, 1, 1]} : vector<2x8x32xf32> to vector<1x8x8xf32>
    %215 = vector.shape_cast %214 : vector<1x8x8xf32> to vector<8x8xf32>
    %216 = vector.extract_strided_slice %194 {offsets = [0, 0, 8], sizes = [1, 8, 8], strides = [1, 1, 1]} : vector<2x8x32xf32> to vector<1x8x8xf32>
    %217 = vector.shape_cast %216 : vector<1x8x8xf32> to vector<8x8xf32>
    %218 = vector.extract_strided_slice %194 {offsets = [0, 0, 16], sizes = [1, 8, 8], strides = [1, 1, 1]} : vector<2x8x32xf32> to vector<1x8x8xf32>
    %219 = vector.shape_cast %218 : vector<1x8x8xf32> to vector<8x8xf32>
    %220 = vector.extract_strided_slice %194 {offsets = [0, 0, 24], sizes = [1, 8, 8], strides = [1, 1, 1]} : vector<2x8x32xf32> to vector<1x8x8xf32>
    %221 = vector.shape_cast %220 : vector<1x8x8xf32> to vector<8x8xf32>
    %222 = vector.shape_cast %215 : vector<8x8xf32> to vector<1x8x8xf32>
    %223 = vector.shape_cast %217 : vector<8x8xf32> to vector<1x8x8xf32>
    %224 = vector.shape_cast %219 : vector<8x8xf32> to vector<1x8x8xf32>
    %225 = vector.shape_cast %221 : vector<8x8xf32> to vector<1x8x8xf32>
    %226 = tpu.concatenate %222, %223, %224, %225 in 0 : vector<1x8x8xf32>, vector<1x8x8xf32>, vector<1x8x8xf32>, vector<1x8x8xf32> -> vector<4x8x8xf32>
    %227 = arith.truncf %226 : vector<4x8x8xf32> to vector<4x8x8xbf16>
    %228 = vector.extract_strided_slice %195 {offsets = [0, 0, 0], sizes = [1, 8, 8], strides = [1, 1, 1]} : vector<2x8x32xf32> to vector<1x8x8xf32>
    %229 = vector.shape_cast %228 : vector<1x8x8xf32> to vector<8x8xf32>
    %230 = vector.extract_strided_slice %195 {offsets = [0, 0, 8], sizes = [1, 8, 8], strides = [1, 1, 1]} : vector<2x8x32xf32> to vector<1x8x8xf32>
    %231 = vector.shape_cast %230 : vector<1x8x8xf32> to vector<8x8xf32>
    %232 = vector.extract_strided_slice %195 {offsets = [0, 0, 16], sizes = [1, 8, 8], strides = [1, 1, 1]} : vector<2x8x32xf32> to vector<1x8x8xf32>
    %233 = vector.shape_cast %232 : vector<1x8x8xf32> to vector<8x8xf32>
    %234 = vector.extract_strided_slice %195 {offsets = [0, 0, 24], sizes = [1, 8, 8], strides = [1, 1, 1]} : vector<2x8x32xf32> to vector<1x8x8xf32>
    %235 = vector.shape_cast %234 : vector<1x8x8xf32> to vector<8x8xf32>
    %236 = vector.shape_cast %229 : vector<8x8xf32> to vector<1x8x8xf32>
    %237 = vector.shape_cast %231 : vector<8x8xf32> to vector<1x8x8xf32>
    %238 = vector.shape_cast %233 : vector<8x8xf32> to vector<1x8x8xf32>
    %239 = vector.shape_cast %235 : vector<8x8xf32> to vector<1x8x8xf32>
    %240 = tpu.concatenate %236, %237, %238, %239 in 0 : vector<1x8x8xf32>, vector<1x8x8xf32>, vector<1x8x8xf32>, vector<1x8x8xf32> -> vector<4x8x8xf32>
    %241 = arith.truncf %240 : vector<4x8x8xf32> to vector<4x8x8xbf16>
    "tpu.trace_start"() <{level = 10 : i32, message = "hqd,hkd->hqk"}> : () -> ()
    %cst_65 = arith.constant dense<0.000000e+00> : vector<4x8x8xf32>
    %242 = tpu.matmul %213, %227, %cst_65 {dimension_numbers = #tpu.dot_dimension_numbers<[2], [2], [1], [1], [0, 0, 0, 1, 1, 1], [0], [0]>} : vector<4x8x8xbf16>, vector<4x8x8xbf16>, vector<4x8x8xf32> -> vector<4x8x8xf32>
    "tpu.trace_stop"() : () -> ()
    %cst_66 = arith.constant dense<0xFF800000> : vector<4x8xf32>
    %243 = vector.multi_reduction <maximumf>, %242, %cst_66 [2] : vector<4x8x8xf32> to vector<4x8xf32>
    %244 = vector.shape_cast %243 : vector<4x8xf32> to vector<4x8x1xf32>
    %245 = vector.broadcast %244 : vector<4x8x1xf32> to vector<4x8x8xf32>
    %246 = arith.subf %242, %245 : vector<4x8x8xf32>
    %247 = math.exp %246 : vector<4x8x8xf32>
    %cst_67 = arith.constant dense<0.000000e+00> : vector<4x8xf32>
    %248 = vector.multi_reduction <add>, %247, %cst_67 [2] : vector<4x8x8xf32> to vector<4x8xf32>
    %249 = vector.shape_cast %248 : vector<4x8xf32> to vector<4x8x1xf32>
    %250 = tpu.reciprocal %249 {approx = true} : vector<4x8x1xf32> -> vector<4x8x1xf32>
    %251 = vector.broadcast %250 : vector<4x8x1xf32> to vector<4x8x8xf32>
    %252 = arith.mulf %247, %251 : vector<4x8x8xf32>
    %253 = arith.truncf %252 : vector<4x8x8xf32> to vector<4x8x8xbf16>
    "tpu.trace_start"() <{level = 10 : i32, message = "hqk,hkd->hqd"}> : () -> ()
    %cst_68 = arith.constant dense<0.000000e+00> : vector<4x8x8xf32>
    %254 = tpu.matmul %253, %241, %cst_68 {dimension_numbers = #tpu.dot_dimension_numbers<[2], [1], [1], [2], [0, 0, 0, 1, 1, 2], [0], [0]>} : vector<4x8x8xbf16>, vector<4x8x8xbf16>, vector<4x8x8xf32> -> vector<4x8x8xf32>
    "tpu.trace_stop"() : () -> ()
    %255 = arith.truncf %254 : vector<4x8x8xf32> to vector<4x8x8xbf16>
    "tpu.trace_start"() <{level = 10 : i32, message = "hqd,hde->hqe"}> : () -> ()
    %cst_69 = arith.constant dense<0.000000e+00> : vector<4x8x32xf32>
    %256 = tpu.matmul %255, %197, %cst_69 {dimension_numbers = #tpu.dot_dimension_numbers<[2], [1], [1], [2], [0, 0, 0, 1, 1, 2], [0], [0]>} : vector<4x8x8xbf16>, vector<4x8x32xbf16>, vector<4x8x32xf32> -> vector<4x8x32xf32>
    "tpu.trace_stop"() : () -> ()
    %cst_70 = arith.constant dense<0.000000e+00> : vector<8x32xf32>
    %257 = vector.multi_reduction <add>, %256, %cst_70 [0] : vector<4x8x32xf32> to vector<8x32xf32>
    %258 = vector.extract_strided_slice %184 {offsets = [1, 0, 0], sizes = [1, 8, 8], strides = [1, 1, 1]} : vector<2x8x32xf32> to vector<1x8x8xf32>
    %259 = vector.shape_cast %258 : vector<1x8x8xf32> to vector<8x8xf32>
    %260 = vector.extract_strided_slice %184 {offsets = [1, 0, 8], sizes = [1, 8, 8], strides = [1, 1, 1]} : vector<2x8x32xf32> to vector<1x8x8xf32>
    %261 = vector.shape_cast %260 : vector<1x8x8xf32> to vector<8x8xf32>
    %262 = vector.extract_strided_slice %184 {offsets = [1, 0, 16], sizes = [1, 8, 8], strides = [1, 1, 1]} : vector<2x8x32xf32> to vector<1x8x8xf32>
    %263 = vector.shape_cast %262 : vector<1x8x8xf32> to vector<8x8xf32>
    %264 = vector.extract_strided_slice %184 {offsets = [1, 0, 24], sizes = [1, 8, 8], strides = [1, 1, 1]} : vector<2x8x32xf32> to vector<1x8x8xf32>
    %265 = vector.shape_cast %264 : vector<1x8x8xf32> to vector<8x8xf32>
    %266 = vector.shape_cast %259 : vector<8x8xf32> to vector<1x8x8xf32>
    %267 = vector.shape_cast %261 : vector<8x8xf32> to vector<1x8x8xf32>
    %268 = vector.shape_cast %263 : vector<8x8xf32> to vector<1x8x8xf32>
    %269 = vector.shape_cast %265 : vector<8x8xf32> to vector<1x8x8xf32>
    %270 = tpu.concatenate %266, %267, %268, %269 in 0 : vector<1x8x8xf32>, vector<1x8x8xf32>, vector<1x8x8xf32>, vector<1x8x8xf32> -> vector<4x8x8xf32>
    %271 = arith.truncf %270 : vector<4x8x8xf32> to vector<4x8x8xbf16>
    %272 = vector.extract_strided_slice %194 {offsets = [1, 0, 0], sizes = [1, 8, 8], strides = [1, 1, 1]} : vector<2x8x32xf32> to vector<1x8x8xf32>
    %273 = vector.shape_cast %272 : vector<1x8x8xf32> to vector<8x8xf32>
    %274 = vector.extract_strided_slice %194 {offsets = [1, 0, 8], sizes = [1, 8, 8], strides = [1, 1, 1]} : vector<2x8x32xf32> to vector<1x8x8xf32>
    %275 = vector.shape_cast %274 : vector<1x8x8xf32> to vector<8x8xf32>
    %276 = vector.extract_strided_slice %194 {offsets = [1, 0, 16], sizes = [1, 8, 8], strides = [1, 1, 1]} : vector<2x8x32xf32> to vector<1x8x8xf32>
    %277 = vector.shape_cast %276 : vector<1x8x8xf32> to vector<8x8xf32>
    %278 = vector.extract_strided_slice %194 {offsets = [1, 0, 24], sizes = [1, 8, 8], strides = [1, 1, 1]} : vector<2x8x32xf32> to vector<1x8x8xf32>
    %279 = vector.shape_cast %278 : vector<1x8x8xf32> to vector<8x8xf32>
    %280 = vector.shape_cast %273 : vector<8x8xf32> to vector<1x8x8xf32>
    %281 = vector.shape_cast %275 : vector<8x8xf32> to vector<1x8x8xf32>
    %282 = vector.shape_cast %277 : vector<8x8xf32> to vector<1x8x8xf32>
    %283 = vector.shape_cast %279 : vector<8x8xf32> to vector<1x8x8xf32>
    %284 = tpu.concatenate %280, %281, %282, %283 in 0 : vector<1x8x8xf32>, vector<1x8x8xf32>, vector<1x8x8xf32>, vector<1x8x8xf32> -> vector<4x8x8xf32>
    %285 = arith.truncf %284 : vector<4x8x8xf32> to vector<4x8x8xbf16>
    %286 = vector.extract_strided_slice %195 {offsets = [1, 0, 0], sizes = [1, 8, 8], strides = [1, 1, 1]} : vector<2x8x32xf32> to vector<1x8x8xf32>
    %287 = vector.shape_cast %286 : vector<1x8x8xf32> to vector<8x8xf32>
    %288 = vector.extract_strided_slice %195 {offsets = [1, 0, 8], sizes = [1, 8, 8], strides = [1, 1, 1]} : vector<2x8x32xf32> to vector<1x8x8xf32>
    %289 = vector.shape_cast %288 : vector<1x8x8xf32> to vector<8x8xf32>
    %290 = vector.extract_strided_slice %195 {offsets = [1, 0, 16], sizes = [1, 8, 8], strides = [1, 1, 1]} : vector<2x8x32xf32> to vector<1x8x8xf32>
    %291 = vector.shape_cast %290 : vector<1x8x8xf32> to vector<8x8xf32>
    %292 = vector.extract_strided_slice %195 {offsets = [1, 0, 24], sizes = [1, 8, 8], strides = [1, 1, 1]} : vector<2x8x32xf32> to vector<1x8x8xf32>
    %293 = vector.shape_cast %292 : vector<1x8x8xf32> to vector<8x8xf32>
    %294 = vector.shape_cast %287 : vector<8x8xf32> to vector<1x8x8xf32>
    %295 = vector.shape_cast %289 : vector<8x8xf32> to vector<1x8x8xf32>
    %296 = vector.shape_cast %291 : vector<8x8xf32> to vector<1x8x8xf32>
    %297 = vector.shape_cast %293 : vector<8x8xf32> to vector<1x8x8xf32>
    %298 = tpu.concatenate %294, %295, %296, %297 in 0 : vector<1x8x8xf32>, vector<1x8x8xf32>, vector<1x8x8xf32>, vector<1x8x8xf32> -> vector<4x8x8xf32>
    %299 = arith.truncf %298 : vector<4x8x8xf32> to vector<4x8x8xbf16>
    "tpu.trace_start"() <{level = 10 : i32, message = "hqd,hkd->hqk"}> : () -> ()
    %cst_71 = arith.constant dense<0.000000e+00> : vector<4x8x8xf32>
    %300 = tpu.matmul %271, %285, %cst_71 {dimension_numbers = #tpu.dot_dimension_numbers<[2], [2], [1], [1], [0, 0, 0, 1, 1, 1], [0], [0]>} : vector<4x8x8xbf16>, vector<4x8x8xbf16>, vector<4x8x8xf32> -> vector<4x8x8xf32>
    "tpu.trace_stop"() : () -> ()
    %cst_72 = arith.constant dense<0xFF800000> : vector<4x8xf32>
    %301 = vector.multi_reduction <maximumf>, %300, %cst_72 [2] : vector<4x8x8xf32> to vector<4x8xf32>
    %302 = vector.shape_cast %301 : vector<4x8xf32> to vector<4x8x1xf32>
    %303 = vector.broadcast %302 : vector<4x8x1xf32> to vector<4x8x8xf32>
    %304 = arith.subf %300, %303 : vector<4x8x8xf32>
    %305 = math.exp %304 : vector<4x8x8xf32>
    %cst_73 = arith.constant dense<0.000000e+00> : vector<4x8xf32>
    %306 = vector.multi_reduction <add>, %305, %cst_73 [2] : vector<4x8x8xf32> to vector<4x8xf32>
    %307 = vector.shape_cast %306 : vector<4x8xf32> to vector<4x8x1xf32>
    %308 = tpu.reciprocal %307 {approx = true} : vector<4x8x1xf32> -> vector<4x8x1xf32>
    %309 = vector.broadcast %308 : vector<4x8x1xf32> to vector<4x8x8xf32>
    %310 = arith.mulf %305, %309 : vector<4x8x8xf32>
    %311 = arith.truncf %310 : vector<4x8x8xf32> to vector<4x8x8xbf16>
    "tpu.trace_start"() <{level = 10 : i32, message = "hqk,hkd->hqd"}> : () -> ()
    %cst_74 = arith.constant dense<0.000000e+00> : vector<4x8x8xf32>
    %312 = tpu.matmul %311, %299, %cst_74 {dimension_numbers = #tpu.dot_dimension_numbers<[2], [1], [1], [2], [0, 0, 0, 1, 1, 2], [0], [0]>} : vector<4x8x8xbf16>, vector<4x8x8xbf16>, vector<4x8x8xf32> -> vector<4x8x8xf32>
    "tpu.trace_stop"() : () -> ()
    %313 = arith.truncf %312 : vector<4x8x8xf32> to vector<4x8x8xbf16>
    "tpu.trace_start"() <{level = 10 : i32, message = "hqd,hde->hqe"}> : () -> ()
    %cst_75 = arith.constant dense<0.000000e+00> : vector<4x8x32xf32>
    %314 = tpu.matmul %313, %197, %cst_75 {dimension_numbers = #tpu.dot_dimension_numbers<[2], [1], [1], [2], [0, 0, 0, 1, 1, 2], [0], [0]>} : vector<4x8x8xbf16>, vector<4x8x32xbf16>, vector<4x8x32xf32> -> vector<4x8x32xf32>
    "tpu.trace_stop"() : () -> ()
    %cst_76 = arith.constant dense<0.000000e+00> : vector<8x32xf32>
    %315 = vector.multi_reduction <add>, %314, %cst_76 [0] : vector<4x8x32xf32> to vector<8x32xf32>
    %316 = tpu.concatenate %257, %315 in 0 : vector<8x32xf32>, vector<8x32xf32> -> vector<16x32xf32>
    %317 = vector.broadcast %199 : vector<1x32xf32> to vector<16x32xf32>
    %318 = arith.addf %316, %317 : vector<16x32xf32>
    %319 = arith.addf %175, %318 : vector<16x32xf32>
    %c0_77 = arith.constant 0 : index
    %c0_78 = arith.constant 0 : index
    %c0_79 = arith.constant 0 : index
    %320 = vector.load %arg15[%c0_77, %c0_78, %c0_79] : memref<1x1x32xf32, #tpu.memory_space<vmem>>, vector<1x1x32xf32>
    %321 = vector.shape_cast %320 : vector<1x1x32xf32> to vector<1x32xf32>
    %c0_80 = arith.constant 0 : index
    %c0_81 = arith.constant 0 : index
    %c0_82 = arith.constant 0 : index
    %322 = vector.load %arg16[%c0_80, %c0_81, %c0_82] : memref<1x1x32xf32, #tpu.memory_space<vmem>>, vector<1x1x32xf32>
    %323 = vector.shape_cast %322 : vector<1x1x32xf32> to vector<1x32xf32>
    %cst_83 = arith.constant dense<0.000000e+00> : vector<16xf32>
    %324 = vector.multi_reduction <add>, %319, %cst_83 [1] : vector<16x32xf32> to vector<16xf32>
    %325 = vector.shape_cast %324 : vector<16xf32> to vector<16x1xf32>
    %cst_84 = arith.constant 3.200000e+01 : f32
    %326 = vector.broadcast %cst_84 : f32 to vector<16x1xf32>
    %327 = arith.divf %325, %326 : vector<16x1xf32>
    %328 = vector.broadcast %327 : vector<16x1xf32> to vector<16x32xf32>
    %329 = arith.subf %319, %328 : vector<16x32xf32>
    %330 = arith.mulf %329, %329 : vector<16x32xf32>
    %cst_85 = arith.constant dense<0.000000e+00> : vector<16xf32>
    %331 = vector.multi_reduction <add>, %330, %cst_85 [1] : vector<16x32xf32> to vector<16xf32>
    %332 = vector.shape_cast %331 : vector<16xf32> to vector<16x1xf32>
    %cst_86 = arith.constant 3.200000e+01 : f32
    %333 = vector.broadcast %cst_86 : f32 to vector<16x1xf32>
    %334 = arith.divf %332, %333 : vector<16x1xf32>
    %335 = vector.broadcast %327 : vector<16x1xf32> to vector<16x32xf32>
    %336 = arith.subf %319, %335 : vector<16x32xf32>
    %cst_87 = arith.constant 9.99999974E-6 : f32
    %337 = vector.broadcast %cst_87 : f32 to vector<16x1xf32>
    %338 = arith.addf %334, %337 : vector<16x1xf32>
    %339 = math.rsqrt %338 : vector<16x1xf32>
    %340 = vector.broadcast %339 : vector<16x1xf32> to vector<16x32xf32>
    %341 = arith.mulf %336, %340 : vector<16x32xf32>
    %342 = vector.broadcast %321 : vector<1x32xf32> to vector<16x32xf32>
    %343 = arith.mulf %341, %342 : vector<16x32xf32>
    %344 = vector.broadcast %323 : vector<1x32xf32> to vector<16x32xf32>
    %345 = arith.addf %343, %344 : vector<16x32xf32>
    %c0_88 = arith.constant 0 : index
    %c0_89 = arith.constant 0 : index
    %c0_90 = arith.constant 0 : index
    %346 = vector.load %arg17[%c0_88, %c0_89, %c0_90] : memref<1x32x64xbf16, #tpu.memory_space<vmem>>, vector<1x32x64xbf16>
    %347 = vector.shape_cast %346 : vector<1x32x64xbf16> to vector<32x64xbf16>
    %348 = arith.truncf %345 : vector<16x32xf32> to vector<16x32xbf16>
    %cst_91 = arith.constant dense<0.000000e+00> : vector<16x64xf32>
    %349 = tpu.matmul %348, %347, %cst_91 {dimension_numbers = #tpu.dot_dimension_numbers<[1], [0], [0], [1], [0, 0, 1, 1], [], []>} : vector<16x32xbf16>, vector<32x64xbf16>, vector<16x64xf32> -> vector<16x64xf32>
    %c0_92 = arith.constant 0 : index
    %c0_93 = arith.constant 0 : index
    %c0_94 = arith.constant 0 : index
    %350 = vector.load %arg18[%c0_92, %c0_93, %c0_94] : memref<1x1x64xf32, #tpu.memory_space<vmem>>, vector<1x1x64xf32>
    %351 = vector.shape_cast %350 : vector<1x1x64xf32> to vector<1x64xf32>
    %352 = vector.broadcast %351 : vector<1x64xf32> to vector<16x64xf32>
    %353 = arith.addf %349, %352 : vector<16x64xf32>
    %cst_95 = arith.constant 0.000000e+00 : f32
    %354 = vector.broadcast %cst_95 : f32 to vector<16x64xf32>
    %355 = arith.maximumf %353, %354 : vector<16x64xf32>
    %c0_96 = arith.constant 0 : index
    %c0_97 = arith.constant 0 : index
    %c0_98 = arith.constant 0 : index
    %356 = vector.load %arg19[%c0_96, %c0_97, %c0_98] : memref<1x64x32xbf16, #tpu.memory_space<vmem>>, vector<1x64x32xbf16>
    %357 = vector.shape_cast %356 : vector<1x64x32xbf16> to vector<64x32xbf16>
    %358 = arith.truncf %355 : vector<16x64xf32> to vector<16x64xbf16>
    %cst_99 = arith.constant dense<0.000000e+00> : vector<16x32xf32>
    %359 = tpu.matmul %358, %357, %cst_99 {dimension_numbers = #tpu.dot_dimension_numbers<[1], [0], [0], [1], [0, 0, 1, 1], [], []>} : vector<16x64xbf16>, vector<64x32xbf16>, vector<16x32xf32> -> vector<16x32xf32>
    %c0_100 = arith.constant 0 : index
    %c0_101 = arith.constant 0 : index
    %c0_102 = arith.constant 0 : index
    %360 = vector.load %arg20[%c0_100, %c0_101, %c0_102] : memref<1x1x32xf32, #tpu.memory_space<vmem>>, vector<1x1x32xf32>
    %361 = vector.shape_cast %360 : vector<1x1x32xf32> to vector<1x32xf32>
    %362 = vector.broadcast %361 : vector<1x32xf32> to vector<16x32xf32>
    %363 = arith.addf %359, %362 : vector<16x32xf32>
    %364 = arith.addf %345, %363 : vector<16x32xf32>
    %c0_103 = arith.constant 0 : index
    %c0_104 = arith.constant 0 : index
    %c0_105 = arith.constant 0 : index
    %365 = vector.load %arg21[%c0_103, %c0_104, %c0_105] : memref<1x1x32xf32, #tpu.memory_space<vmem>>, vector<1x1x32xf32>
    %366 = vector.shape_cast %365 : vector<1x1x32xf32> to vector<1x32xf32>
    %c0_106 = arith.constant 0 : index
    %c0_107 = arith.constant 0 : index
    %c0_108 = arith.constant 0 : index
    %367 = vector.load %arg22[%c0_106, %c0_107, %c0_108] : memref<1x1x32xf32, #tpu.memory_space<vmem>>, vector<1x1x32xf32>
    %368 = vector.shape_cast %367 : vector<1x1x32xf32> to vector<1x32xf32>
    %cst_109 = arith.constant dense<0.000000e+00> : vector<16xf32>
    %369 = vector.multi_reduction <add>, %364, %cst_109 [1] : vector<16x32xf32> to vector<16xf32>
    %370 = vector.shape_cast %369 : vector<16xf32> to vector<16x1xf32>
    %cst_110 = arith.constant 3.200000e+01 : f32
    %371 = vector.broadcast %cst_110 : f32 to vector<16x1xf32>
    %372 = arith.divf %370, %371 : vector<16x1xf32>
    %373 = vector.broadcast %372 : vector<16x1xf32> to vector<16x32xf32>
    %374 = arith.subf %364, %373 : vector<16x32xf32>
    %375 = arith.mulf %374, %374 : vector<16x32xf32>
    %cst_111 = arith.constant dense<0.000000e+00> : vector<16xf32>
    %376 = vector.multi_reduction <add>, %375, %cst_111 [1] : vector<16x32xf32> to vector<16xf32>
    %377 = vector.shape_cast %376 : vector<16xf32> to vector<16x1xf32>
    %cst_112 = arith.constant 3.200000e+01 : f32
    %378 = vector.broadcast %cst_112 : f32 to vector<16x1xf32>
    %379 = arith.divf %377, %378 : vector<16x1xf32>
    %380 = vector.broadcast %372 : vector<16x1xf32> to vector<16x32xf32>
    %381 = arith.subf %364, %380 : vector<16x32xf32>
    %cst_113 = arith.constant 9.99999974E-6 : f32
    %382 = vector.broadcast %cst_113 : f32 to vector<16x1xf32>
    %383 = arith.addf %379, %382 : vector<16x1xf32>
    %384 = math.rsqrt %383 : vector<16x1xf32>
    %385 = vector.broadcast %384 : vector<16x1xf32> to vector<16x32xf32>
    %386 = arith.mulf %381, %385 : vector<16x32xf32>
    %387 = vector.broadcast %366 : vector<1x32xf32> to vector<16x32xf32>
    %388 = arith.mulf %386, %387 : vector<16x32xf32>
    %389 = vector.broadcast %368 : vector<1x32xf32> to vector<16x32xf32>
    %390 = arith.addf %388, %389 : vector<16x32xf32>
    %391 = vector.shape_cast %390 : vector<16x32xf32> to vector<2x8x32xf32>
    %c0_114 = arith.constant 0 : index
    %c0_115 = arith.constant 0 : index
    %c0_116 = arith.constant 0 : index
    %392 = vector.load %arg24[%c0_114, %c0_115, %c0_116] : memref<2x8x32xf32, #tpu.memory_space<vmem>>, vector<2x8x32xf32>
    tpu.vector_store %arg24[%c0_114, %c0_115, %c0_116], %391 {strides = array<i32>} : memref<2x8x32xf32, #tpu.memory_space<vmem>>, vector<2x8x32xf32>,
    %c1_i32 = arith.constant 1 : i32
    %393 = arith.cmpi eq, %arg0, %c1_i32 : i32
    %394 = arith.extui %393 : i1 to i32
    %c0_i32_117 = arith.constant 0 : i32
    %395 = arith.cmpi ne, %394, %c0_i32_117 : i32
    scf.if %395 {
      %c0_118 = arith.constant 0 : index
      %c0_119 = arith.constant 0 : index
      %c0_120 = arith.constant 0 : index
      %396 = vector.load %arg23[%c0_118, %c0_119, %c0_120] : memref<2x8x32xf32, #tpu.memory_space<vmem>>, vector<2x8x32xf32>
      tpu.vector_store %arg23[%c0_118, %c0_119, %c0_120], %391 {strides = array<i32>} : memref<2x8x32xf32, #tpu.memory_space<vmem>>, vector<2x8x32xf32>,
    } else {
    }
    return
  }
  func.func @transform_0(%arg0: i32) -> (i32, i32, i32) {
    %c0_i32 = arith.constant 0 : i32
    %c0_i32_0 = arith.constant 0 : i32
    %c0_i32_1 = arith.constant 0 : i32
    %c0_i32_2 = arith.constant 0 : i32
    return %c0_i32, %c0_i32_0, %c0_i32_1 : i32, i32, i32
  }
  func.func @transform_1(%arg0: i32) -> (i32, i32, i32) {
    %c0_i32 = arith.constant 0 : i32
    %c0_i32_0 = arith.constant 0 : i32
    %c0_i32_1 = arith.constant 0 : i32
    %c0_i32_2 = arith.constant 0 : i32
    return %c0_i32, %c0_i32_0, %c0_i32_1 : i32, i32, i32
  }
  func.func @transform_2(%arg0: i32) -> (i32, i32, i32) {
    %c0_i32 = arith.constant 0 : i32
    %c0_i32_0 = arith.constant 0 : i32
    %c0_i32_1 = arith.constant 0 : i32
    return %arg0, %c0_i32, %c0_i32_0 : i32, i32, i32
  }
  func.func @transform_3(%arg0: i32) -> (i32, i32, i32) {
    %c0_i32 = arith.constant 0 : i32
    %c0_i32_0 = arith.constant 0 : i32
    %c0_i32_1 = arith.constant 0 : i32
    return %arg0, %c0_i32, %c0_i32_0 : i32, i32, i32
  }
  func.func @transform_4(%arg0: i32) -> (i32, i32, i32, i32) {
    %c0_i32 = arith.constant 0 : i32
    %c0_i32_0 = arith.constant 0 : i32
    %c0_i32_1 = arith.constant 0 : i32
    %c0_i32_2 = arith.constant 0 : i32
    return %arg0, %c0_i32, %c0_i32_0, %c0_i32_1 : i32, i32, i32, i32
  }
  func.func @transform_5(%arg0: i32) -> (i32, i32, i32) {
    %c0_i32 = arith.constant 0 : i32
    %c0_i32_0 = arith.constant 0 : i32
    %c0_i32_1 = arith.constant 0 : i32
    return %arg0, %c0_i32, %c0_i32_0 : i32, i32, i32
  }
  func.func @transform_6(%arg0: i32) -> (i32, i32, i32) {
    %c0_i32 = arith.constant 0 : i32
    %c0_i32_0 = arith.constant 0 : i32
    %c0_i32_1 = arith.constant 0 : i32
    return %arg0, %c0_i32, %c0_i32_0 : i32, i32, i32
  }
  func.func @transform_7(%arg0: i32) -> (i32, i32, i32) {
    %c0_i32 = arith.constant 0 : i32
    %c0_i32_0 = arith.constant 0 : i32
    %c0_i32_1 = arith.constant 0 : i32
    return %arg0, %c0_i32, %c0_i32_0 : i32, i32, i32
  }
  func.func @transform_8(%arg0: i32) -> (i32, i32, i32) {
    %c0_i32 = arith.constant 0 : i32
    %c0_i32_0 = arith.constant 0 : i32
    %c0_i32_1 = arith.constant 0 : i32
    return %arg0, %c0_i32, %c0_i32_0 : i32, i32, i32
  }
  func.func @transform_9(%arg0: i32) -> (i32, i32, i32) {
    %c0_i32 = arith.constant 0 : i32
    %c0_i32_0 = arith.constant 0 : i32
    %c0_i32_1 = arith.constant 0 : i32
    return %arg0, %c0_i32, %c0_i32_0 : i32, i32, i32
  }
  func.func @transform_10(%arg0: i32) -> (i32, i32, i32) {
    %c0_i32 = arith.constant 0 : i32
    %c0_i32_0 = arith.constant 0 : i32
    %c0_i32_1 = arith.constant 0 : i32
    return %arg0, %c0_i32, %c0_i32_0 : i32, i32, i32
  }
  func.func @transform_11(%arg0: i32) -> (i32, i32, i32) {
    %c0_i32 = arith.constant 0 : i32
    %c0_i32_0 = arith.constant 0 : i32
    %c0_i32_1 = arith.constant 0 : i32
    return %arg0, %c0_i32, %c0_i32_0 : i32, i32, i32
  }
  func.func @transform_12(%arg0: i32) -> (i32, i32, i32, i32) {
    %c0_i32 = arith.constant 0 : i32
    %c0_i32_0 = arith.constant 0 : i32
    %c0_i32_1 = arith.constant 0 : i32
    %c0_i32_2 = arith.constant 0 : i32
    return %arg0, %c0_i32, %c0_i32_0, %c0_i32_1 : i32, i32, i32, i32
  }
  func.func @transform_13(%arg0: i32) -> (i32, i32, i32) {
    %c0_i32 = arith.constant 0 : i32
    %c0_i32_0 = arith.constant 0 : i32
    %c0_i32_1 = arith.constant 0 : i32
    return %arg0, %c0_i32, %c0_i32_0 : i32, i32, i32
  }
  func.func @transform_14(%arg0: i32) -> (i32, i32, i32) {
    %c0_i32 = arith.constant 0 : i32
    %c0_i32_0 = arith.constant 0 : i32
    %c0_i32_1 = arith.constant 0 : i32
    return %arg0, %c0_i32, %c0_i32_0 : i32, i32, i32
  }
  func.func @transform_15(%arg0: i32) -> (i32, i32, i32) {
    %c0_i32 = arith.constant 0 : i32
    %c0_i32_0 = arith.constant 0 : i32
    %c0_i32_1 = arith.constant 0 : i32
    return %arg0, %c0_i32, %c0_i32_0 : i32, i32, i32
  }
  func.func @transform_16(%arg0: i32) -> (i32, i32, i32) {
    %c0_i32 = arith.constant 0 : i32
    %c0_i32_0 = arith.constant 0 : i32
    %c0_i32_1 = arith.constant 0 : i32
    return %arg0, %c0_i32, %c0_i32_0 : i32, i32, i32
  }
  func.func @transform_17(%arg0: i32) -> (i32, i32, i32) {
    %c0_i32 = arith.constant 0 : i32
    %c0_i32_0 = arith.constant 0 : i32
    %c0_i32_1 = arith.constant 0 : i32
    return %arg0, %c0_i32, %c0_i32_0 : i32, i32, i32
  }
  func.func @transform_18(%arg0: i32) -> (i32, i32, i32) {
    %c0_i32 = arith.constant 0 : i32
    %c0_i32_0 = arith.constant 0 : i32
    %c0_i32_1 = arith.constant 0 : i32
    return %arg0, %c0_i32, %c0_i32_0 : i32, i32, i32
  }
  func.func @transform_19(%arg0: i32) -> (i32, i32, i32) {
    %c0_i32 = arith.constant 0 : i32
    %c0_i32_0 = arith.constant 0 : i32
    %c0_i32_1 = arith.constant 0 : i32
    return %arg0, %c0_i32, %c0_i32_0 : i32, i32, i32
  }
  func.func @transform_20(%arg0: i32) -> (i32, i32, i32) {
    %c0_i32 = arith.constant 0 : i32
    %c0_i32_0 = arith.constant 0 : i32
    %c0_i32_1 = arith.constant 0 : i32
    return %arg0, %c0_i32, %c0_i32_0 : i32, i32, i32
  }
  func.func @transform_21(%arg0: i32) -> (i32, i32, i32) {
    %c0_i32 = arith.constant 0 : i32
    %c0_i32_0 = arith.constant 0 : i32
    %c0_i32_1 = arith.constant 0 : i32
    return %arg0, %c0_i32, %c0_i32_0 : i32, i32, i32
  }
  func.func @transform_22(%arg0: i32) -> (i32, i32, i32) {
    %c0_i32 = arith.constant 0 : i32
    %c0_i32_0 = arith.constant 0 : i32
    %c0_i32_1 = arith.constant 0 : i32
    %c0_i32_2 = arith.constant 0 : i32
    return %c0_i32, %c0_i32_0, %c0_i32_1 : i32, i32, i32
  }
}

</mosaic_0001>

<bundles_post_ra>
// kernel: transformer_forward.2
= control target key start
LH: loop header
LB: loop body
LE: loop exit
PB: predicated region body
PF: predicated region fallthrough
CT: control target
= control target key end

     0   :  { %s1904_s25 = smov 0   ;;  %s2218_s0 = inlined_call_operand.vmem [shape: f32[2,8,32], index: 0, kind: input, shape index: {}]   ;;  %s2219_s1 = inlined_call_operand.vmem [shape: bf16[2,32,96], index: 1, kind: input, shape index: {}]   ;;  %s2220_s2 = inlined_call_operand.vmem [shape: f32[2,1,96], index: 2, kind: input, shape index: {}]   ;;  %s2221_s3 = inlined_call_operand.vmem [shape: bf16[2,4,8,32], index: 3, kind: input, shape index: {}]   ;;  %s2222_s4 = inlined_call_operand.vmem [shape: f32[2,1,32], index: 4, kind: input, shape index: {}]   ;;  %s2223_s5 = inlined_call_operand.vmem [shape: f32[2,1,32], index: 5, kind: input, shape index: {}]   ;;  %s2224_s6 = inlined_call_operand.vmem [shape: f32[2,1,32], index: 6, kind: input, shape index: {}]   ;;  %s2225_s7 = inlined_call_operand.vmem [shape: bf16[2,32,64], index: 7, kind: input, shape index: {}]   ;;  %s2226_s8 = inlined_call_operand.vmem [shape: f32[2,1,64], index: 8, kind: input, shape index: {}]   ;;  %s2227_s9 = inlined_call_operand.vmem [shape: bf16[2,64,32], index: 9, kind: input, shape index: {}]   ;;  %s2228_s10 = inlined_call_operand.vmem [shape: f32[2,1,32], index: 10, kind: input, shape index: {}]   ;;  %s2229_s11 = inlined_call_operand.vmem [shape: f32[2,1,32], index: 11, kind: input, shape index: {}]   ;;  %s2230_s12 = inlined_call_operand.vmem [shape: f32[2,1,32], index: 12, kind: input, shape index: {}]   ;;  %s2231_s13 = inlined_call_operand.vmem [shape: f32[2,8,32], index: 13, kind: output, shape index: {}]  }
   0x1   :  { %2235 = sst [smem:[#allocation4_spill]] %s2218_s0 }
   0x2   :  { %2236 = sst [smem:[#allocation5_spill]] %s2219_s1 }
   0x3   :  { %2237 = sst [smem:[#allocation6_spill]] %s2220_s2 }
   0x4   :  { %2238 = sst [smem:[#allocation7_spill]] %s2221_s3 }
   0x5   :  { %2239 = sst [smem:[#allocation8_spill]] %s2231_s13 }
   0x6 LB: > { %2240 = sst [smem:[#allocation3_spill]] %s1826_s25  ;;  %s1910_s26 = sadd.s32 4294967295, %s1826_s25   ;;  %s1826_s25 = sphi %s1904_s25, %s23_s25  }
   0x7   : > { %p1672_p0 = scmp.ge.s32.totalorder %s1826_s25, 1  ;;  %p476_p1 = scmp.lt.s32.totalorder %s1826_s25, 3 }
   0x9   : > { %p477_p2 = pnand %p1672_p0, %p476_p1 }
   0xa   : > { %p554_p3 = scmp.lt.s32.totalorder (!%p477_p2), %s1910_s26, 1  ;;  %s2241_s2 = sld [smem:[#allocation6_spill]] (!%p477_p2) }
   0xb   : > { %480 = sbr.rel (%p477_p2) target bundleno = 2456 (0x998), region = 72  ;;  %s2242_s1 = sld [smem:[#allocation5_spill]] (!%p477_p2) }
   0xc   : > { %s2243_s3 = sld [smem:[#allocation7_spill]] (!%p477_p2)  ;;  %p1681_p4 = scmp.ne.s32.totalorder (!%p477_p2), %s1910_s26, 0 }
  0x10   : > { %s1916_s27 = scalar_select %p554_p3, %s1910_s26, 1 }
  0x11   : > { %s2244_s21 = sld [smem:[#allocation4_spill]] (!%p1681_p4) }
  0x12   : > { %s1744_s28 = sshll.u32 %s1916_s27, 4  ;;  %s561_s14 = scalar_lea.vmem %s2241_s2, %s1916_s27 }
  0x13   : > { %s558_s17 = scalar_lea.vmem %s2242_s1, %s1744_s28  ;;  %s1929_s20 = scalar_lea.vmem %s2243_s3, %s1744_s28 }
  0x14   : > { %s1946_s16 = scalar_lea.vmem %s2225_s7, %s1744_s28  ;;  %s583_s1 = scalar_lea.vmem %s2226_s8, %s1916_s27 }
  0x15   : > { %s1747_s3 = sshll.u32 %s1916_s27, 5  ;;  %s591_s0 = scalar_lea.vmem %s2228_s10, %s1916_s27 }
  0x16   : > { %s1956_s23 = scalar_lea.vmem %s2227_s9, %s1747_s3  ;;  %s594_s2 = scalar_lea.vmem %s2229_s11, %s1916_s27 }
  0x17   : > { %s597_s13 = scalar_lea.vmem %s2230_s12, %s1916_s27  ;;  %602 = sbr.rel (%p1681_p4) target bundleno = 31 (0x1f), region = 76 }
  0x1c   : > { %v603_v0 = vld [vmem:[%s2244_s21] sm:$0xff]  ;;  %vm605_vm0 = vcmask 261120   ;;  %v604_v1 = vld [vmem:[%s2244_s21 + $0x8] sm:$0xff] }
  0x1d   : > { %606 = vst.msk [vmem:[#allocation2] sm:$0xff] %vm605_vm0, %v603_v0 }
  0x1e   : > { %607 = vst.msk [vmem:[#allocation2 + $0x8] sm:$0xff] %vm605_vm0, %v604_v1 }
  0x1f PF: > { %v1749_v2 = vld [vmem:[%s558_s17 + $0x8] sm:$0xff]  ;;  %v1748_v3 = vld [vmem:[%s558_s17] sm:$0xff]  ;;  %vm631_vm1 = vcmask 261120   ;;  %s1828_s30 = smov 104   ;;  %s1829_s17 = smov 120   ;;  %vm673_vm2 = vcmask 64512  }
  0x20   : > { %641 = vmatpush.bf16.msra.mxu0 %v1749_v2  ;;  %v1984_v7 = vld [vmem:[%s561_s14] ss:$0 sm:$0xff]  ;;  %s1830_s25 = smov 112   ;;  %s1831_s14 = smov 96   ;;  %vm818_vm3 = vcmask 1043456   ;;  %vm1449_vm11 = vcmask 523264  }
  0x21   : > { %s1832_s24 = smov 64   ;;  %s2245_s28 = scalar_lea.vmem %s2222_s4, %s1916_s27 }
  0x22   : > { %s2246_s18 = scalar_lea.vmem %s2223_s5, %s1916_s27  ;;  %s2247_s22 = scalar_lea.vmem %s2224_s6, %s1916_s27 }
  0x23   : > { %p1741_p5 = scmp.ne.s32.totalorder %s1910_s26, 1 }
  0x24   : > { %v1977_v4 = vld [vmem:[#allocation2] sm:$0xff]  ;;  %642 = vmatpush.bf16.msra.mxu0 %v1748_v3 }
  0x25   : > { %v1979_v5 = vld [vmem:[#allocation2 + $0x8] sm:$0xff] }
  0x26   : > { %v614_v6 = vpack.c.bf16 %v1979_v5, %v1977_v4 }
  0x28   : > { %1690 = vmatmul.msk.bf16.vlgmr.msra.gmra.mxu0 %vm631_vm1, %v614_v6 }
  0xa5   : > { %v644_v8 = vpop.f32.mrf.mxu0 }
  0xa6   : > { %v645_v9 = vadd.f32 %v1984_v7, %v644_v8 }
  0xa8   : > { %661 = vrot.lane.b32.xlu1 %v645_v9, %s1828_s30  ;;  %655 = vrot.lane.b32.xlu0 %v645_v9, %s1829_s17  ;;  %v664_v22 = vpack.c.bf16 %v645_v9, %v645_v9 }
  0xaa   : > { %v669_v23 = vunpack.c.l.b16 %v664_v22 }
  0xac   : > { %v670_v24 = vpack.c.b16 %v669_v23, %v669_v23 }
  0xad   : > { %v646_v35 = vpop.f32.mrf.mxu0 }
  0xae   : > { %v2015_v46 = vadd.f32 %v1984_v7, %v646_v35 }
  0xb0   : > { %658 = vrot.lane.b32.xlu0 %v645_v9, %s1830_s25 }
 0x11a   : > { %v662_v10 = vpop.permute.xlu1 %661  ;;  %v656_v11 = vpop.permute.xlu0 %655 }
 0x11b   : > { %v667_v12 = vpack.c.bf16 %v662_v10, %v662_v10  ;;  %v665_v13 = vpack.c.bf16 %v656_v11, %v656_v11 }
 0x11d   : > { %v742_v14 = vunpack.c.l.b16 %v667_v12  ;;  %v694_v15 = vunpack.c.l.b16 %v665_v13 }
 0x11f   : > { %v1990_v16 = vpack.c.b16 %v742_v14, %v742_v14  ;;  %v695_v17 = vpack.c.b16 %v694_v15, %v694_v15 }
 0x121   : > { %744 = vrot.lane.b32.xlu0 %v1990_v16, %s1831_s14  ;;  %696 = vrot.lane.b32.xlu1 %v695_v17, %s1831_s14 }
 0x122   : > { %v659_v18 = vpop.permute.xlu0 %658 }
 0x123   : > { %v666_v19 = vpack.c.bf16 %v659_v18, %v659_v18 }
 0x125   : > { %v718_v20 = vunpack.c.l.b16 %v666_v19 }
 0x127   : > { %v1995_v21 = vpack.c.b16 %v718_v20, %v718_v20 }
 0x129   : > { %720 = vrot.lane.b32.xlu2 %v1995_v21, %s1831_s14 }
 0x131   : > { %671 = vrot.lane.b32.xlu2 %v670_v24, %s1831_s14 }
 0x183   : > { %v721_v25 = vpop.permute.xlu2 %720 }
 0x184   : > { %v726_v26 = vsel %vm673_vm2, %v721_v25, 0 }
 0x185   : > { %735 = vmatpush.bf16.xpose.msra.mxu3 %v726_v26 }
 0x18b   : > { %v672_v27 = vpop.permute.xlu2 %671 }
 0x18c   : > { %1693 = vmatmul.msk.bf16.vlgmr.msra.gmra.mxu3 %vm673_vm2, %v666_v19  ;;  %v678_v28 = vsel %vm673_vm2, %v672_v27, 0 }
 0x18d   : > { %687 = vmatpush.bf16.xpose.msra.mxu1 %v678_v28 }
 0x193   : > { %v697_v29 = vpop.permute.xlu1 %696  ;;  %v745_v30 = vpop.permute.xlu0 %744 }
 0x194   : > { %1691 = vmatmul.msk.bf16.vlgmr.msra.gmra.mxu1 %vm673_vm2, %v664_v22  ;;  %v702_v31 = vsel %vm673_vm2, %v697_v29, 0  ;;  %v750_v32 = vsel %vm673_vm2, %v745_v30, 0  ;;  %v651_v29 = vld [vmem:[%s1929_s20 + $0x8] sm:$0xf] }
 0x195   : > { %711 = vmatpush.bf16.xpose.msra.mxu2 %v702_v31  ;;  %759 = vmatpush.bf16.xpose.msrb.mxu0 %v750_v32  ;;  %v2046_v32 = vsel %vm818_vm3, %v651_v29, 0 }
 0x19c   : > { %1692 = vmatmul.msk.bf16.vlgmr.msra.gmra.mxu2 %vm673_vm2, %v665_v13  ;;  %1694 = vmatmul.msk.bf16.vlgmr.msrb.gmra.mxu0 %vm673_vm2, %v667_v12 }
 0x20f   : > { %v737_v33 = vpop.f32.mrf.mxu3 }
 0x210   : > { %v771_v34 = vsel %vm673_vm2, %v737_v33, -inf }
 0x211   : > { %772 = vmax.xlane.f32.xlu2 %v771_v34  ;;  %v689_v36 = vpop.f32.mrf.mxu1 }
 0x212   : > { %v765_v37 = vsel %vm673_vm2, %v689_v36, -inf }
 0x213   : > { %766 = vmax.xlane.f32.xlu0 %v765_v37 }
 0x217   : > { %v739_v38 = vpop.f32.mrf.mxu3 }
 0x219   : > { %v691_v39 = vpop.f32.mrf.mxu1  ;;  %v761_v40 = vpop.f32.mrf.mxu0 }
 0x21a   : > { %v774_v41 = vsel %vm673_vm2, %v761_v40, -inf  ;;  %v995_v39 = vpack.c.bf16 %v2015_v46, %v2015_v46 }
 0x21b   : > { %775 = vmax.xlane.f32.xlu2 %v774_v41 }
 0x21f   : > { %v713_v42 = vpop.f32.mrf.mxu2 }
 0x220   : > { %v768_v43 = vsel %vm673_vm2, %v713_v42, -inf }
 0x221   : > { %769 = vmax.xlane.f32.xlu1 %v768_v43  ;;  %v763_v44 = vpop.f32.mrf.mxu0 }
 0x227   : > { %v715_v45 = vpop.f32.mrf.mxu2  ;;  %835 = vrot.lane.b32.xlu0 %v695_v17, %s1832_s24 }
 0x22f   : > { %813 = vrot.lane.b32.xlu0 %v670_v24, %s1832_s24 }
 0x237   : > { %989 = vrot.lane.b32.xlu0 %v2015_v46, %s1830_s25 }
 0x284   : > { %v773_v47 = vpop.xlane.xlu2 %772 }
 0x285   : > { %v779_v53 = vsub.f32 %v737_v33, %v773_v47 }
 0x286   : > { %v767_v48 = vpop.xlane.xlu0 %766 }
 0x287   : > { %v777_v49 = vsub.f32 %v689_v36, %v767_v48  ;;  %v785_v57 = vmul.f32 1.442695, %v779_v53  ;;  %v649_v48 = vld [vmem:[%s1929_s20] sm:$0xf] }
 0x289   : > { %v781_v50 = vmul.f32 1.442695, %v777_v49  ;;  %v2068_v49 = vsel %vm818_vm3, %v649_v48, 0 }
 0x28b   : > { %1778 = vpow2.f32 %v781_v50  ;;  %v652_v50 = vld [vmem:[%s1929_s20 + $0xc] sm:$0xf] }
 0x28e   : > { %v776_v51 = vpop.xlane.xlu2 %775 }
 0x28f   : > { %v780_v52 = vsub.f32 %v761_v40, %v776_v51  ;;  %v2073_v51 = vsel %vm818_vm3, %v652_v50, 0 }
 0x291   : > { %v1779_v54 = vpop.eup %1778  ;;  %v787_v55 = vmul.f32 1.442695, %v780_v52  ;;  %v650_v52 = vld [vmem:[%s1929_s20 + $0x4] sm:$0xf] }
 0x292   : > { %v789_v56 = vsel %vm673_vm2, %v1779_v54, 0.0  ;;  %v2078_v53 = vsel %vm818_vm3, %v650_v52, 0 }
 0x293   : > { %1780 = vpow2.f32 %v787_v55  ;;  %790 = vadd.xlane.f32.xlu2 %v789_v56 }
 0x294   : > { %v770_v58 = vpop.xlane.xlu1 %769  ;;  %1782 = vpow2.f32 %v785_v57 }
 0x295   : > { %v778_v59 = vsub.f32 %v713_v42, %v770_v58  ;;  %v1000_v42 = vunpack.c.l.b16 %v995_v39 }
 0x297   : > { %v783_v60 = vmul.f32 1.442695, %v778_v59  ;;  %v2059_v45 = vpack.c.b16 %v1000_v42, %v1000_v42 }
 0x299   : > { %v1781_v61 = vpop.eup %1780  ;;  %1784 = vpow2.f32 %v783_v60  ;;  %v836_v62 = vpop.permute.xlu0 %835 }
 0x29a   : > { %v841_v63 = vsel %vm818_vm3, %v836_v62, 0  ;;  %v798_v0 = vsel %vm673_vm2, %v1781_v61, 0.0  ;;  %v1783_v1 = vpop.eup %1782 }
 0x29b   : > { %850 = vmatpush.bf16.msrb.mxu2 %v841_v63  ;;  %799 = vadd.xlane.f32.xlu2 %v798_v0  ;;  %v795_v8 = vsel %vm673_vm2, %v1783_v1, 0.0 }
 0x29f   : > { %v1785_v2 = vpop.eup %1784  ;;  %934 = vmatpush.bf16.msra.mxu2 %v2078_v53 }
 0x2a0   : > { %v792_v3 = vsel %vm673_vm2, %v1785_v2, 0.0 }
 0x2a1   : > { %793 = vadd.xlane.f32.xlu1 %v792_v3  ;;  %v814_v6 = vpop.permute.xlu0 %813 }
 0x2a2   : > { %v820_v7 = vsel %vm818_vm3, %v814_v6, 0 }
 0x2a3   : > { %829 = vmatpush.bf16.msrb.mxu1 %v820_v7  ;;  %796 = vadd.xlane.f32.xlu2 %v795_v8 }
 0x2a7   : > { %915 = vmatpush.bf16.msra.mxu1 %v2068_v49 }
 0x2a9   : > { %v990_v9 = vpop.permute.xlu0 %989 }
 0x2aa   : > { %v2031_v10 = vpack.c.bf16 %v990_v9, %v990_v9 }
 0x2ac   : > { %v1048_v11 = vunpack.c.l.b16 %v2031_v10 }
 0x2ae   : > { %v2036_v12 = vpack.c.b16 %v1048_v11, %v1048_v11 }
 0x2ba   : > { %856 = vrot.lane.b32.xlu1 %v1995_v21, %s1832_s24 }
 0x2bb   : > { %877 = vrot.lane.b32.xlu2 %v1990_v16, %s1832_s24 }
 0x2c2   : > { %986 = vrot.lane.b32.xlu1 %v2015_v46, %s1829_s17 }
 0x2ca   : > { %992 = vrot.lane.b32.xlu1 %v2015_v46, %s1828_s30 }
 0x2d2   : > { %1050 = vrot.lane.b32.xlu1 %v2036_v12, %s1831_s14 }
 0x306   : > { %v791_v13 = vpop.xlane.xlu2 %790 }
 0x307   : > { %1786 = vrcp.f32 %v791_v13 }
 0x30d   : > { %v1787_v14 = vpop.eup %1786 }
 0x30e   : > { %v805_v15 = vmul.f32 %v1787_v14, %v1779_v54  ;;  %v800_v16 = vpop.xlane.xlu2 %799 }
 0x30f   : > { %1788 = vrcp.f32 %v800_v16 }
 0x310   : > { %v809_v17 = vpack.c.bf16 %v805_v15, %v805_v15 }
 0x312   : > { %1695 = vmatmul.msk.bf16.vlgmr.msrb.gmra.mxu1 %vm673_vm2, %v809_v17 }
 0x314   : > { %v794_v18 = vpop.xlane.xlu1 %793 }
 0x315   : > { %1790 = vrcp.f32 %v794_v18  ;;  %v1789_v20 = vpop.eup %1788 }
 0x316   : > { %v797_v19 = vpop.xlane.xlu2 %796  ;;  %v808_v23 = vmul.f32 %v1789_v20, %v1781_v61 }
 0x317   : > { %1792 = vrcp.f32 %v797_v19 }
 0x318   : > { %v812_v27 = vpack.c.bf16 %v808_v23, %v808_v23 }
 0x31b   : > { %v1791_v21 = vpop.eup %1790 }
 0x31c   : > { %v806_v22 = vmul.f32 %v1791_v21, %v1785_v2 }
 0x31d   : > { %v1793_v28 = vpop.eup %1792 }
 0x31e   : > { %v878_v24 = vpop.permute.xlu2 %877  ;;  %v810_v25 = vpack.c.bf16 %v806_v22, %v806_v22  ;;  %v807_v30 = vmul.f32 %v1793_v28, %v1783_v1 }
 0x31f   : > { %v883_v26 = vsel %vm818_vm3, %v878_v24, 0 }
 0x320   : > { %1696 = vmatmul.msk.bf16.vlgmr.msrb.gmra.mxu2 %vm673_vm2, %v810_v25  ;;  %892 = vmatpush.bf16.msra.mxu0 %v883_v26  ;;  %v811_v34 = vpack.c.bf16 %v807_v30, %v807_v30 }
 0x323   : > { %1698 = vmatmul.msk.bf16.vlgmr.msra.gmra.mxu0 %vm673_vm2, %v812_v27 }
 0x324   : > { %972 = vmatpush.bf16.msrb.mxu0 %v2073_v51 }
 0x32c   : > { %v857_v31 = vpop.permute.xlu1 %856 }
 0x32d   : > { %v862_v33 = vsel %vm818_vm3, %v857_v31, 0 }
 0x32e   : > { %871 = vmatpush.bf16.msrb.mxu3 %v862_v33 }
 0x331   : > { %1697 = vmatmul.msk.bf16.vlgmr.msrb.gmra.mxu3 %vm673_vm2, %v811_v34 }
 0x332   : > { %953 = vmatpush.bf16.msra.mxu3 %v2046_v32 }
 0x334   : > { %v987_v35 = vpop.permute.xlu1 %986 }
 0x335   : > { %v996_v36 = vpack.c.bf16 %v987_v35, %v987_v35 }
 0x337   : > { %v1024_v37 = vunpack.c.l.b16 %v996_v36 }
 0x339   : > { %v2051_v38 = vpack.c.b16 %v1024_v37, %v1024_v37 }
 0x33b   : > { %1026 = vrot.lane.b32.xlu0 %v2051_v38, %s1831_s14 }
 0x33c   : > { %v993_v40 = vpop.permute.xlu1 %992 }
 0x33d   : > { %v998_v41 = vpack.c.bf16 %v993_v40, %v993_v40  ;;  %v2110_v40 = vld [vmem:[%s2245_s28] ss:$0 sm:$0xff] }
 0x33f   : > { %v1072_v43 = vunpack.c.l.b16 %v998_v41 }
 0x341   : > { %v2057_v44 = vpack.c.b16 %v1072_v43, %v1072_v43 }
 0x343   : > { %1002 = vrot.lane.b32.xlu0 %v2059_v45, %s1831_s14  ;;  %1074 = vrot.lane.b32.xlu2 %v2057_v44, %s1831_s14 }
 0x344   : > { %v1051_v46 = vpop.permute.xlu1 %1050 }
 0x345   : > { %v1056_v47 = vsel %vm673_vm2, %v1051_v46, 0 }
 0x346   : > { %1065 = vmatpush.bf16.xpose.msrb.mxu3 %v1056_v47 }
 0x38f   : > { %v831_v54 = vpop.f32.mrf.mxu1 }
 0x390   : > { %v898_v55 = vpack.c.bf16 %v831_v54, %v831_v54 }
 0x392   : > { %1699 = vmatmul.msk.bf16.vlgmr.msra.gmra.mxu1 %vm673_vm2, %v898_v55 }
 0x397   : > { %v833_v56 = vpop.f32.mrf.mxu1 }
 0x39d   : > { %v1075_v57 = vpop.permute.xlu2 %1074 }
 0x39e   : > { %v1080_v58 = vsel %vm673_vm2, %v1075_v57, 0 }
 0x39f   : > { %1089 = vmatpush.bf16.xpose.msra.mxu0 %v1080_v58 }
 0x3a0   : > { %v894_v59 = vpop.f32.mrf.mxu0 }
 0x3a1   : > { %v901_v60 = vpack.c.bf16 %v894_v59, %v894_v59 }
 0x3a3   : > { %v852_v61 = vpop.f32.mrf.mxu2  ;;  %1702 = vmatmul.msk.bf16.vlgmr.msrb.gmra.mxu0 %vm673_vm2, %v901_v60 }
 0x3a4   : > { %v899_v62 = vpack.c.bf16 %v852_v61, %v852_v61 }
 0x3a6   : > { %1700 = vmatmul.msk.bf16.vlgmr.msra.gmra.mxu2 %vm673_vm2, %v899_v62 }
 0x3a8   : > { %v896_v63 = vpop.f32.mrf.mxu0 }
 0x3ab   : > { %v854_v0 = vpop.f32.mrf.mxu2 }
 0x3ad   : > { %v1027_v1 = vpop.permute.xlu0 %1026 }
 0x3ae   : > { %v1032_v2 = vsel %vm673_vm2, %v1027_v1, 0 }
 0x3af   : > { %1041 = vmatpush.bf16.xpose.msrb.mxu2 %v1032_v2 }
 0x3b3   : > { %1706 = vmatmul.msk.bf16.vlgmr.msra.gmra.mxu0 %vm673_vm2, %v998_v41 }
 0x3b4   : > { %v873_v3 = vpop.f32.mrf.mxu3 }
 0x3b5   : > { %v900_v6 = vpack.c.bf16 %v873_v3, %v873_v3  ;;  %v1003_v7 = vpop.permute.xlu0 %1002 }
 0x3b6   : > { %v1008_v8 = vsel %vm673_vm2, %v1003_v7, 0  ;;  %1704 = vmatmul.msk.bf16.vlgmr.msrb.gmra.mxu2 %vm673_vm2, %v996_v36 }
 0x3b7   : > { %1701 = vmatmul.msk.bf16.vlgmr.msra.gmra.mxu3 %vm673_vm2, %v900_v6  ;;  %1017 = vmatpush.bf16.xpose.msrb.mxu1 %v1008_v8  ;;  %v1833_v8 = vmov 32.0  }
 0x3bc   : > { %v875_v9 = vpop.f32.mrf.mxu3 }
 0x3be   : > { %1703 = vmatmul.msk.bf16.vlgmr.msrb.gmra.mxu1 %vm673_vm2, %v995_v39 }
 0x3c7   : > { %1705 = vmatmul.msk.bf16.vlgmr.msrb.gmra.mxu3 %vm673_vm2, %v2031_v10 }
 0x40f   : > { %v917_v11 = vpop.f32.mrf.mxu1 }
 0x410   : > { %v978_v17 = vsel %vm631_vm1, %v917_v11, 0.0 }
 0x417   : > { %v919_v13 = vpop.f32.mrf.mxu1 }
 0x420   : > { %v974_v14 = vpop.f32.mrf.mxu0 }
 0x421   : > { %v983_v29 = vsel %vm631_vm1, %v974_v14, 0.0 }
 0x428   : > { %v976_v15 = vpop.f32.mrf.mxu0 }
 0x429   : > { %v936_v16 = vpop.f32.mrf.mxu2 }
 0x42a   : > { %v979_v18 = vsel %vm631_vm1, %v936_v16, 0.0 }
 0x42b   : > { %v980_v19 = vadd.f32 %v979_v18, %v978_v17 }
 0x430   : > { %v1091_v20 = vpop.f32.mrf.mxu0 }
 0x431   : > { %v938_v21 = vpop.f32.mrf.mxu2  ;;  %v1104_v34 = vsel %vm673_vm2, %v1091_v20, -inf }
 0x438   : > { %v1093_v22 = vpop.f32.mrf.mxu0 }
 0x439   : > { %v1043_v23 = vpop.f32.mrf.mxu2 }
 0x43a   : > { %v955_v24 = vpop.f32.mrf.mxu3  ;;  %v1098_v25 = vsel %vm673_vm2, %v1043_v23, -inf }
 0x43b   : > { %v981_v26 = vsel %vm631_vm1, %v955_v24, 0.0  ;;  %1099 = vmax.xlane.f32.xlu1 %v1098_v25  ;;  %v1019_v10 = vpop.f32.mrf.mxu1 }
 0x43c   : > { %v982_v27 = vadd.f32 %v981_v26, %v980_v19  ;;  %v1095_v28 = vsel %vm673_vm2, %v1019_v10, -inf }
 0x43d   : > { %1096 = vmax.xlane.f32.xlu2 %v1095_v28 }
 0x43e   : > { %v984_v30 = vadd.f32 %v983_v29, %v982_v27 }
 0x440   : > { %v1305_v41 = vadd.f32 %v2110_v40, %v984_v30 }
 0x441   : > { %v1045_v31 = vpop.f32.mrf.mxu2 }
 0x442   : > { %v957_v33 = vpop.f32.mrf.mxu3  ;;  %v1307_v42 = vadd.f32 %v1305_v41, %v1977_v4 }
 0x443   : > { %v1021_v35 = vpop.f32.mrf.mxu1  ;;  %1105 = vmax.xlane.f32.xlu1 %v1104_v34 }
 0x444   : > { %v1311_v43 = vsel %vm631_vm1, %v1307_v42, 0.0 }
 0x44a   : > { %v1067_v36 = vpop.f32.mrf.mxu3 }
 0x44b   : > { %v1101_v37 = vsel %vm673_vm2, %v1067_v36, -inf }
 0x44c   : > { %1102 = vmax.xlane.f32.xlu0 %v1101_v37 }
 0x452   : > { %v1069_v39 = vpop.f32.mrf.mxu3 }
 0x45c   : > { %1164 = vrot.lane.b32.xlu1 %v2051_v38, %s1832_s24 }
 0x460   : > { %1185 = vrot.lane.b32.xlu0 %v2036_v12, %s1832_s24 }
 0x486   : > { %1312 = vadd.xlane.f32.xlu1 %v1311_v43 }
 0x4ae   : > { %v1100_v46 = vpop.xlane.xlu1 %1099 }
 0x4af   : > { %v1108_v47 = vsub.f32 %v1043_v23, %v1100_v46 }
 0x4b0   : > { %v1097_v48 = vpop.xlane.xlu2 %1096 }
 0x4b1   : > { %v1113_v38 = vmul.f32 1.442695, %v1108_v47  ;;  %v1107_v50 = vsub.f32 %v1019_v10, %v1097_v48 }
 0x4b3   : > { %1794 = vpow2.f32 %v1113_v38  ;;  %v1111_v12 = vmul.f32 1.442695, %v1107_v50 }
 0x4b5   : > { %1796 = vpow2.f32 %v1111_v12 }
 0x4b6   : > { %v1106_v52 = vpop.xlane.xlu1 %1105 }
 0x4b7   : > { %v1110_v54 = vsub.f32 %v1091_v20, %v1106_v52 }
 0x4b9   : > { %v1795_v55 = vpop.eup %1794  ;;  %v1117_v56 = vmul.f32 1.442695, %v1110_v54 }
 0x4ba   : > { %v1122_v57 = vsel %vm673_vm2, %v1795_v55, 0.0 }
 0x4bb   : > { %v1797_v58 = vpop.eup %1796  ;;  %1798 = vpow2.f32 %v1117_v56  ;;  %1123 = vadd.xlane.f32.xlu0 %v1122_v57 }
 0x4bc   : > { %v1119_v4 = vsel %vm673_vm2, %v1797_v58, 0.0 }
 0x4bd   : > { %1120 = vadd.xlane.f32.xlu2 %v1119_v4 }
 0x4bf   : > { %v1103_v59 = vpop.xlane.xlu0 %1102 }
 0x4c0   : > { %v1109_v60 = vsub.f32 %v1067_v36, %v1103_v59 }
 0x4c1   : > { %v1799_v61 = vpop.eup %1798 }
 0x4c2   : > { %v1115_v62 = vmul.f32 1.442695, %v1109_v60  ;;  %v1128_v63 = vsel %vm673_vm2, %v1799_v61, 0.0 }
 0x4c4   : > { %1800 = vpow2.f32 %v1115_v62 }
 0x4c5   : > { %1129 = vadd.xlane.f32.xlu2 %v1128_v63  ;;  %1802 = vrcp.f32 %v1833_v8 }
 0x4ca   : > { %v1801_v0 = vpop.eup %1800 }
 0x4cb   : > { %v1125_v1 = vsel %vm673_vm2, %v1801_v0, 0.0  ;;  %v1803_v9 = vpop.eup %1802 }
 0x4cc   : > { %v1318_v11 = vmul.f32 32.0, %v1803_v9  ;;  %vm1322_vm4 = vweird.f32 %v1803_v9 }
 0x4cd   : > { %1126 = vadd.xlane.f32.xlu2 %v1125_v1 }
 0x4ce   : > { %v1165_v2 = vpop.permute.xlu1 %1164  ;;  %v1319_v13 = vsub.f32 1.0, %v1318_v11 }
 0x4cf   : > { %v1170_v3 = vsel %vm818_vm3, %v1165_v2, 0  ;;  %1206 = vrot.lane.b32.xlu0 %v2057_v44, %s1832_s24 }
 0x4d0   : > { %1179 = vmatpush.bf16.msra.mxu2 %v1170_v3  ;;  %v1320_v14 = vmul.f32 %v1803_v9, %v1319_v13 }
 0x4d2   : > { %v1186_v6 = vpop.permute.xlu0 %1185  ;;  %v1321_v15 = vadd.f32 %v1803_v9, %v1320_v14 }
 0x4d3   : > { %v1191_v7 = vsel %vm818_vm3, %v1186_v6, 0 }
 0x4d4   : > { %1257 = vmatpush.bf16.msrb.mxu2 %v2078_v53  ;;  %1200 = vmatpush.bf16.msra.mxu3 %v1191_v7  ;;  %v2127_v44 = vsel %vm1322_vm4, %v1803_v9, %v1321_v15 }
 0x4d8   : > { %1273 = vmatpush.bf16.msrb.mxu3 %v2046_v32 }
 0x4e5   : > { %1143 = vrot.lane.b32.xlu2 %v2059_v45, %s1832_s24 }
 0x4f9   : > { %v1313_v53 = vpop.xlane.xlu1 %1312 }
 0x4fa   : > { %v1324_v16 = vmul.f32 %v2127_v44, %v1313_v53 }
 0x4fc   : > { %v2130_v17 = vsub.f32 %v1307_v42, %v1324_v16 }
 0x4fe   : > { %v1328_v32 = vmul.f32 %v2130_v17, %v2130_v17 }
 0x500   : > { %v1330_v45 = vsel %vm631_vm1, %v1328_v32, 0.0  ;;  %v1750_v32 = vld [vmem:[%s1946_s16] sm:$0xff] }
 0x50e   : > { %1331 = vadd.xlane.f32.xlu2 %v1330_v45 }
 0x52e   : > { %v1124_v18 = vpop.xlane.xlu0 %1123 }
 0x52f   : > { %1804 = vrcp.f32 %v1124_v18 }
 0x530   : > { %v1121_v19 = vpop.xlane.xlu2 %1120 }
 0x535   : > { %v1805_v20 = vpop.eup %1804 }
 0x536   : > { %v1136_v21 = vmul.f32 %v1805_v20, %v1795_v55 }
 0x538   : > { %v1140_v22 = vpack.c.bf16 %v1136_v21, %v1136_v21  ;;  %v1130_v23 = vpop.xlane.xlu2 %1129 }
 0x539   : > { %1806 = vrcp.f32 %v1130_v23 }
 0x53a   : > { %1708 = vmatmul.msk.bf16.vlgmr.msra.gmra.mxu2 %vm673_vm2, %v1140_v22  ;;  %1808 = vrcp.f32 %v1121_v19 }
 0x53f   : > { %v1807_v24 = vpop.eup %1806 }
 0x540   : > { %v1138_v25 = vmul.f32 %v1807_v24, %v1799_v61  ;;  %v1127_v26 = vpop.xlane.xlu2 %1126  ;;  %v1809_v28 = vpop.eup %1808 }
 0x541   : > { %1810 = vrcp.f32 %v1127_v26  ;;  %v1207_v10 = vpop.permute.xlu0 %1206  ;;  %v1135_v31 = vmul.f32 %v1809_v28, %v1797_v58 }
 0x542   : > { %v1212_v27 = vsel %vm818_vm3, %v1207_v10, 0  ;;  %v1142_v29 = vpack.c.bf16 %v1138_v25, %v1138_v25 }
 0x543   : > { %1221 = vmatpush.bf16.msrb.mxu0 %v1212_v27  ;;  %v1139_v37 = vpack.c.bf16 %v1135_v31, %v1135_v31 }
 0x546   : > { %1710 = vmatmul.msk.bf16.vlgmr.msrb.gmra.mxu0 %vm673_vm2, %v1142_v29 }
 0x547   : > { %1289 = vmatpush.bf16.msra.mxu0 %v2073_v51  ;;  %v1811_v30 = vpop.eup %1810 }
 0x548   : > { %v1137_v33 = vmul.f32 %v1811_v30, %v1801_v0  ;;  %v1144_v34 = vpop.permute.xlu2 %1143  ;;  %v1772_v30 = vld [vmem:[%s2246_s18] ss:$0 sm:$0xff] }
 0x549   : > { %v1149_v35 = vsel %vm818_vm3, %v1144_v34, 0 }
 0x54a   : > { %v1141_v36 = vpack.c.bf16 %v1137_v33, %v1137_v33  ;;  %1158 = vmatpush.bf16.msra.mxu1 %v1149_v35  ;;  %v1773_v35 = vld [vmem:[%s2247_s22] ss:$0 sm:$0xff] }
 0x54c   : > { %1709 = vmatmul.msk.bf16.vlgmr.msra.gmra.mxu3 %vm673_vm2, %v1141_v36 }
 0x54d   : > { %1707 = vmatmul.msk.bf16.vlgmr.msra.gmra.mxu1 %vm673_vm2, %v1139_v37 }
 0x54e   : > { %1241 = vmatpush.bf16.msrb.mxu1 %v2068_v49 }
 0x581   : > { %v1332_v15 = vpop.xlane.xlu2 %1331 }
 0x582   : > { %v1336_v53 = vmul.f32 %v1332_v15, %v2127_v44 }
 0x584   : > { %v1338_v16 = vadd.f32 1e-05, %v1336_v53 }
 0x586   : > { %1812 = vrsqrt.f32 %v1338_v16  ;;  %vm1346_vm6 = vweird.f32 %v1338_v16 }
 0x5bd   : > { %v1181_v39 = vpop.f32.mrf.mxu2 }
 0x5be   : > { %v1228_v41 = vpack.c.bf16 %v1181_v39, %v1181_v39 }
 0x5c0   : > { %1712 = vmatmul.msk.bf16.vlgmr.msrb.gmra.mxu2 %vm673_vm2, %v1228_v41 }
 0x5c3   : > { %v1223_v51 = vpop.f32.mrf.mxu0 }
 0x5c4   : > { %v1230_v42 = vpack.c.bf16 %v1223_v51, %v1223_v51 }
 0x5c5   : > { %v1183_v43 = vpop.f32.mrf.mxu2 }
 0x5c6   : > { %1714 = vmatmul.msk.bf16.vlgmr.msra.gmra.mxu0 %vm673_vm2, %v1230_v42  ;;  %v1754_v43 = vld [vmem:[%s1956_s23 + $0x10] sm:$0xff] }
 0x5ca   : > { %v1160_v46 = vpop.f32.mrf.mxu1 }
 0x5cb   : > { %v1227_v47 = vpack.c.bf16 %v1160_v46, %v1160_v46  ;;  %v1225_v48 = vpop.f32.mrf.mxu0  ;;  %v1753_v46 = vld [vmem:[%s1956_s23 + $0x8] sm:$0xff] }
 0x5cd   : > { %1711 = vmatmul.msk.bf16.vlgmr.msrb.gmra.mxu1 %vm673_vm2, %v1227_v47  ;;  %v1752_v47 = vld [vmem:[%s1956_s23] sm:$0xff] }
 0x5cf   : > { %v1202_v38 = vpop.f32.mrf.mxu3 }
 0x5d0   : > { %v1229_v49 = vpack.c.bf16 %v1202_v38, %v1202_v38  ;;  %v1774_v38 = vld [vmem:[%s583_s1] ss:$0 sm:$0xff] }
 0x5d2   : > { %v1162_v50 = vpop.f32.mrf.mxu1  ;;  %1713 = vmatmul.msk.bf16.vlgmr.msrb.gmra.mxu3 %vm673_vm2, %v1229_v49 }
 0x5d7   : > { %v1204_v12 = vpop.f32.mrf.mxu3 }
 0x643   : > { %v1259_v52 = vpop.f32.mrf.mxu2  ;;  %v1291_v54 = vpop.f32.mrf.mxu0 }
 0x644   : > { %v1296_v59 = vsel %vm631_vm1, %v1259_v52, 0.0  ;;  %v1300_v0 = vsel %vm631_vm1, %v1291_v54, 0.0 }
 0x64a   : > { %v1243_v55 = vpop.f32.mrf.mxu1 }
 0x64b   : > { %v1261_v56 = vpop.f32.mrf.mxu2  ;;  %v1293_v57 = vpop.f32.mrf.mxu0  ;;  %v1295_v58 = vsel %vm631_vm1, %v1243_v55, 0.0 }
 0x64c   : > { %v1297_v60 = vadd.f32 %v1296_v59, %v1295_v58  ;;  %v1775_v56 = vld [vmem:[%s591_s0] ss:$0 sm:$0xff] }
 0x652   : > { %v1245_v4 = vpop.f32.mrf.mxu1 }
 0x655   : > { %v1275_v61 = vpop.f32.mrf.mxu3 }
 0x656   : > { %v1298_v62 = vsel %vm631_vm1, %v1275_v61, 0.0 }
 0x657   : > { %v1299_v63 = vadd.f32 %v1298_v62, %v1297_v60 }
 0x659   : > { %v1301_v1 = vadd.f32 %v1300_v0, %v1299_v63 }
 0x65b   : > { %v1306_v2 = vadd.f32 %v2110_v40, %v1301_v1  ;;  %v1751_v40 = vld [vmem:[%s1946_s16 + $0x8] sm:$0xff] }
 0x65c   : > { %1402 = vmatpush.bf16.msra.mxu1 %v1751_v40 }
 0x65d   : > { %v1277_v3 = vpop.f32.mrf.mxu3  ;;  %v1308_v6 = vadd.f32 %v1306_v2, %v1979_v5  ;;  %v1813_v5 = vpop.eup %1812 }
 0x65e   : > { %v1341_v45 = vmul.f32 %v1813_v5, %v1338_v16  ;;  %vm1347_vm5 = vweird.f32 %v1813_v5 }
 0x65f   : > { %v1314_v7 = vsel %vm631_vm1, %v1308_v6, 0.0  ;;  %vm1348_vm7 = vmor %vm1346_vm6, %vm1347_vm5 }
 0x660   : > { %1315 = vadd.xlane.f32.xlu0 %v1314_v7  ;;  %1403 = vmatpush.bf16.msra.mxu1 %v1750_v32  ;;  %v1342_v18 = vmul.f32 %v1813_v5, %v1341_v45 }
 0x662   : > { %v1343_v22 = vmul.f32 0.5, %v1342_v18 }
 0x664   : > { %v1344_v23 = vsub.f32 1.5, %v1343_v22 }
 0x666   : > { %v1345_v25 = vmul.f32 %v1813_v5, %v1344_v23 }
 0x668   : > { %v1349_v27 = vsel %vm1348_vm7, %v1813_v5, %v1345_v25 }
 0x669   : > { %v1360_v31 = vmul.f32 %v1349_v27, %v2130_v17  ;;  %v1755_v17 = vld [vmem:[%s1956_s23 + $0x18] sm:$0xff] }
 0x66a   : > { %1457 = vmatpush.bf16.msra.mxu2 %v1755_v17 }
 0x66b   : > { %v1365_v36 = vmul.f32 %v1772_v30, %v1360_v31 }
 0x66d   : > { %v1370_v41 = vadd.f32 %v1773_v35, %v1365_v36 }
 0x66e   : > { %1458 = vmatpush.bf16.msra.mxu2 %v1754_v43 }
 0x672   : > { %1459 = vmatpush.bf16.msra.mxu2 %v1753_v46 }
 0x676   : > { %1460 = vmatpush.bf16.msra.mxu2 %v1752_v47 }
 0x6d3   : > { %v1316_v8 = vpop.xlane.xlu0 %1315 }
 0x6d4   : > { %v1325_v9 = vmul.f32 %v2127_v44, %v1316_v8 }
 0x6d6   : > { %v1327_v11 = vsub.f32 %v1308_v6, %v1325_v9 }
 0x6d8   : > { %v1329_v13 = vmul.f32 %v1327_v11, %v1327_v11 }
 0x6da   : > { %v1333_v14 = vsel %vm631_vm1, %v1329_v13, 0.0 }
 0x6db   : > { %1334 = vadd.xlane.f32.xlu1 %v1333_v14 }
 0x74e   : > { %v1335_v19 = vpop.xlane.xlu1 %1334 }
 0x74f   : > { %v1337_v20 = vmul.f32 %v1335_v19, %v2127_v44 }
 0x751   : > { %v1339_v21 = vadd.f32 1e-05, %v1337_v20 }
 0x753   : > { %1814 = vrsqrt.f32 %v1339_v21  ;;  %vm1356_vm9 = vweird.f32 %v1339_v21 }
 0x759   : > { %v1815_v24 = vpop.eup %1814 }
 0x75a   : > { %v1351_v26 = vmul.f32 %v1815_v24, %v1339_v21  ;;  %vm1357_vm8 = vweird.f32 %v1815_v24 }
 0x75b   : > { %vm1358_vm10 = vmor %vm1356_vm9, %vm1357_vm8 }
 0x75c   : > { %v1352_v10 = vmul.f32 %v1815_v24, %v1351_v26  ;;  %v1777_v26 = vld [vmem:[%s597_s13] ss:$0 sm:$0xff] }
 0x75e   : > { %v1353_v28 = vmul.f32 0.5, %v1352_v10 }
 0x760   : > { %v1354_v29 = vsub.f32 1.5, %v1353_v28 }
 0x762   : > { %v1355_v33 = vmul.f32 %v1815_v24, %v1354_v29 }
 0x764   : > { %v1359_v34 = vsel %vm1358_vm10, %v1815_v24, %v1355_v33  ;;  %v1776_v24 = vld [vmem:[%s594_s2] ss:$0 sm:$0xff]  ;;  %s2248_s2 = sld [smem:[#allocation8_spill]] (!%p1741_p5) }
 0x765   : > { %v1361_v37 = vmul.f32 %v1359_v34, %v1327_v11 }
 0x767   : > { %v1366_v39 = vmul.f32 %v1772_v30, %v1361_v37 }
 0x769   : > { %v1371_v51 = vadd.f32 %v1773_v35, %v1366_v39 }
 0x76b   : > { %v1376_v42 = vpack.c.bf16 %v1371_v51, %v1370_v41 }
 0x76d   : > { %1723 = vmatmul.msk.bf16.vlgmr.msra.gmra.mxu1 %vm631_vm1, %v1376_v42 }
 0x7ea   : > { %v1405_v48 = vpop.f32.mrf.mxu1 }
 0x7eb   : > { %v1406_v49 = vadd.f32 %v1774_v38, %v1405_v48 }
 0x7ed   : > { %v1410_v52 = vmax.f32 %v1406_v49, 0.0 }
 0x7f2   : > { %v1407_v50 = vpop.f32.mrf.mxu1 }
 0x7f3   : > { %v1408_v12 = vadd.f32 %v1774_v38, %v1407_v50 }
 0x7f5   : > { %v1411_v54 = vmax.f32 %v1408_v12, 0.0 }
 0x7f7   : > { %v1420_v55 = vpack.c.bf16 %v1411_v54, %v1410_v52 }
 0x7f9   : > { %1740 = vmatmul.msk.bf16.vlgmr.msra.gmra.mxu2 %vm1449_vm11, %v1420_v55 }
 0x87c   : > { %v1462_v57 = vpop.f32.mrf.mxu2 }
 0x87d   : > { %v1463_v58 = vadd.f32 %v1775_v56, %v1462_v57 }
 0x87f   : > { %v1467_v4 = vadd.f32 %v1463_v58, %v1370_v41 }
 0x881   : > { %v1471_v59 = vsel %vm631_vm1, %v1467_v4, 0.0 }
 0x882   : > { %1472 = vadd.xlane.f32.xlu0 %v1471_v59 }
 0x884   : > { %v1464_v60 = vpop.f32.mrf.mxu2 }
 0x885   : > { %v1465_v61 = vadd.f32 %v1775_v56, %v1464_v60 }
 0x887   : > { %v1468_v62 = vadd.f32 %v1465_v61, %v1371_v51 }
 0x889   : > { %v1474_v63 = vsel %vm631_vm1, %v1468_v62, 0.0 }
 0x88a   : > { %1475 = vadd.xlane.f32.xlu1 %v1474_v63 }
 0x8f5   : > { %v1473_v0 = vpop.xlane.xlu0 %1472 }
 0x8f6   : > { %v1477_v1 = vmul.f32 %v1473_v0, %v2127_v44 }
 0x8f8   : > { %v1479_v2 = vsub.f32 %v1467_v4, %v1477_v1 }
 0x8fa   : > { %v1481_v3 = vmul.f32 %v1479_v2, %v1479_v2 }
 0x8fc   : > { %v1483_v6 = vsel %vm631_vm1, %v1481_v3, 0.0 }
 0x8fd   : > { %v1476_v7 = vpop.xlane.xlu1 %1475  ;;  %1484 = vadd.xlane.f32.xlu0 %v1483_v6 }
 0x8fe   : > { %v1478_v8 = vmul.f32 %v1476_v7, %v2127_v44 }
 0x900   : > { %v1480_v9 = vsub.f32 %v1468_v62, %v1478_v8 }
 0x902   : > { %v1482_v11 = vmul.f32 %v1480_v9, %v1480_v9 }
 0x904   : > { %v1486_v13 = vsel %vm631_vm1, %v1482_v11, 0.0 }
 0x905   : > { %1487 = vadd.xlane.f32.xlu1 %v1486_v13 }
 0x970   : > { %v1485_v14 = vpop.xlane.xlu0 %1484 }
 0x971   : > { %v1489_v15 = vmul.f32 %v1485_v14, %v2127_v44 }
 0x973   : > { %v1491_v53 = vadd.f32 1e-05, %v1489_v15 }
 0x975   : > { %1816 = vrsqrt.f32 %v1491_v53  ;;  %vm1499_vm13 = vweird.f32 %v1491_v53 }
 0x978   : > { %v1488_v16 = vpop.xlane.xlu1 %1487 }
 0x979   : > { %v1490_v40 = vmul.f32 %v1488_v16, %v2127_v44 }
 0x97b   : > { %v1817_v5 = vpop.eup %1816  ;;  %v1492_v32 = vadd.f32 1e-05, %v1490_v40 }
 0x97c   : > { %v1494_v45 = vmul.f32 %v1817_v5, %v1491_v53  ;;  %vm1500_vm12 = vweird.f32 %v1817_v5 }
 0x97d   : > { %1818 = vrsqrt.f32 %v1492_v32  ;;  %vm1501_vm14 = vmor %vm1499_vm13, %vm1500_vm12  ;;  %vm1509_vm0 = vweird.f32 %v1492_v32 }
 0x97e   : > { %v1495_v18 = vmul.f32 %v1817_v5, %v1494_v45 }
 0x980   : > { %v1496_v19 = vmul.f32 0.5, %v1495_v18 }
 0x982   : > { %v1497_v20 = vsub.f32 1.5, %v1496_v19 }
 0x983   : > { %v1819_v21 = vpop.eup %1818 }
 0x984   : > { %v1498_v22 = vmul.f32 %v1817_v5, %v1497_v20  ;;  %v1504_v23 = vmul.f32 %v1819_v21, %v1492_v32  ;;  %vm1510_vm15 = vweird.f32 %v1819_v21 }
 0x985   : > { %vm1511_vm2 = vmor %vm1509_vm0, %vm1510_vm15 }
 0x986   : > { %v1502_v44 = vsel %vm1501_vm14, %v1817_v5, %v1498_v22  ;;  %v1505_v25 = vmul.f32 %v1819_v21, %v1504_v23 }
 0x987   : > { %v1513_v10 = vmul.f32 %v1502_v44, %v1479_v2 }
 0x988   : > { %v1506_v27 = vmul.f32 0.5, %v1505_v25 }
 0x989   : > { %v1518_v28 = vmul.f32 %v1776_v24, %v1513_v10 }
 0x98a   : > { %v1507_v29 = vsub.f32 1.5, %v1506_v27 }
 0x98b   : > { %v1523_v30 = vadd.f32 %v1777_v26, %v1518_v28 }
 0x98c   : > { %v1508_v31 = vmul.f32 %v1819_v21, %v1507_v29 }
 0x98d   : > { %1525 = vst.msk [vmem:[#allocation2] sm:$0xff] %vm631_vm1, %v1523_v30 }
 0x98e   : > { %v1512_v33 = vsel %vm1511_vm2, %v1819_v21, %v1508_v31 }
 0x98f   : > { %v1514_v34 = vmul.f32 %v1512_v33, %v1480_v9 }
 0x991   : > { %v1519_v35 = vmul.f32 %v1776_v24, %v1514_v34  ;;  %1530 = sbr.rel (%p1741_p5) target bundleno = 2456 (0x998), region = 80 }
 0x993   : > { %v1524_v36 = vadd.f32 %v1777_v26, %v1519_v35 }
 0x995   : > { %1526 = vst.msk [vmem:[#allocation2 + $0x8] sm:$0xff] %vm631_vm1, %v1524_v36 }
 0x996   : > { %1531 = vst.msk [vmem:[%s2248_s2] sm:$0xff] %vm631_vm1, %v1523_v30 }
 0x997   : > { %1532 = vst.msk [vmem:[%s2248_s2 + $0x8] sm:$0xff] %vm631_vm1, %v1524_v36 }
 0x998 PF: > { %s2249_s28 = sld [smem:[#allocation3_spill]] }
 0x99e   : > { %s23_s25 = sadd.s32 1, %s2249_s28  }
 0x99f   : > { %p20_p6 = scmp.ge.s32.totalorder %s23_s25, 4  }
 0x9a1   :  { %22 = sbr.rel (!%p20_p6) target bundleno = 6 (0x6), region = 139 }

// kernel: transformer_forward.3
= control target key start
LH: loop header
LB: loop body
LE: loop exit
PB: predicated region body
PF: predicated region fallthrough
CT: control target
= control target key end

     0   :  { %s4722_s0 = inlined_call_operand.vmem [shape: f32[2,8,32], index: 0, kind: input, shape index: {}]   ;;  %s4723_s1 = inlined_call_operand.vmem [shape: f32[2,8,32], index: 1, kind: input, shape index: {}]   ;;  %s4724_s2 = inlined_call_operand.vmem [shape: bf16[2,32,96], index: 2, kind: input, shape index: {}]   ;;  %s4725_s3 = inlined_call_operand.vmem [shape: f32[2,1,96], index: 3, kind: input, shape index: {}]   ;;  %s4726_s4 = inlined_call_operand.vmem [shape: bf16[2,4,8,32], index: 4, kind: input, shape index: {}]   ;;  %s4727_s5 = inlined_call_operand.vmem [shape: f32[2,1,32], index: 5, kind: input, shape index: {}]   ;;  %s4728_s6 = inlined_call_operand.vmem [shape: f32[2,1,32], index: 6, kind: input, shape index: {}]   ;;  %s4729_s7 = inlined_call_operand.vmem [shape: f32[2,1,32], index: 7, kind: input, shape index: {}]   ;;  %s4730_s8 = inlined_call_operand.vmem [shape: bf16[2,32,32], index: 8, kind: input, shape index: {}]   ;;  %s4731_s9 = inlined_call_operand.vmem [shape: f32[2,1,32], index: 9, kind: input, shape index: {}]   ;;  %s4732_s10 = inlined_call_operand.vmem [shape: bf16[2,32,64], index: 10, kind: input, shape index: {}]   ;;  %s4733_s11 = inlined_call_operand.hbm [shape: f32[2,1,64], index: 11, kind: input, shape index: {}]   ;;  %s4734_s12 = inlined_call_operand.vmem [shape: bf16[2,4,8,32], index: 12, kind: input, shape index: {}]   ;;  %s4735_s13 = inlined_call_operand.hbm [shape: f32[2,1,32], index: 13, kind: input, shape index: {}]   ;;  %s4736_s14 = inlined_call_operand.hbm [shape: f32[2,1,32], index: 14, kind: input, shape index: {}]   ;;  %s4737_s15 = inlined_call_operand.hbm [shape: f32[2,1,32], index: 15, kind: input, shape index: {}]   ;;  %s4738_s16 = inlined_call_operand.hbm [shape: bf16[2,32,64], index: 16, kind: input, shape index: {}]   ;;  %s4739_s17 = inlined_call_operand.hbm [shape: f32[2,1,64], index: 17, kind: input, shape index: {}]   ;;  %s4740_s18 = inlined_call_operand.vmem [shape: bf16[2,64,32], index: 18, kind: input, shape index: {}]   ;;  %s4741_s19 = inlined_call_operand.hbm [shape: f32[2,1,32], index: 19, kind: input, shape index: {}]   ;;  %s4742_s20 = inlined_call_operand.hbm [shape: f32[2,1,32], index: 20, kind: input, shape index: {}]   ;;  %s4743_s21 = inlined_call_operand.hbm [shape: f32[2,1,32], index: 21, kind: input, shape index: {}]   ;;  %s4744_s22 = inlined_call_operand.vmem [shape: f32[2,8,32], index: 22, kind: output, shape index: {}]  }
   0x1   :  { %4755 = sst [smem:[#allocation26_spill]] %s4722_s0 }
   0x2   :  { %4756 = sst [smem:[#allocation27_spill]] %s4723_s1 }
   0x3   :  { %4757 = sst [smem:[#allocation28_spill]] %s4724_s2 }
   0x4   :  { %4758 = sst [smem:[#allocation29_spill]] %s4725_s3 }
   0x5   :  { %4759 = sst [smem:[#allocation30_spill]] %s4726_s4 }
   0x6   :  { %4760 = sst [smem:[#allocation31_spill]] %s4727_s5 }
   0x7   :  { %4761 = sst [smem:[#allocation32_spill]] %s4728_s6 }
   0x8   :  { %4762 = sst [smem:[#allocation33_spill]] %s4730_s8 }
   0x9   :  { %4763 = sst [smem:[#allocation34_spill]] %s4731_s9 }
   0xa   :  { %4764 = sst [smem:[#allocation35_spill]] %s4732_s10 }
   0xb   :  { %4765 = sst [smem:[#allocation36_spill]] %s4733_s11 }
   0xc   :  { %4766 = sst [smem:[#allocation37_spill]] %s4734_s12 }
   0xd   :  { %4767 = sst [smem:[#allocation38_spill]] %s4735_s13 }
   0xe   :  { %4768 = sst [smem:[#allocation39_spill]] %s4736_s14 }
   0xf   :  { %4769 = sst [smem:[#allocation40_spill]] %s4737_s15 }
  0x10   :  { %4770 = sst [smem:[#allocation41_spill]] %s4738_s16 }
  0x11   :  { %4771 = sst [smem:[#allocation42_spill]] %s4739_s17 }
  0x12   :  { %4772 = sst [smem:[#allocation43_spill]] %s4740_s18 }
  0x13   :  { %4773 = sst [smem:[#allocation44_spill]] %s4741_s19 }
  0x14   :  { %4774 = sst [smem:[#allocation45_spill]] %s4744_s22 }
  0x15   :  { %27 = vsyncpa [#allocation5], 0 }
  0x16   :  { %29 = vsyncpa [#allocation5 + $0x1], 0 }
  0x17   :  { %30 = vsyncpa [#allocation7], 0 }
  0x18   :  { %32 = vsyncpa [#allocation7 + $0x1], 0 }
  0x19   :  { %33 = vsyncpa [#allocation10], 0 }
  0x1a   :  { %35 = vsyncpa [#allocation10 + $0x1], 0 }
  0x1b   :  { %36 = vsyncpa [#allocation13], 0 }
  0x1c   :  { %38 = vsyncpa [#allocation13 + $0x1], 0 }
  0x1d   :  { %39 = vsyncpa [#allocation16], 0 }
  0x1e   :  { %41 = vsyncpa [#allocation16 + $0x1], 0  ;;  %s3962_s3 = smov 0   ;;  %s3964_s28 = smov 0  }
  0x1f   :  { %s3966_s29 = smov 0   ;;  %s3968_s30 = smov 0  }
  0x20 LB: > { %4775 = sst [smem:[#allocation23_spill]] %s3832_s29  ;;  %s3981_s4 = sadd.s32 4294967295, %s3836_s30   ;;  %s3836_s30 = sphi %s3968_s30, %s4820_s30   ;;  %s3832_s29 = sphi %s3966_s29, %s4822_s29   ;;  %s3828_s28 = sphi %s3964_s28, %s4824_s28   ;;  %s3824_s3 = sphi %s3962_s3, %s4823_s3  }
  0x21   : > { %s3984_s0 = sadd.s32 1, %s3836_s30   ;;  %s330_s1 = sadd.s32 1, %s3832_s29 }
  0x22   : > { %4776 = sst [smem:[#allocation24_spill]] %s3984_s0  ;;  %s327_s23 = ssub.s32 %s3836_s30, %s3984_s0 }
  0x23   : > { %p328_p0 = scmp.eq.s32.totalorder %s327_s23, 0  ;;  %p337_p1 = scmp.ne.s32.totalorder %s3832_s29, %s3828_s28 }
  0x24   : > { %p338_p2 = scmp.eq.s32.totalorder %s3836_s30, 0  ;;  %p343_p3 = scmp.ne.s32.totalorder %s3828_s28, %s3824_s3 }
  0x25   : > { %s3994_s5 = scalar_select %p328_p0, %s3832_s29, %s330_s1  }
  0x26   : > { %p339_p4 = por %p338_p2, %p337_p1  ;;  %p344_p5 = scmp.eq.s32.totalorder %s3981_s4, 0 }
  0x27   : > { %4777 = sst [smem:[#allocation25_spill]] %s3994_s5  ;;  %p3383_p6 = scmp.lt.s32.totalorder %s3836_s30, 2 }
  0x28   : > { %p3998_p7 = por %p344_p5, %p343_p3  ;;  %s4003_s6 = sand.u32 1, %s3832_s29  }
  0x29   : > { %p4005_p8 = pnand %p3383_p6, %p339_p4  ;;  %s4010_s26 = sand.u32 1, %s3836_s30  }
  0x2a   : > { %s4780_s13 = sld [smem:[#allocation38_spill]]  ;;  %s744_s1 = scalar_lea.vmem [#allocation6], %s4003_s6 }
  0x2b   : > { %s751_s5 = sshll.u32 %s744_s1, 4  ;;  %s4751_s29 = scalar_lea.sflag [#allocation7], %s4010_s26  ;;  %s752_s5 = int_to_ptr.vmem [resolvable:$true] %s751_s5 }
  0x2c   : > { %p4020_p10 = pneg %p4005_p8 }
  0x30   : > { %s747_s3 = scalar_lea.hbm %s4780_s13, %s3836_s30 }
  0x31   : > { %s749_s23 = sshll.u32 %s747_s3, 4  ;;  %s3523_s3 = scalar_lea.hbm %s4780_s13, 2  ;;  %s750_s23 = int_to_ptr.hbm [resolvable:$true] %s749_s23 }
  0x32   : > { %s3516_s0 = sshra.s32 %s750_s23, 4  ;;  %s3517_s0 = int_to_ptr.hbm [resolvable:$true] %s3516_s0 }
  0x33   : > { %s3518_s22 = scalar_lea.hbm %s3517_s0, 1  ;;  %p3524_p13 = scmp.lt.s32.totalorder %s3517_s0, %s4780_s13 }
  0x34   : > { %p3519_p9 = scmp.ne.s32.totalorder %s3517_s0, %s3518_s22  ;;  %p3525_p0 = scmp.lt.s32.totalorder %s3523_s3, %s3518_s22 }
  0x36   : > { %p3521_p11 = pnand %p4020_p10, %p3519_p9  ;;  %p3526_p1 = por %p3525_p0, %p3524_p13 }
  0x38   : > { %p3522_p12 = pneg %p3521_p11 }
  0x3a   : > { %p3527_p2 = pnand %p3526_p1, %p3522_p12 }
  0x3c   : > { %3530 = shalt.err (!%p3527_p2)
}
  0x3d   : > { %3361 = dma.hbm_to_vmem [thread:$0]  (!%p4005_p8), %s750_s23, 16, %s752_s5, %s4751_s29  }
  0x3e   : > { %p3199_p3 = scmp.ge.s32.totalorder %s3836_s30, 1  ;;  %p888_p4 = scmp.lt.s32.totalorder %s3836_s30, 3 }
  0x3f   : > { %s4783_s15 = sld [smem:[#allocation40_spill]]  ;;  %s778_s3 = scalar_lea.vmem [#allocation9], %s4003_s6 }
  0x40   : > { %p4038_p5 = pnand %p3199_p3, %p888_p4  ;;  %s785_s1 = sshll.u32 %s778_s3, 4  ;;  %s786_s1 = int_to_ptr.vmem [resolvable:$true] %s785_s1 }
  0x41   : > { %s4752_s13 = scalar_lea.sflag [#allocation10], %s4010_s26 }
  0x45   : > { %s781_s2 = scalar_lea.hbm %s4783_s15, %s3836_s30  ;;  %s3553_s29 = scalar_lea.hbm %s4783_s15, 2 }
  0x46   : > { %s783_s27 = sshll.u32 %s781_s2, 4  ;;  %s784_s27 = int_to_ptr.hbm [resolvable:$true] %s783_s27 }
  0x47   : > { %s3546_s10 = sshra.s32 %s784_s27, 4  ;;  %s3547_s10 = int_to_ptr.hbm [resolvable:$true] %s3546_s10 }
  0x48   : > { %s3548_s9 = scalar_lea.hbm %s3547_s10, 1  ;;  %p3554_p12 = scmp.lt.s32.totalorder %s3547_s10, %s4783_s15 }
  0x49   : > { %p3549_p6 = scmp.ne.s32.totalorder %s3547_s10, %s3548_s9  ;;  %p3555_p13 = scmp.lt.s32.totalorder %s3553_s29, %s3548_s9 }
  0x4b   : > { %p3551_p9 = pnand %p3549_p6, %p4020_p10  ;;  %p3556_p0 = por %p3555_p13, %p3554_p12 }
  0x4d   : > { %p3552_p11 = pneg %p3551_p9 }
  0x4f   : > { %p3557_p1 = pnand %p3556_p0, %p3552_p11 }
  0x51   : > { %3560 = shalt.err (!%p3557_p1)
}
  0x52   : > { %3367 = dma.hbm_to_vmem [thread:$0]  (!%p4005_p8), %s784_s27, 16, %s786_s1, %s4752_s13  }
  0x53   : > { %s4784_s17 = sld [smem:[#allocation42_spill]]  ;;  %s817_s5 = scalar_lea.vmem [#allocation12], %s4003_s6 }
  0x54   : > { %s824_s8 = sshll.u32 %s817_s5, 4  ;;  %s4753_s9 = scalar_lea.sflag [#allocation13], %s4010_s26  ;;  %s825_s8 = int_to_ptr.vmem [resolvable:$true] %s824_s8 }
  0x59   : > { %s820_s3 = scalar_lea.hbm %s4784_s17, %s3836_s30  ;;  %s3583_s27 = scalar_lea.hbm %s4784_s17, 2 }
  0x5a   : > { %s822_s10 = sshll.u32 %s820_s3, 4  ;;  %s823_s10 = int_to_ptr.hbm [resolvable:$true] %s822_s10 }
  0x5b   : > { %s3576_s29 = sshra.s32 %s823_s10, 4  ;;  %s3577_s29 = int_to_ptr.hbm [resolvable:$true] %s3576_s29 }
  0x5c   : > { %s3578_s23 = scalar_lea.hbm %s3577_s29, 1  ;;  %p3584_p6 = scmp.lt.s32.totalorder %s3577_s29, %s4784_s17 }
  0x5d   : > { %p3579_p2 = scmp.ne.s32.totalorder %s3577_s29, %s3578_s23  ;;  %p3585_p9 = scmp.lt.s32.totalorder %s3583_s27, %s3578_s23 }
  0x5f   : > { %p3581_p3 = pnand %p3579_p2, %p4020_p10  ;;  %p3586_p11 = por %p3585_p9, %p3584_p6 }
  0x61   : > { %p3582_p4 = pneg %p3581_p3 }
  0x63   : > { %p3587_p12 = pnand %p3586_p11, %p3582_p4 }
  0x65   : > { %3590 = shalt.err (!%p3587_p12)
}
  0x66   : > { %3373 = dma.hbm_to_vmem [thread:$0]  (!%p4005_p8), %s823_s10, 16, %s825_s8, %s4753_s9  }
  0x67   : > { %s862_s3 = scalar_lea.hbm %s4742_s20, %s3836_s30  ;;  %s859_s22 = scalar_lea.vmem [#allocation15], %s4003_s6 }
  0x68   : > { %s864_s5 = sshll.u32 %s862_s3, 4  ;;  %s866_s29 = sshll.u32 %s859_s22, 4  ;;  %s865_s5 = int_to_ptr.hbm [resolvable:$true] %s864_s5  ;;  %s867_s29 = int_to_ptr.vmem [resolvable:$true] %s866_s29 }
  0x69   : > { %s4754_s23 = scalar_lea.sflag [#allocation16], %s4010_s26  ;;  %s3606_s27 = sshra.s32 %s865_s5, 4  ;;  %s3607_s27 = int_to_ptr.hbm [resolvable:$true] %s3606_s27 }
  0x6a   : > { %s3608_s1 = scalar_lea.hbm %s3607_s27, 1  ;;  %s3613_s8 = scalar_lea.hbm %s4742_s20, 2 }
  0x6b   : > { %p3609_p13 = scmp.ne.s32.totalorder %s3607_s27, %s3608_s1  ;;  %p3614_p2 = scmp.lt.s32.totalorder %s3607_s27, %s4742_s20 }
  0x6c   : > { %p3615_p3 = scmp.lt.s32.totalorder %s3613_s8, %s3608_s1 }
  0x6d   : > { %p3611_p0 = pnand %p3609_p13, %p4020_p10 }
  0x6e   : > { %p3616_p4 = por %p3615_p3, %p3614_p2 }
  0x6f   : > { %p3612_p1 = pneg %p3611_p0 }
  0x71   : > { %p3617_p6 = pnand %p3616_p4, %p3612_p1 }
  0x73   : > { %3620 = shalt.err (!%p3617_p6)
}
  0x74   : > { %3379 = dma.hbm_to_vmem [thread:$0]  (!%p4005_p8), %s865_s5, 16, %s867_s29, %s4754_s23  }
  0x75   : > { %s4785_s11 = sld [smem:[#allocation36_spill]]  ;;  %s719_s22 = scalar_lea.vmem [#allocation4], %s4003_s6 }
  0x76   : > { %s726_s0 = sshll.u32 %s719_s22, 4  ;;  %s717_s1 = scalar_lea.sflag [#allocation5], %s4003_s6  ;;  %s727_s0 = int_to_ptr.vmem [resolvable:$true] %s726_s0 }
  0x7b   : > { %s722_s3 = scalar_lea.hbm %s4785_s11, %s3836_s30  ;;  %s3643_s5 = scalar_lea.hbm %s4785_s11, 2 }
  0x7c   : > { %s724_s27 = sshll.u32 %s722_s3, 4  ;;  %s725_s27 = int_to_ptr.hbm [resolvable:$true] %s724_s27 }
  0x7d   : > { %s3636_s8 = sshra.s32 %s725_s27, 4  ;;  %s3637_s8 = int_to_ptr.hbm [resolvable:$true] %s3636_s8 }
  0x7e   : > { %s3638_s10 = scalar_lea.hbm %s3637_s8, 1  ;;  %p3644_p13 = scmp.lt.s32.totalorder %s3637_s8, %s4785_s11 }
  0x7f   : > { %p3639_p9 = scmp.ne.s32.totalorder %s3637_s8, %s3638_s10  ;;  %p3645_p0 = scmp.lt.s32.totalorder %s3643_s5, %s3638_s10 }
  0x81   : > { %p3641_p11 = pnand %p3639_p9, %p4020_p10  ;;  %p3646_p1 = por %p3645_p0, %p3644_p13 }
  0x83   : > { %p3642_p12 = pneg %p3641_p11 }
  0x85   : > { %p3647_p2 = pnand %p3646_p1, %p3642_p12 }
  0x87   : > { %3650 = shalt.err (!%p3647_p2)
}
  0x88   : > { %3358 = dma.hbm_to_vmem [thread:$0]  (!%p4005_p8), %s725_s27, 16, %s727_s0, %s717_s1  }
  0x89   : > { %s4786_s14 = sld [smem:[#allocation39_spill]]  ;;  %s761_s22 = scalar_lea.vmem [#allocation8], %s4003_s6 }
  0x8a   : > { %s768_s2 = sshll.u32 %s761_s22, 4  ;;  %s3196_s8 = sshll.u32 %s4003_s6, 4  ;;  %s769_s2 = int_to_ptr.vmem [resolvable:$true] %s768_s2 }
  0x8f   : > { %s764_s9 = scalar_lea.hbm %s4786_s14, %s3836_s30  ;;  %s3673_s0 = scalar_lea.hbm %s4786_s14, 2 }
  0x90   : > { %s766_s23 = sshll.u32 %s764_s9, 4  ;;  %s767_s23 = int_to_ptr.hbm [resolvable:$true] %s766_s23 }
  0x91   : > { %s3666_s10 = sshra.s32 %s767_s23, 4  ;;  %s3667_s10 = int_to_ptr.hbm [resolvable:$true] %s3666_s10 }
  0x92   : > { %s3668_s5 = scalar_lea.hbm %s3667_s10, 1  ;;  %p3674_p9 = scmp.lt.s32.totalorder %s3667_s10, %s4786_s14 }
  0x93   : > { %p3669_p3 = scmp.ne.s32.totalorder %s3667_s10, %s3668_s5  ;;  %p3675_p11 = scmp.lt.s32.totalorder %s3673_s0, %s3668_s5 }
  0x95   : > { %p3671_p4 = pnand %p3669_p3, %p4020_p10  ;;  %p3676_p12 = por %p3675_p11, %p3674_p9 }
  0x97   : > { %p3672_p6 = pneg %p3671_p4 }
  0x99   : > { %p3677_p13 = pnand %p3676_p12, %p3672_p6 }
  0x9b   : > { %3680 = shalt.err (!%p3677_p13)
}
  0x9c   : > { %s4787_s13 = scalar_lea.sflag [#allocation7], %s4010_s26  ;;  %s3318_s3 = sshll.u32 %s3836_s30, 4 }
  0x9d   : > { %3364 = dma.hbm_to_vmem [thread:$0]  (!%p4005_p8), %s767_s23, 16, %s769_s2, %s4787_s13  }
  0x9e   : > { %s4788_s16 = sld [smem:[#allocation41_spill]]  ;;  %s796_s15 = scalar_lea.vmem [#allocation11], %s3196_s8 }
  0x9f   : > { %s804_s11 = sshll.u32 %s796_s15, 4  ;;  %s805_s11 = int_to_ptr.vmem [resolvable:$true] %s804_s11 }
  0xa4   : > { %s801_s29 = scalar_lea.hbm %s4788_s16, %s3318_s3  ;;  %s3703_s23 = scalar_lea.hbm %s4788_s16, 32 }
  0xa5   : > { %s802_s27 = sshll.u32 %s801_s29, 4  ;;  %s803_s27 = int_to_ptr.hbm [resolvable:$true] %s802_s27 }
  0xa6   : > { %s3696_s10 = sshra.s32 %s803_s27, 4  ;;  %s3697_s10 = int_to_ptr.hbm [resolvable:$true] %s3696_s10 }
  0xa7   : > { %s3698_s5 = scalar_lea.hbm %s3697_s10, 16  ;;  %p3704_p3 = scmp.lt.s32.totalorder %s3697_s10, %s4788_s16 }
  0xa8   : > { %p3699_p0 = scmp.ne.s32.totalorder %s3697_s10, %s3698_s5  ;;  %p3705_p4 = scmp.lt.s32.totalorder %s3703_s23, %s3698_s5 }
  0xaa   : > { %p3701_p1 = pnand %p3699_p0, %p4020_p10  ;;  %p3706_p6 = por %p3705_p4, %p3704_p3 }
  0xac   : > { %p3702_p2 = pneg %p3701_p1 }
  0xae   : > { %p3707_p9 = pnand %p3706_p6, %p3702_p2 }
  0xb0   : > { %3710 = shalt.err (!%p3707_p9)
}
  0xb1   : > { %s3838_s8 = smov 64   ;;  %s3839_s3 = smov 4  }
  0xb2   : > { %s4789_s9 = scalar_lea.sflag [#allocation10], %s4010_s26  ;;  %s4790_s19 = sld [smem:[#allocation44_spill]] }
  0xb3   : > { %3370 = dma.hbm_to_vmem [thread:$0]  (!%p4005_p8), %s803_s27, 256, %s805_s11, %s4789_s9, %s3838_s8, %s3838_s8, %s3839_s3  }
  0xb4   : > { %s842_s0 = scalar_lea.vmem [#allocation14], %s4003_s6 }
  0xb5   : > { %s849_s10 = sshll.u32 %s842_s0, 4  ;;  %s850_s10 = int_to_ptr.vmem [resolvable:$true] %s849_s10 }
  0xb8   : > { %s845_s15 = scalar_lea.hbm %s4790_s19, %s3836_s30  ;;  %s3733_s11 = scalar_lea.hbm %s4790_s19, 2 }
  0xb9   : > { %s847_s5 = sshll.u32 %s845_s15, 4  ;;  %s848_s5 = int_to_ptr.hbm [resolvable:$true] %s847_s5 }
  0xba   : > { %s3726_s1 = sshra.s32 %s848_s5, 4  ;;  %s3727_s1 = int_to_ptr.hbm [resolvable:$true] %s3726_s1 }
  0xbb   : > { %s3728_s23 = scalar_lea.hbm %s3727_s1, 1  ;;  %p3734_p0 = scmp.lt.s32.totalorder %s3727_s1, %s4790_s19 }
  0xbc   : > { %p3729_p11 = scmp.ne.s32.totalorder %s3727_s1, %s3728_s23  ;;  %p3735_p1 = scmp.lt.s32.totalorder %s3733_s11, %s3728_s23 }
  0xbe   : > { %p3731_p12 = pnand %p3729_p11, %p4020_p10  ;;  %p3736_p2 = por %p3735_p1, %p3734_p0 }
  0xc0   : > { %p3732_p13 = pneg %p3731_p12 }
  0xc2   : > { %p3737_p3 = pnand %p3736_p2, %p3732_p13 }
  0xc4   : > { %3740 = shalt.err (!%p3737_p3)
}
  0xc5   : > { %s4791_s3 = scalar_lea.sflag [#allocation13], %s4010_s26  ;;  %s879_s29 = scalar_lea.hbm %s4743_s21, %s3836_s30 }
  0xc6   : > { %3376 = dma.hbm_to_vmem [thread:$0]  (!%p4005_p8), %s848_s5, 16, %s850_s10, %s4791_s3  }
  0xc7   : > { %s876_s15 = scalar_lea.vmem [#allocation17], %s4003_s6  ;;  %s881_s2 = sshll.u32 %s879_s29, 4  ;;  %s882_s2 = int_to_ptr.hbm [resolvable:$true] %s881_s2 }
  0xc8   : > { %s883_s0 = sshll.u32 %s876_s15, 4  ;;  %s3756_s1 = sshra.s32 %s882_s2, 4  ;;  %s884_s0 = int_to_ptr.vmem [resolvable:$true] %s883_s0  ;;  %s3757_s1 = int_to_ptr.hbm [resolvable:$true] %s3756_s1 }
  0xc9   : > { %s3758_s23 = scalar_lea.hbm %s3757_s1, 1  ;;  %s3763_s10 = scalar_lea.hbm %s4743_s21, 2 }
  0xca   : > { %p3759_p4 = scmp.ne.s32.totalorder %s3757_s1, %s3758_s23  ;;  %p3764_p11 = scmp.lt.s32.totalorder %s3757_s1, %s4743_s21 }
  0xcb   : > { %p3765_p12 = scmp.lt.s32.totalorder %s3763_s10, %s3758_s23 }
  0xcc   : > { %p3761_p6 = pnand %p3759_p4, %p4020_p10 }
  0xcd   : > { %p3766_p13 = por %p3765_p12, %p3764_p11 }
  0xce   : > { %p3762_p9 = pneg %p3761_p6 }
  0xd0   : > { %p3767_p0 = pnand %p3766_p13, %p3762_p9 }
  0xd2   : > { %3770 = shalt.err (!%p3767_p0)
}
  0xd3   : > { %s4792_s30 = scalar_lea.sflag [#allocation16], %s4010_s26  ;;  %892 = sbr.rel (%p4038_p5) target bundleno = 4427 (0x114b), region = 108 }
  0xd4   : > { %3382 = dma.hbm_to_vmem [thread:$0]  (!%p4005_p8), %s882_s2, 16, %s884_s0, %s4792_s30  }
  0xd5   : > { %s4183_s18 = sand.u32 (!%p4038_p5), 1, %s3828_s28  }
  0xd6   : > { %s895_s6 = scalar_lea.sflag (!%p4038_p5), [#allocation5], %s4183_s18 }
  0xd8   : > { %3803 = dma.done.wait (%p3998_p7), %s895_s6, 16  }
  0xd9   : > { %3805 = vsyncadd (%p3998_p7), %s895_s6, 4294967280  ;;  %s903_s25 = sand.u32 1, %s3981_s4  }
  0xda   : > { %s904_s26 = scalar_lea.sflag [#allocation7], %s903_s25 }
  0xdb   : > { %3807 = dma.done.wait (%p3998_p7), %s904_s26, 32  }
  0xdc   : > { %3809 = vsyncadd (%p3998_p7), %s904_s26, 4294967264  ;;  %s922_s9 = scalar_lea.sflag [#allocation10], %s903_s25 }
  0xdd   : > { %3811 = dma.done.wait (%p3998_p7), %s922_s9, 272  }
  0xde   : > { %3813 = vsyncadd (%p3998_p7), %s922_s9, 4294967024  ;;  %s3200_s29 = sshll.u32 %s4183_s18, 4  ;;  %s941_s0 = scalar_lea.sflag [#allocation13], %s903_s25 }
  0xdf   : > { %s4204_s15 = scalar_lea.vmem [#allocation11], %s3200_s29 }
  0xe0   : > { %3815 = dma.done.wait (%p3998_p7), %s941_s0, 32  }
  0xe1   : > { %3817 = vsyncadd (%p3998_p7), %s941_s0, 4294967264  ;;  %s959_s23 = scalar_lea.sflag [#allocation16], %s903_s25 }
  0xe2   : > { %3819 = dma.done.wait (%p3998_p7), %s959_s23, 32  }
  0xe3   : > { %3821 = vsyncadd (%p3998_p7), %s959_s23, 4294967264  ;;  %p1104_p8 = scmp.lt.s32.totalorder %s3981_s4, 1  ;;  %s4794_s26 = sld [smem:[#allocation28_spill]] }
  0xe4   : > { %s4795_s23 = sld [smem:[#allocation30_spill]]  ;;  %p3213_p7 = scmp.ne.s32.totalorder %s3981_s4, 0 }
  0xe5   : > { %s4219_s11 = scalar_select %p1104_p8, %s3981_s4, 1 }
  0xe6   : > { %s4796_s22 = sld [smem:[#allocation31_spill]] }
  0xe7   : > { %s3319_s10 = sshll.u32 %s4219_s11, 4  ;;  %s4798_s25 = sld [smem:[#allocation33_spill]] }
  0xe8   : > { %s4801_s12 = sld [smem:[#allocation37_spill]]  ;;  %s3324_s17 = sshll.u32 %s4219_s11, 5 }
  0xe9   : > { %s1108_s9 = scalar_lea.vmem %s4794_s26, %s3319_s10  ;;  %s4802_s30 = sld [smem:[#allocation43_spill]] }
  0xea   : > { %s4232_s13 = scalar_lea.vmem %s4795_s23, %s3319_s10  ;;  %s4799_s23 = sld [smem:[#allocation34_spill]] }
  0xeb   : > { %s4803_s19 = sld [smem:[#allocation26_spill]] (!%p3213_p7) }
  0xec   : > { %s1119_s3 = scalar_lea.vmem %s4796_s22, %s4219_s11  ;;  %s4800_s22 = sld [smem:[#allocation35_spill]] }
  0xed   : > { %s4249_s26 = scalar_lea.vmem %s4798_s25, %s3319_s10  ;;  %s970_s25 = scalar_lea.vmem [#allocation17], %s4183_s18 }
  0xee   : > { %s4263_s16 = scalar_lea.vmem %s4801_s12, %s3319_s10  ;;  %1153 = sbr.rel (%p3213_p7) target bundleno = 250 (0xfa), region = 148 }
  0xef   : > { %s4269_s24 = scalar_lea.vmem %s4802_s30, %s3324_s17 }
  0xf0   : > { %s1133_s6 = scalar_lea.vmem %s4799_s23, %s4219_s11 }
  0xf2   : > { %s4258_s1 = scalar_lea.vmem %s4800_s22, %s3319_s10 }
  0xf3   : > { %v1154_v0 = vld [vmem:[%s4803_s19] sm:$0xff]  ;;  %vm1156_vm0 = vcmask 261120   ;;  %v1155_v1 = vld [vmem:[%s4803_s19 + $0x8] sm:$0xff]  ;;  %v1159_v2 = vlaneseq  ;;  %vm1165_vm1 = vcmask 64512   ;;  %v3840_v5 = vmov -1e+30  }
  0xf4   : > { %1157 = vst.msk [vmem:[#allocation2] sm:$0xff] %vm1156_vm0, %v1154_v0 }
  0xf5   : > { %1158 = vst.msk [vmem:[#allocation2 + $0x8] sm:$0xff] %vm1156_vm0, %v1155_v1  ;;  %v1160_v3 = vshrl.u32 %v1159_v2, 7  ;;  %v1162_v4 = vand.u32 127, %v1159_v2 }
  0xf7   : > { %vm1163_vm2 = vcmp.le.s32.totalorder %v1162_v4, %v1160_v3 }
  0xf8   : > { %v1164_v6 = vsel %vm1163_vm2, 0.0, %v3840_v5 }
  0xf9   : > { %1166 = vst.msk [vmem:[#allocation3] sm:$0xff] %vm1165_vm1, %v1164_v6 }
  0xfa PF: > { %v3326_v7 = vld [vmem:[%s1108_s9 + $0x8] sm:$0xff]  ;;  %v3325_v8 = vld [vmem:[%s1108_s9] sm:$0xff]  ;;  %vm1193_vm3 = vcmask 261120   ;;  %s4804_s22 = sld [smem:[#allocation29_spill]]  ;;  %s3841_s9 = smov 104   ;;  %vm1235_vm4 = vcmask 64512  }
  0xfb   : > { %v4279_v9 = vld [vmem:[#allocation2] sm:$0xff]  ;;  %1203 = vmatpush.bf16.msra.mxu0 %v3326_v7  ;;  %s3842_s14 = smov 120   ;;  %s3843_s12 = smov 112   ;;  %vm1380_vm5 = vcmask 1043456  }
  0xfc   : > { %v4281_v10 = vld [vmem:[#allocation2 + $0x8] sm:$0xff]  ;;  %s3844_s17 = smov 96   ;;  %s3845_s5 = smov 64  }
  0xfd   : > { %v1176_v11 = vpack.c.bf16 %v4281_v10, %v4279_v9  ;;  %s4807_s23 = sld [smem:[#allocation27_spill]]  ;;  %s4811_s30 = scalar_lea.vmem [#allocation4], %s4183_s18 }
  0xfe   : > { %s4808_s27 = sld [smem:[#allocation32_spill]]  ;;  %p3315_p10 = scmp.ne.s32.totalorder %s3981_s4, 1 }
  0xff   : > { %1204 = vmatpush.bf16.msra.mxu0 %v3325_v8 }
 0x100   : > { %s4805_s8 = scalar_lea.vmem %s4804_s22, %s4219_s11  ;;  %v4315_v38 = vld [vmem:[#allocation3] sm:$0xff] }
 0x101   : > { %v4291_v12 = vld [vmem:[%s4805_s8] ss:$0 sm:$0xff] }
 0x102   : > { %3222 = vmatmul.msk.bf16.vlgmr.msra.gmra.mxu0 %vm1193_vm3, %v1176_v11 }
 0x104   : > { %s4809_s22 = scalar_lea.vmem %s4808_s27, %s4219_s11 }
 0x17f   : > { %v1206_v13 = vpop.f32.mrf.mxu0 }
 0x180   : > { %v1207_v14 = vadd.f32 %v4291_v12, %v1206_v13 }
 0x182   : > { %1223 = vrot.lane.b32.xlu1 %v1207_v14, %s3841_s9  ;;  %1217 = vrot.lane.b32.xlu0 %v1207_v14, %s3842_s14  ;;  %v1226_v27 = vpack.c.bf16 %v1207_v14, %v1207_v14 }
 0x184   : > { %v1231_v28 = vunpack.c.l.b16 %v1226_v27 }
 0x186   : > { %v1232_v29 = vpack.c.b16 %v1231_v28, %v1231_v28 }
 0x187   : > { %v1208_v41 = vpop.f32.mrf.mxu0 }
 0x188   : > { %v4328_v56 = vadd.f32 %v4291_v12, %v1208_v41 }
 0x18a   : > { %1220 = vrot.lane.b32.xlu0 %v1207_v14, %s3843_s12 }
 0x1f4   : > { %v1224_v15 = vpop.permute.xlu1 %1223  ;;  %v1218_v16 = vpop.permute.xlu0 %1217 }
 0x1f5   : > { %v1229_v17 = vpack.c.bf16 %v1224_v15, %v1224_v15  ;;  %v1227_v18 = vpack.c.bf16 %v1218_v16, %v1218_v16 }
 0x1f7   : > { %v1304_v19 = vunpack.c.l.b16 %v1229_v17  ;;  %v1256_v20 = vunpack.c.l.b16 %v1227_v18 }
 0x1f9   : > { %v4297_v21 = vpack.c.b16 %v1304_v19, %v1304_v19  ;;  %v1257_v22 = vpack.c.b16 %v1256_v20, %v1256_v20 }
 0x1fb   : > { %1306 = vrot.lane.b32.xlu0 %v4297_v21, %s3844_s17  ;;  %1258 = vrot.lane.b32.xlu1 %v1257_v22, %s3844_s17 }
 0x1fc   : > { %v1221_v23 = vpop.permute.xlu0 %1220 }
 0x1fd   : > { %v1228_v24 = vpack.c.bf16 %v1221_v23, %v1221_v23 }
 0x1ff   : > { %v1280_v25 = vunpack.c.l.b16 %v1228_v24 }
 0x201   : > { %v4302_v26 = vpack.c.b16 %v1280_v25, %v1280_v25 }
 0x203   : > { %1282 = vrot.lane.b32.xlu2 %v4302_v26, %s3844_s17 }
 0x20b   : > { %1233 = vrot.lane.b32.xlu2 %v1232_v29, %s3844_s17 }
 0x25d   : > { %v1283_v30 = vpop.permute.xlu2 %1282 }
 0x25e   : > { %v1288_v31 = vsel %vm1235_vm4, %v1283_v30, 0 }
 0x25f   : > { %1297 = vmatpush.bf16.xpose.msra.mxu3 %v1288_v31 }
 0x265   : > { %v1234_v32 = vpop.permute.xlu2 %1233 }
 0x266   : > { %3225 = vmatmul.msk.bf16.vlgmr.msra.gmra.mxu3 %vm1235_vm4, %v1228_v24  ;;  %v1240_v33 = vsel %vm1235_vm4, %v1234_v32, 0 }
 0x267   : > { %1249 = vmatpush.bf16.xpose.msra.mxu1 %v1240_v33 }
 0x26d   : > { %v1259_v34 = vpop.permute.xlu1 %1258  ;;  %v1307_v35 = vpop.permute.xlu0 %1306 }
 0x26e   : > { %3223 = vmatmul.msk.bf16.vlgmr.msra.gmra.mxu1 %vm1235_vm4, %v1226_v27  ;;  %v1264_v36 = vsel %vm1235_vm4, %v1259_v34, 0  ;;  %v1312_v37 = vsel %vm1235_vm4, %v1307_v35, 0 }
 0x26f   : > { %1273 = vmatpush.bf16.xpose.msra.mxu2 %v1264_v36  ;;  %1321 = vmatpush.bf16.xpose.msrb.mxu0 %v1312_v37 }
 0x276   : > { %3224 = vmatmul.msk.bf16.vlgmr.msra.gmra.mxu2 %vm1235_vm4, %v1227_v18  ;;  %3226 = vmatmul.msk.bf16.vlgmr.msrb.gmra.mxu0 %vm1235_vm4, %v1229_v17 }
 0x2e9   : > { %v1299_v39 = vpop.f32.mrf.mxu3 }
 0x2ea   : > { %v1300_v40 = vadd.f32 %v1299_v39, %v4315_v38 }
 0x2eb   : > { %v1251_v42 = vpop.f32.mrf.mxu1 }
 0x2ec   : > { %v1252_v43 = vadd.f32 %v1251_v42, %v4315_v38  ;;  %v1333_v44 = vsel %vm1235_vm4, %v1300_v40, -inf }
 0x2ed   : > { %1334 = vmax.xlane.f32.xlu2 %v1333_v44 }
 0x2ee   : > { %v1327_v45 = vsel %vm1235_vm4, %v1252_v43, -inf }
 0x2ef   : > { %1328 = vmax.xlane.f32.xlu0 %v1327_v45 }
 0x2f1   : > { %v1301_v46 = vpop.f32.mrf.mxu3 }
 0x2f3   : > { %v1253_v47 = vpop.f32.mrf.mxu1  ;;  %v1323_v48 = vpop.f32.mrf.mxu0 }
 0x2f4   : > { %v1324_v49 = vadd.f32 %v1323_v48, %v4315_v38 }
 0x2f6   : > { %v1336_v50 = vsel %vm1235_vm4, %v1324_v49, -inf }
 0x2f7   : > { %1337 = vmax.xlane.f32.xlu2 %v1336_v50  ;;  %v1557_v50 = vpack.c.bf16 %v4328_v56, %v4328_v56 }
 0x2f9   : > { %v1275_v51 = vpop.f32.mrf.mxu2 }
 0x2fa   : > { %v1276_v52 = vadd.f32 %v1275_v51, %v4315_v38 }
 0x2fb   : > { %v1325_v53 = vpop.f32.mrf.mxu0 }
 0x2fc   : > { %v1330_v54 = vsel %vm1235_vm4, %v1276_v52, -inf  ;;  %v1562_v53 = vunpack.c.l.b16 %v1557_v50 }
 0x2fd   : > { %1331 = vmax.xlane.f32.xlu1 %v1330_v54 }
 0x301   : > { %v1277_v55 = vpop.f32.mrf.mxu2 }
 0x303   : > { %1397 = vrot.lane.b32.xlu0 %v1257_v22, %s3845_s5 }
 0x30b   : > { %1375 = vrot.lane.b32.xlu0 %v1232_v29, %s3845_s5 }
 0x313   : > { %1551 = vrot.lane.b32.xlu0 %v4328_v56, %s3843_s12 }
 0x360   : > { %v1335_v57 = vpop.xlane.xlu2 %1334 }
 0x361   : > { %v1341_v63 = vsub.f32 %v1300_v40, %v1335_v57  ;;  %v1213_v40 = vld [vmem:[%s4232_s13 + $0x8] sm:$0xf]  ;;  %v4372_v57 = vpack.c.b16 %v1562_v53, %v1562_v53 }
 0x362   : > { %v1329_v58 = vpop.xlane.xlu0 %1328 }
 0x363   : > { %v1339_v59 = vsub.f32 %v1252_v43, %v1329_v58  ;;  %v1347_v3 = vmul.f32 1.442695, %v1341_v63  ;;  %v4359_v43 = vsel %vm1380_vm5, %v1213_v40, 0  ;;  %v1212_v63 = vld [vmem:[%s4232_s13 + $0x4] sm:$0xf] }
 0x365   : > { %v1343_v60 = vmul.f32 1.442695, %v1339_v59  ;;  %v1211_v59 = vld [vmem:[%s4232_s13] sm:$0xf] }
 0x367   : > { %3438 = vpow2.f32 %v1343_v60  ;;  %v4381_v60 = vsel %vm1380_vm5, %v1211_v59, 0 }
 0x36a   : > { %v1338_v61 = vpop.xlane.xlu2 %1337 }
 0x36b   : > { %v1342_v62 = vsub.f32 %v1324_v49, %v1338_v61  ;;  %v1214_v61 = vld [vmem:[%s4232_s13 + $0xc] sm:$0xf]  ;;  %s4810_s13 = scalar_lea.vmem %s4729_s7, %s4219_s11  ;;  %s4815_s11 = scalar_lea.vmem [#allocation9], %s4183_s18 }
 0x36d   : > { %v3439_v0 = vpop.eup %3438  ;;  %v1349_v1 = vmul.f32 1.442695, %v1342_v62  ;;  %v4386_v62 = vsel %vm1380_vm5, %v1214_v61, 0 }
 0x36e   : > { %v1351_v2 = vsel %vm1235_vm4, %v3439_v0, 0.0 }
 0x36f   : > { %3440 = vpow2.f32 %v1349_v1  ;;  %1352 = vadd.xlane.f32.xlu2 %v1351_v2 }
 0x370   : > { %v1332_v4 = vpop.xlane.xlu1 %1331  ;;  %3442 = vpow2.f32 %v1347_v3 }
 0x371   : > { %v1340_v5 = vsub.f32 %v1276_v52, %v1332_v4 }
 0x373   : > { %v1345_v6 = vmul.f32 1.442695, %v1340_v5 }
 0x375   : > { %v3441_v7 = vpop.eup %3440  ;;  %3444 = vpow2.f32 %v1345_v6  ;;  %v1398_v8 = vpop.permute.xlu0 %1397 }
 0x376   : > { %v1403_v11 = vsel %vm1380_vm5, %v1398_v8, 0  ;;  %v1360_v12 = vsel %vm1235_vm4, %v3441_v7, 0.0  ;;  %v3443_v13 = vpop.eup %3442 }
 0x377   : > { %1412 = vmatpush.bf16.msrb.mxu2 %v1403_v11  ;;  %1361 = vadd.xlane.f32.xlu2 %v1360_v12  ;;  %v1357_v18 = vsel %vm1235_vm4, %v3443_v13, 0.0 }
 0x37b   : > { %v3445_v14 = vpop.eup %3444 }
 0x37c   : > { %v1354_v15 = vsel %vm1235_vm4, %v3445_v14, 0.0 }
 0x37d   : > { %1355 = vadd.xlane.f32.xlu1 %v1354_v15  ;;  %v1376_v16 = vpop.permute.xlu0 %1375 }
 0x37e   : > { %v1382_v17 = vsel %vm1380_vm5, %v1376_v16, 0 }
 0x37f   : > { %1391 = vmatpush.bf16.msrb.mxu1 %v1382_v17  ;;  %1358 = vadd.xlane.f32.xlu2 %v1357_v18 }
 0x383   : > { %1477 = vmatpush.bf16.msra.mxu1 %v4381_v60 }
 0x385   : > { %v1552_v19 = vpop.permute.xlu0 %1551 }
 0x386   : > { %v4344_v20 = vpack.c.bf16 %v1552_v19, %v1552_v19 }
 0x388   : > { %v1610_v22 = vunpack.c.l.b16 %v4344_v20 }
 0x38a   : > { %v4349_v23 = vpack.c.b16 %v1610_v22, %v1610_v22 }
 0x396   : > { %1418 = vrot.lane.b32.xlu1 %v4302_v26, %s3845_s5 }
 0x397   : > { %1439 = vrot.lane.b32.xlu2 %v4297_v21, %s3845_s5 }
 0x39e   : > { %1548 = vrot.lane.b32.xlu1 %v4328_v56, %s3842_s14 }
 0x3a6   : > { %1554 = vrot.lane.b32.xlu1 %v4328_v56, %s3841_s9 }
 0x3ae   : > { %1612 = vrot.lane.b32.xlu1 %v4349_v23, %s3844_s17 }
 0x3e2   : > { %v1353_v24 = vpop.xlane.xlu2 %1352 }
 0x3e3   : > { %3446 = vrcp.f32 %v1353_v24 }
 0x3e9   : > { %v3447_v25 = vpop.eup %3446 }
 0x3ea   : > { %v1367_v21 = vmul.f32 %v3447_v25, %v3439_v0  ;;  %v1362_v26 = vpop.xlane.xlu2 %1361  ;;  %v4391_v0 = vsel %vm1380_vm5, %v1212_v63, 0 }
 0x3eb   : > { %3448 = vrcp.f32 %v1362_v26  ;;  %1496 = vmatpush.bf16.msra.mxu2 %v4391_v0 }
 0x3ec   : > { %v1371_v27 = vpack.c.bf16 %v1367_v21, %v1367_v21 }
 0x3ee   : > { %3227 = vmatmul.msk.bf16.vlgmr.msrb.gmra.mxu1 %vm1235_vm4, %v1371_v27 }
 0x3f0   : > { %v1356_v28 = vpop.xlane.xlu1 %1355 }
 0x3f1   : > { %3450 = vrcp.f32 %v1356_v28  ;;  %v3449_v30 = vpop.eup %3448 }
 0x3f2   : > { %v1359_v29 = vpop.xlane.xlu2 %1358  ;;  %v1370_v33 = vmul.f32 %v3449_v30, %v3441_v7 }
 0x3f3   : > { %3452 = vrcp.f32 %v1359_v29 }
 0x3f4   : > { %v1374_v37 = vpack.c.bf16 %v1370_v33, %v1370_v33 }
 0x3f7   : > { %v3451_v31 = vpop.eup %3450 }
 0x3f8   : > { %v1368_v32 = vmul.f32 %v3451_v31, %v3445_v14 }
 0x3f9   : > { %v3453_v39 = vpop.eup %3452 }
 0x3fa   : > { %v1440_v34 = vpop.permute.xlu2 %1439  ;;  %v1372_v35 = vpack.c.bf16 %v1368_v32, %v1368_v32  ;;  %v1369_v41 = vmul.f32 %v3453_v39, %v3443_v13 }
 0x3fb   : > { %v1445_v36 = vsel %vm1380_vm5, %v1440_v34, 0 }
 0x3fc   : > { %3228 = vmatmul.msk.bf16.vlgmr.msrb.gmra.mxu2 %vm1235_vm4, %v1372_v35  ;;  %1454 = vmatpush.bf16.msra.mxu0 %v1445_v36  ;;  %v1373_v45 = vpack.c.bf16 %v1369_v41, %v1369_v41 }
 0x3ff   : > { %3230 = vmatmul.msk.bf16.vlgmr.msra.gmra.mxu0 %vm1235_vm4, %v1374_v37 }
 0x400   : > { %1534 = vmatpush.bf16.msrb.mxu0 %v4386_v62 }
 0x408   : > { %v1419_v42 = vpop.permute.xlu1 %1418 }
 0x409   : > { %v1424_v44 = vsel %vm1380_vm5, %v1419_v42, 0 }
 0x40a   : > { %1433 = vmatpush.bf16.msrb.mxu3 %v1424_v44 }
 0x40d   : > { %3229 = vmatmul.msk.bf16.vlgmr.msrb.gmra.mxu3 %vm1235_vm4, %v1373_v45 }
 0x40e   : > { %1515 = vmatpush.bf16.msra.mxu3 %v4359_v43 }
 0x410   : > { %v1549_v46 = vpop.permute.xlu1 %1548 }
 0x411   : > { %v1558_v47 = vpack.c.bf16 %v1549_v46, %v1549_v46 }
 0x413   : > { %v1586_v48 = vunpack.c.l.b16 %v1558_v47 }
 0x415   : > { %v4364_v49 = vpack.c.b16 %v1586_v48, %v1586_v48 }
 0x417   : > { %1588 = vrot.lane.b32.xlu0 %v4364_v49, %s3844_s17 }
 0x418   : > { %v1555_v51 = vpop.permute.xlu1 %1554 }
 0x419   : > { %v1560_v52 = vpack.c.bf16 %v1555_v51, %v1555_v51 }
 0x41b   : > { %v1634_v54 = vunpack.c.l.b16 %v1560_v52 }
 0x41d   : > { %v4370_v55 = vpack.c.b16 %v1634_v54, %v1634_v54 }
 0x41f   : > { %1564 = vrot.lane.b32.xlu0 %v4372_v57, %s3844_s17  ;;  %1636 = vrot.lane.b32.xlu2 %v4370_v55, %s3844_s17 }
 0x420   : > { %v1613_v56 = vpop.permute.xlu1 %1612 }
 0x421   : > { %v1618_v58 = vsel %vm1235_vm4, %v1613_v56, 0 }
 0x422   : > { %1627 = vmatpush.bf16.xpose.msrb.mxu3 %v1618_v58  ;;  %v4427_v58 = vld [vmem:[%s1119_s3] ss:$0 sm:$0xff] }
 0x46b   : > { %v1393_v1 = vpop.f32.mrf.mxu1 }
 0x46c   : > { %v1460_v2 = vpack.c.bf16 %v1393_v1, %v1393_v1 }
 0x46e   : > { %3231 = vmatmul.msk.bf16.vlgmr.msra.gmra.mxu1 %vm1235_vm4, %v1460_v2 }
 0x473   : > { %v1395_v3 = vpop.f32.mrf.mxu1 }
 0x479   : > { %v1637_v4 = vpop.permute.xlu2 %1636 }
 0x47a   : > { %v1642_v5 = vsel %vm1235_vm4, %v1637_v4, 0 }
 0x47b   : > { %1651 = vmatpush.bf16.xpose.msra.mxu0 %v1642_v5 }
 0x47c   : > { %v1456_v6 = vpop.f32.mrf.mxu0 }
 0x47d   : > { %v1463_v7 = vpack.c.bf16 %v1456_v6, %v1456_v6 }
 0x47f   : > { %v1414_v8 = vpop.f32.mrf.mxu2  ;;  %3234 = vmatmul.msk.bf16.vlgmr.msrb.gmra.mxu0 %vm1235_vm4, %v1463_v7 }
 0x480   : > { %v1461_v11 = vpack.c.bf16 %v1414_v8, %v1414_v8 }
 0x482   : > { %3232 = vmatmul.msk.bf16.vlgmr.msra.gmra.mxu2 %vm1235_vm4, %v1461_v11 }
 0x484   : > { %v1458_v12 = vpop.f32.mrf.mxu0 }
 0x487   : > { %v1416_v13 = vpop.f32.mrf.mxu2 }
 0x489   : > { %v1589_v14 = vpop.permute.xlu0 %1588 }
 0x48a   : > { %v1594_v15 = vsel %vm1235_vm4, %v1589_v14, 0 }
 0x48b   : > { %1603 = vmatpush.bf16.xpose.msrb.mxu2 %v1594_v15 }
 0x48f   : > { %3238 = vmatmul.msk.bf16.vlgmr.msra.gmra.mxu0 %vm1235_vm4, %v1560_v52 }
 0x490   : > { %v1435_v16 = vpop.f32.mrf.mxu3 }
 0x491   : > { %v1462_v17 = vpack.c.bf16 %v1435_v16, %v1435_v16  ;;  %v1565_v18 = vpop.permute.xlu0 %1564 }
 0x492   : > { %v1570_v19 = vsel %vm1235_vm4, %v1565_v18, 0  ;;  %3236 = vmatmul.msk.bf16.vlgmr.msrb.gmra.mxu2 %vm1235_vm4, %v1558_v47 }
 0x493   : > { %3233 = vmatmul.msk.bf16.vlgmr.msra.gmra.mxu3 %vm1235_vm4, %v1462_v17  ;;  %1579 = vmatpush.bf16.xpose.msrb.mxu1 %v1570_v19 }
 0x498   : > { %v1437_v22 = vpop.f32.mrf.mxu3 }
 0x49a   : > { %3235 = vmatmul.msk.bf16.vlgmr.msrb.gmra.mxu1 %vm1235_vm4, %v1557_v50 }
 0x4a3   : > { %3237 = vmatmul.msk.bf16.vlgmr.msrb.gmra.mxu3 %vm1235_vm4, %v4344_v20 }
 0x4eb   : > { %v1479_v24 = vpop.f32.mrf.mxu1 }
 0x4ec   : > { %v1540_v28 = vsel %vm1193_vm3, %v1479_v24, 0.0 }
 0x4f3   : > { %v1481_v25 = vpop.f32.mrf.mxu1 }
 0x4fc   : > { %v1536_v21 = vpop.f32.mrf.mxu0 }
 0x4fd   : > { %v1545_v42 = vsel %vm1193_vm3, %v1536_v21, 0.0  ;;  %v3846_v21 = vmov 32.0  }
 0x504   : > { %v1538_v26 = vpop.f32.mrf.mxu0 }
 0x505   : > { %v1498_v27 = vpop.f32.mrf.mxu2 }
 0x506   : > { %v1541_v29 = vsel %vm1193_vm3, %v1498_v27, 0.0 }
 0x507   : > { %v1542_v30 = vadd.f32 %v1541_v29, %v1540_v28 }
 0x50c   : > { %v1653_v31 = vpop.f32.mrf.mxu0 }
 0x50d   : > { %v1500_v32 = vpop.f32.mrf.mxu2  ;;  %v1654_v46 = vadd.f32 %v1653_v31, %v4315_v38 }
 0x50f   : > { %v1666_v51 = vsel %vm1235_vm4, %v1654_v46, -inf }
 0x514   : > { %v1655_v33 = vpop.f32.mrf.mxu0 }
 0x515   : > { %v1605_v34 = vpop.f32.mrf.mxu2 }
 0x516   : > { %v1606_v35 = vadd.f32 %v1605_v34, %v4315_v38  ;;  %v1517_v36 = vpop.f32.mrf.mxu3 }
 0x517   : > { %v1543_v37 = vsel %vm1193_vm3, %v1517_v36, 0.0  ;;  %v1581_v20 = vpop.f32.mrf.mxu1 }
 0x518   : > { %v1544_v39 = vadd.f32 %v1543_v37, %v1542_v30  ;;  %v1582_v40 = vadd.f32 %v1581_v20, %v4315_v38  ;;  %v1660_v41 = vsel %vm1235_vm4, %v1606_v35, -inf }
 0x519   : > { %1661 = vmax.xlane.f32.xlu1 %v1660_v41 }
 0x51a   : > { %v1546_v44 = vadd.f32 %v1545_v42, %v1544_v39  ;;  %v1657_v45 = vsel %vm1235_vm4, %v1582_v40, -inf }
 0x51b   : > { %1658 = vmax.xlane.f32.xlu2 %v1657_v45 }
 0x51c   : > { %v1867_v59 = vadd.f32 %v4427_v58, %v1546_v44 }
 0x51d   : > { %v1607_v47 = vpop.f32.mrf.mxu2 }
 0x51e   : > { %v1519_v48 = vpop.f32.mrf.mxu3 }
 0x51f   : > { %v1583_v50 = vpop.f32.mrf.mxu1 }
 0x521   : > { %1667 = vmax.xlane.f32.xlu1 %v1666_v51 }
 0x526   : > { %v1629_v52 = vpop.f32.mrf.mxu3 }
 0x527   : > { %v1630_v53 = vadd.f32 %v1629_v52, %v4315_v38  ;;  %v1869_v38 = vadd.f32 %v1867_v59, %v4279_v9 }
 0x529   : > { %v1663_v54 = vsel %vm1235_vm4, %v1630_v53, -inf  ;;  %v1873_v61 = vsel %vm1193_vm3, %v1869_v38, 0.0 }
 0x52a   : > { %1664 = vmax.xlane.f32.xlu0 %v1663_v54 }
 0x52e   : > { %v1631_v56 = vpop.f32.mrf.mxu3 }
 0x53a   : > { %1726 = vrot.lane.b32.xlu1 %v4364_v49, %s3845_s5 }
 0x53e   : > { %1747 = vrot.lane.b32.xlu0 %v4349_v23, %s3845_s5 }
 0x564   : > { %1874 = vadd.xlane.f32.xlu1 %v1873_v61 }
 0x58c   : > { %v1662_v63 = vpop.xlane.xlu1 %1661 }
 0x58d   : > { %v1670_v1 = vsub.f32 %v1606_v35, %v1662_v63 }
 0x58e   : > { %v1659_v2 = vpop.xlane.xlu2 %1658 }
 0x58f   : > { %v1675_v49 = vmul.f32 1.442695, %v1670_v1  ;;  %v1669_v3 = vsub.f32 %v1582_v40, %v1659_v2 }
 0x591   : > { %3454 = vpow2.f32 %v1675_v49  ;;  %v1673_v23 = vmul.f32 1.442695, %v1669_v3 }
 0x593   : > { %3456 = vpow2.f32 %v1673_v23 }
 0x594   : > { %v1668_v4 = vpop.xlane.xlu1 %1667 }
 0x595   : > { %v1672_v5 = vsub.f32 %v1654_v46, %v1668_v4 }
 0x597   : > { %v3455_v6 = vpop.eup %3454  ;;  %v1679_v7 = vmul.f32 1.442695, %v1672_v5 }
 0x598   : > { %v1684_v8 = vsel %vm1235_vm4, %v3455_v6, 0.0 }
 0x599   : > { %v3457_v11 = vpop.eup %3456  ;;  %3458 = vpow2.f32 %v1679_v7  ;;  %1685 = vadd.xlane.f32.xlu0 %v1684_v8 }
 0x59a   : > { %v1681_v9 = vsel %vm1235_vm4, %v3457_v11, 0.0 }
 0x59b   : > { %1682 = vadd.xlane.f32.xlu2 %v1681_v9 }
 0x59d   : > { %v1665_v12 = vpop.xlane.xlu0 %1664 }
 0x59e   : > { %v1671_v13 = vsub.f32 %v1630_v53, %v1665_v12 }
 0x59f   : > { %v3459_v14 = vpop.eup %3458 }
 0x5a0   : > { %v1677_v15 = vmul.f32 1.442695, %v1671_v13  ;;  %v1690_v16 = vsel %vm1235_vm4, %v3459_v14, 0.0 }
 0x5a2   : > { %3460 = vpow2.f32 %v1677_v15 }
 0x5a3   : > { %1691 = vadd.xlane.f32.xlu2 %v1690_v16  ;;  %3462 = vrcp.f32 %v3846_v21 }
 0x5a8   : > { %v3461_v17 = vpop.eup %3460 }
 0x5a9   : > { %v1687_v18 = vsel %vm1235_vm4, %v3461_v17, 0.0  ;;  %v3463_v26 = vpop.eup %3462 }
 0x5aa   : > { %v1880_v27 = vmul.f32 32.0, %v3463_v26  ;;  %vm1884_vm6 = vweird.f32 %v3463_v26 }
 0x5ab   : > { %1688 = vadd.xlane.f32.xlu2 %v1687_v18 }
 0x5ac   : > { %v1727_v19 = vpop.permute.xlu1 %1726  ;;  %v1881_v28 = vsub.f32 1.0, %v1880_v27 }
 0x5ad   : > { %v1732_v22 = vsel %vm1380_vm5, %v1727_v19, 0  ;;  %1768 = vrot.lane.b32.xlu0 %v4370_v55, %s3845_s5 }
 0x5ae   : > { %1741 = vmatpush.bf16.msra.mxu2 %v1732_v22  ;;  %v1882_v29 = vmul.f32 %v3463_v26, %v1881_v28 }
 0x5b0   : > { %v1748_v24 = vpop.permute.xlu0 %1747  ;;  %v1883_v30 = vadd.f32 %v3463_v26, %v1882_v29 }
 0x5b1   : > { %v1753_v25 = vsel %vm1380_vm5, %v1748_v24, 0 }
 0x5b2   : > { %1819 = vmatpush.bf16.msrb.mxu2 %v4391_v0  ;;  %1762 = vmatpush.bf16.msra.mxu3 %v1753_v25  ;;  %v4444_v55 = vsel %vm1884_vm6, %v3463_v26, %v1883_v30  ;;  %v3330_v30 = vld [vmem:[%s4258_s1 + $0x8] sm:$0xff] }
 0x5b6   : > { %1835 = vmatpush.bf16.msrb.mxu3 %v4359_v43 }
 0x5c3   : > { %1705 = vrot.lane.b32.xlu2 %v4372_v57, %s3845_s5 }
 0x5d7   : > { %v1875_v0 = vpop.xlane.xlu1 %1874 }
 0x5d8   : > { %v1886_v31 = vmul.f32 %v4444_v55, %v1875_v0  ;;  %v3329_v0 = vld [vmem:[%s4258_s1] sm:$0xff] }
 0x5da   : > { %v4447_v32 = vsub.f32 %v1869_v38, %v1886_v31 }
 0x5dc   : > { %v1890_v43 = vmul.f32 %v4447_v32, %v4447_v32 }
 0x5de   : > { %v1892_v57 = vsel %vm1193_vm3, %v1890_v43, 0.0 }
 0x5ec   : > { %1893 = vadd.xlane.f32.xlu2 %v1892_v57 }
 0x60c   : > { %v1686_v33 = vpop.xlane.xlu0 %1685 }
 0x60d   : > { %3464 = vrcp.f32 %v1686_v33 }
 0x60e   : > { %v1683_v34 = vpop.xlane.xlu2 %1682 }
 0x613   : > { %v3465_v35 = vpop.eup %3464 }
 0x614   : > { %v1698_v36 = vmul.f32 %v3465_v35, %v3455_v6 }
 0x616   : > { %v1702_v37 = vpack.c.bf16 %v1698_v36, %v1698_v36  ;;  %v1692_v20 = vpop.xlane.xlu2 %1691  ;;  %v3327_v36 = vld [vmem:[%s4249_s26] sm:$0xff] }
 0x617   : > { %3466 = vrcp.f32 %v1692_v20 }
 0x618   : > { %3240 = vmatmul.msk.bf16.vlgmr.msra.gmra.mxu2 %vm1235_vm4, %v1702_v37  ;;  %3468 = vrcp.f32 %v1683_v34  ;;  %v3328_v34 = vld [vmem:[%s4249_s26 + $0x8] sm:$0xff] }
 0x619   : > { %2002 = vmatpush.bf16.msra.mxu2 %v3330_v30 }
 0x61d   : > { %v3467_v39 = vpop.eup %3466  ;;  %2003 = vmatpush.bf16.msra.mxu2 %v3329_v0 }
 0x61e   : > { %v1700_v40 = vmul.f32 %v3467_v39, %v3459_v14  ;;  %v1689_v41 = vpop.xlane.xlu2 %1688  ;;  %v3469_v45 = vpop.eup %3468 }
 0x61f   : > { %3470 = vrcp.f32 %v1689_v41  ;;  %v1769_v42 = vpop.permute.xlu0 %1768  ;;  %v1697_v48 = vmul.f32 %v3469_v45, %v3457_v11 }
 0x620   : > { %v1774_v44 = vsel %vm1380_vm5, %v1769_v42, 0  ;;  %v1704_v46 = vpack.c.bf16 %v1700_v40, %v1700_v40 }
 0x621   : > { %1783 = vmatpush.bf16.msrb.mxu0 %v1774_v44  ;;  %v1701_v54 = vpack.c.bf16 %v1697_v48, %v1697_v48 }
 0x624   : > { %3242 = vmatmul.msk.bf16.vlgmr.msrb.gmra.mxu0 %vm1235_vm4, %v1704_v46 }
 0x625   : > { %1851 = vmatpush.bf16.msra.mxu0 %v4386_v62  ;;  %v3471_v47 = vpop.eup %3470 }
 0x626   : > { %v1699_v50 = vmul.f32 %v3471_v47, %v3461_v17  ;;  %v1706_v51 = vpop.permute.xlu2 %1705 }
 0x627   : > { %v1711_v52 = vsel %vm1380_vm5, %v1706_v51, 0 }
 0x628   : > { %v1703_v53 = vpack.c.bf16 %v1699_v50, %v1699_v50  ;;  %1720 = vmatpush.bf16.msra.mxu1 %v1711_v52 }
 0x62a   : > { %3241 = vmatmul.msk.bf16.vlgmr.msra.gmra.mxu3 %vm1235_vm4, %v1703_v53  ;;  %v3427_v53 = vld [vmem:[%s4809_s22] ss:$0 sm:$0xff] }
 0x62b   : > { %3239 = vmatmul.msk.bf16.vlgmr.msra.gmra.mxu1 %vm1235_vm4, %v1701_v54 }
 0x62c   : > { %1803 = vmatpush.bf16.msrb.mxu1 %v4381_v60 }
 0x630   : > { %1964 = vmatpush.bf16.msra.mxu1 %v3328_v34 }
 0x634   : > { %1965 = vmatpush.bf16.msra.mxu1 %v3327_v36 }
 0x65f   : > { %v1894_v43 = vpop.xlane.xlu2 %1893 }
 0x660   : > { %v1898_v57 = vmul.f32 %v1894_v43, %v4444_v55 }
 0x662   : > { %v1900_v33 = vadd.f32 1e-05, %v1898_v57 }
 0x664   : > { %3472 = vrsqrt.f32 %v1900_v33  ;;  %vm1908_vm8 = vweird.f32 %v1900_v33 }
 0x66a   : > { %v3473_v35 = vpop.eup %3472 }
 0x66b   : > { %v1903_v37 = vmul.f32 %v3473_v35, %v1900_v33  ;;  %vm1909_vm7 = vweird.f32 %v3473_v35 }
 0x66c   : > { %vm1910_vm9 = vmor %vm1908_vm8, %vm1909_vm7 }
 0x66d   : > { %v1904_v20 = vmul.f32 %v3473_v35, %v1903_v37 }
 0x66f   : > { %v1905_v42 = vmul.f32 0.5, %v1904_v20 }
 0x671   : > { %v1906_v44 = vsub.f32 1.5, %v1905_v42 }
 0x673   : > { %v1907_v46 = vmul.f32 %v3473_v35, %v1906_v44 }
 0x675   : > { %v1911_v50 = vsel %vm1910_vm9, %v3473_v35, %v1907_v46 }
 0x676   : > { %v1922_v54 = vmul.f32 %v1911_v50, %v4447_v32 }
 0x69b   : > { %v1743_v56 = vpop.f32.mrf.mxu2 }
 0x69c   : > { %v1790_v59 = vpack.c.bf16 %v1743_v56, %v1743_v56 }
 0x69e   : > { %3244 = vmatmul.msk.bf16.vlgmr.msrb.gmra.mxu2 %vm1235_vm4, %v1790_v59 }
 0x6a1   : > { %v1785_v62 = vpop.f32.mrf.mxu0 }
 0x6a2   : > { %v1792_v38 = vpack.c.bf16 %v1785_v62, %v1785_v62  ;;  %v3428_v62 = vld [vmem:[%s4810_s13] ss:$0 sm:$0xff] }
 0x6a3   : > { %v1745_v61 = vpop.f32.mrf.mxu2 }
 0x6a4   : > { %3246 = vmatmul.msk.bf16.vlgmr.msra.gmra.mxu0 %vm1235_vm4, %v1792_v38  ;;  %v1927_v38 = vmul.f32 %v3427_v53, %v1922_v54 }
 0x6a8   : > { %v1722_v63 = vpop.f32.mrf.mxu1 }
 0x6a9   : > { %v1789_v1 = vpack.c.bf16 %v1722_v63, %v1722_v63  ;;  %v1787_v2 = vpop.f32.mrf.mxu0 }
 0x6ab   : > { %3243 = vmatmul.msk.bf16.vlgmr.msrb.gmra.mxu1 %vm1235_vm4, %v1789_v1  ;;  %v4497_v1 = vadd.f32 %v3428_v62, %v1927_v38 }
 0x6ad   : > { %v1764_v49 = vpop.f32.mrf.mxu3 }
 0x6ae   : > { %v1791_v60 = vpack.c.bf16 %v1764_v49, %v1764_v49  ;;  %v3429_v49 = vld [vmem:[%s4811_s30] ss:$0 sm:$0xff] }
 0x6b0   : > { %v1724_v3 = vpop.f32.mrf.mxu1  ;;  %3245 = vmatmul.msk.bf16.vlgmr.msrb.gmra.mxu3 %vm1235_vm4, %v1791_v60 }
 0x6b5   : > { %v1766_v23 = vpop.f32.mrf.mxu3 }
 0x721   : > { %v1821_v4 = vpop.f32.mrf.mxu2  ;;  %v1853_v5 = vpop.f32.mrf.mxu0 }
 0x722   : > { %v1858_v12 = vsel %vm1193_vm3, %v1821_v4, 0.0  ;;  %v1862_v17 = vsel %vm1193_vm3, %v1853_v5, 0.0  ;;  %v3430_v5 = vld [vmem:[%s1133_s6] ss:$0 sm:$0xff]  ;;  %s4816_s6 = scalar_lea.vmem [#allocation12], %s4183_s18 }
 0x728   : > { %v1805_v6 = vpop.f32.mrf.mxu1 }
 0x729   : > { %v1823_v7 = vpop.f32.mrf.mxu2  ;;  %v1855_v8 = vpop.f32.mrf.mxu0  ;;  %v1857_v11 = vsel %vm1193_vm3, %v1805_v6, 0.0 }
 0x72a   : > { %v1859_v13 = vadd.f32 %v1858_v12, %v1857_v11 }
 0x730   : > { %v1807_v9 = vpop.f32.mrf.mxu1 }
 0x733   : > { %v1837_v14 = vpop.f32.mrf.mxu3 }
 0x734   : > { %v1860_v15 = vsel %vm1193_vm3, %v1837_v14, 0.0 }
 0x735   : > { %v1861_v16 = vadd.f32 %v1860_v15, %v1859_v13 }
 0x737   : > { %v1863_v18 = vadd.f32 %v1862_v17, %v1861_v16 }
 0x739   : > { %v1868_v19 = vadd.f32 %v4427_v58, %v1863_v18  ;;  %v1170_v58 = vld [vmem:[%s4807_s23 + $0x8] sm:$0xff] }
 0x73b   : > { %v1839_v22 = vpop.f32.mrf.mxu3  ;;  %v1870_v24 = vadd.f32 %v1868_v19, %v4281_v10  ;;  %v1169_v10 = vld [vmem:[%s4807_s23] sm:$0xff] }
 0x73c   : > { %v1976_v31 = vpack.c.bf16 %v1170_v58, %v1169_v10 }
 0x73d   : > { %v1876_v25 = vsel %vm1193_vm3, %v1870_v24, 0.0 }
 0x73e   : > { %1877 = vadd.xlane.f32.xlu0 %v1876_v25  ;;  %3264 = vmatmul.msk.bf16.vlgmr.msra.gmra.mxu2 %vm1193_vm3, %v1976_v31 }
 0x7b1   : > { %v1878_v21 = vpop.xlane.xlu0 %1877 }
 0x7b2   : > { %v1887_v26 = vmul.f32 %v4444_v55, %v1878_v21 }
 0x7b4   : > { %v1889_v27 = vsub.f32 %v1870_v24, %v1887_v26 }
 0x7b6   : > { %v1891_v28 = vmul.f32 %v1889_v27, %v1889_v27 }
 0x7b8   : > { %v1895_v29 = vsel %vm1193_vm3, %v1891_v28, 0.0 }
 0x7b9   : > { %1896 = vadd.xlane.f32.xlu1 %v1895_v29 }
 0x7c1   : > { %v2005_v60 = vpop.f32.mrf.mxu2 }
 0x7c2   : > { %v2006_v3 = vadd.f32 %v3429_v49, %v2005_v60 }
 0x7c4   : > { %2036 = vrot.lane.b32.xlu0 %v2006_v3, %s3841_s9  ;;  %v2039_v23 = vpack.c.bf16 %v2006_v3, %v2006_v3  ;;  %2030 = vrot.lane.b32.xlu2 %v2006_v3, %s3842_s14 }
 0x7c6   : > { %v2047_v4 = vsel %vm1235_vm4, %v2039_v23, 0  ;;  %v2168_v37 = vunpack.c.l.b16 %v2039_v23 }
 0x7c7   : > { %2056 = vmatpush.bf16.xpose.msra.mxu3 %v2047_v4 }
 0x7c9   : > { %v2007_v0 = vpop.f32.mrf.mxu2 }
 0x7cc   : > { %2033 = vrot.lane.b32.xlu0 %v2006_v3, %s3843_s12 }
 0x81e   : > { %v2031_v11 = vpop.permute.xlu2 %2030 }
 0x81f   : > { %v4519_v9 = vpack.c.bf16 %v2031_v11, %v2031_v11  ;;  %v2010_v11 = vld [vmem:[%s4263_s16] sm:$0xf] }
 0x821   : > { %v2066_v12 = vsel %vm1235_vm4, %v4519_v9, 0 }
 0x822   : > { %2075 = vmatpush.bf16.xpose.msrb.mxu0 %v2066_v12  ;;  %v4555_v12 = vsel %vm1380_vm5, %v2010_v11, 0 }
 0x82c   : > { %v1897_v39 = vpop.xlane.xlu1 %1896 }
 0x82d   : > { %v1899_v40 = vmul.f32 %v1897_v39, %v4444_v55  ;;  %v2169_v39 = vpack.c.b16 %v2168_v37, %v2168_v37 }
 0x82f   : > { %v1901_v41 = vadd.f32 1e-05, %v1899_v40 }
 0x831   : > { %3474 = vrsqrt.f32 %v1901_v41  ;;  %vm1918_vm11 = vweird.f32 %v1901_v41 }
 0x836   : > { %v2037_v13 = vpop.permute.xlu0 %2036 }
 0x837   : > { %v3475_v45 = vpop.eup %3474  ;;  %v2042_v14 = vpack.c.bf16 %v2037_v13, %v2037_v13  ;;  %v2192_v13 = vunpack.c.l.b16 %v4519_v9 }
 0x838   : > { %v1913_v47 = vmul.f32 %v3475_v45, %v1901_v41  ;;  %vm1919_vm10 = vweird.f32 %v3475_v45  ;;  %v2008_v41 = vadd.f32 %v3429_v49, %v2007_v0 }
 0x839   : > { %vm1920_vm12 = vmor %vm1918_vm11, %vm1919_vm10  ;;  %v2104_v15 = vsel %vm1235_vm4, %v2042_v14, 0  ;;  %v2240_v20 = vunpack.c.l.b16 %v2042_v14  ;;  %v2193_v14 = vpack.c.b16 %v2192_v13, %v2192_v13 }
 0x83a   : > { %v1914_v48 = vmul.f32 %v3475_v45, %v1913_v47  ;;  %2113 = vmatpush.bf16.xpose.msrb.mxu2 %v2104_v15 }
 0x83b   : > { %v2241_v40 = vpack.c.b16 %v2240_v20, %v2240_v20 }
 0x83c   : > { %v1915_v51 = vmul.f32 0.5, %v1914_v48 }
 0x83e   : > { %v1916_v52 = vsub.f32 1.5, %v1915_v51  ;;  %v2034_v16 = vpop.permute.xlu0 %2033 }
 0x83f   : > { %v2041_v17 = vpack.c.bf16 %v2034_v16, %v2034_v16 }
 0x840   : > { %v1917_v56 = vmul.f32 %v3475_v45, %v1916_v52 }
 0x841   : > { %v2085_v18 = vsel %vm1235_vm4, %v2041_v17, 0  ;;  %v2216_v50 = vunpack.c.l.b16 %v2041_v17 }
 0x842   : > { %v1921_v59 = vsel %vm1920_vm12, %v3475_v45, %v1917_v56  ;;  %2094 = vmatpush.bf16.xpose.msrb.mxu1 %v2085_v18  ;;  %v4562_v18 = vpack.c.bf16 %v2008_v41, %v2008_v41 }
 0x843   : > { %v1923_v61 = vmul.f32 %v1921_v59, %v1889_v27  ;;  %v2217_v51 = vpack.c.b16 %v2216_v50, %v2216_v50 }
 0x844   : > { %v2382_v9 = vsel %vm1235_vm4, %v4562_v18, 0 }
 0x845   : > { %v1928_v63 = vmul.f32 %v3427_v53, %v1923_v61 }
 0x847   : > { %v4499_v2 = vadd.f32 %v3428_v62, %v1928_v63 }
 0x849   : > { %v1938_v32 = vpack.c.bf16 %v4499_v2, %v4497_v1 }
 0x84b   : > { %3255 = vmatmul.msk.bf16.vlgmr.msra.gmra.mxu1 %vm1193_vm3, %v1938_v32 }
 0x8c8   : > { %v1967_v6 = vpop.f32.mrf.mxu1 }
 0x8c9   : > { %v1968_v7 = vadd.f32 %v3430_v5, %v1967_v6 }
 0x8cb   : > { %v2025_v8 = vpack.c.bf16 %v1968_v7, %v1968_v7  ;;  %2019 = vrot.lane.b32.xlu0 %v1968_v7, %s3843_s12  ;;  %2022 = vrot.lane.b32.xlu1 %v1968_v7, %s3841_s9 }
 0x8cd   : > { %3265 = vmatmul.msk.bf16.vlgmr.msra.gmra.mxu3 %vm1235_vm4, %v2025_v8 }
 0x8d0   : > { %v1969_v30 = vpop.f32.mrf.mxu1 }
 0x8d1   : > { %v4536_v42 = vadd.f32 %v3430_v5, %v1969_v30 }
 0x8d3   : > { %2016 = vrot.lane.b32.xlu1 %v1968_v7, %s3842_s14 }
 0x93d   : > { %v2020_v19 = vpop.permute.xlu0 %2019  ;;  %v2023_v22 = vpop.permute.xlu1 %2022 }
 0x93e   : > { %v2027_v24 = vpack.c.bf16 %v2020_v19, %v2020_v19  ;;  %v2028_v25 = vpack.c.bf16 %v2023_v22, %v2023_v22 }
 0x940   : > { %3267 = vmatmul.msk.bf16.vlgmr.msrb.gmra.mxu1 %vm1235_vm4, %v2027_v24  ;;  %3268 = vmatmul.msk.bf16.vlgmr.msrb.gmra.mxu2 %vm1235_vm4, %v2028_v25  ;;  %v2012_v25 = vld [vmem:[%s4263_s16 + $0x8] sm:$0xf] }
 0x945   : > { %v2017_v21 = vpop.permute.xlu1 %2016 }
 0x946   : > { %v2026_v26 = vpack.c.bf16 %v2017_v21, %v2017_v21  ;;  %v4570_v21 = vsel %vm1380_vm5, %v2012_v25, 0 }
 0x948   : > { %3266 = vmatmul.msk.bf16.vlgmr.msrb.gmra.mxu0 %vm1235_vm4, %v2026_v26  ;;  %v2013_v26 = vld [vmem:[%s4263_s16 + $0xc] sm:$0xf] }
 0x950   : > { %v2058_v27 = vpop.f32.mrf.mxu3 }
 0x951   : > { %v2119_v28 = vsel %vm1235_vm4, %v2058_v27, -inf }
 0x952   : > { %2120 = vmax.xlane.f32.xlu1 %v2119_v28 }
 0x958   : > { %v2060_v29 = vpop.f32.mrf.mxu3 }
 0x9bd   : > { %v2096_v10 = vpop.f32.mrf.mxu1 }
 0x9be   : > { %v2125_v58 = vsel %vm1235_vm4, %v2096_v10, -inf }
 0x9bf   : > { %2126 = vmax.xlane.f32.xlu1 %v2125_v58 }
 0x9c3   : > { %v2115_v31 = vpop.f32.mrf.mxu2 }
 0x9c4   : > { %v2128_v43 = vsel %vm1235_vm4, %v2115_v31, -inf }
 0x9c5   : > { %v2098_v57 = vpop.f32.mrf.mxu1  ;;  %2129 = vmax.xlane.f32.xlu0 %v2128_v43  ;;  %v2077_v33 = vpop.f32.mrf.mxu0 }
 0x9c6   : > { %v2122_v34 = vsel %vm1235_vm4, %v2077_v33, -inf  ;;  %v2121_v44 = vpop.xlane.xlu1 %2120 }
 0x9c7   : > { %2123 = vmax.xlane.f32.xlu2 %v2122_v34  ;;  %v2131_v45 = vsub.f32 %v2058_v27, %v2121_v44  ;;  %v4575_v27 = vsel %vm1380_vm5, %v2013_v26, 0 }
 0x9c9   : > { %v2135_v46 = vmul.f32 1.442695, %v2131_v45 }
 0x9cb   : > { %v2117_v35 = vpop.f32.mrf.mxu2  ;;  %3476 = vpow2.f32 %v2135_v46 }
 0x9cd   : > { %v2079_v36 = vpop.f32.mrf.mxu0 }
 0x9ce   : > { %v2011_v36 = vld [vmem:[%s4263_s16 + $0x4] sm:$0xf]  ;;  %s4813_s16 = scalar_lea.vmem [#allocation6], %s4183_s18 }
 0x9cf   : > { %v4588_v45 = vsel %vm1380_vm5, %v2011_v36, 0 }
 0x9d1   : > { %v3477_v47 = vpop.eup %3476 }
 0x9d2   : > { %v2143_v48 = vsel %vm1235_vm4, %v3477_v47, 0.0 }
 0x9d8   : > { %2170 = vrot.lane.b32.xlu1 %v2169_v39, %s3844_s17 }
 0x9d9   : > { %2242 = vrot.lane.b32.xlu0 %v2241_v40, %s3844_s17 }
 0x9e0   : > { %2371 = vrot.lane.b32.xlu1 %v2008_v41, %s3841_s9 }
 0x9e8   : > { %2365 = vrot.lane.b32.xlu1 %v2008_v41, %s3842_s14 }
 0x9f0   : > { %2351 = vrot.lane.b32.xlu1 %v4536_v42, %s3842_s14  ;;  %s4819_s14 = sld [smem:[#allocation45_spill]] (!%p3315_p10) }
 0xa03   : > { %2144 = vadd.xlane.f32.xlu0 %v2143_v48 }
 0xa17   : > { %2218 = vrot.lane.b32.xlu0 %v2217_v51, %s3844_s17 }
 0xa1f   : > { %2357 = vrot.lane.b32.xlu0 %v4536_v42, %s3841_s9  ;;  %s4817_s9 = scalar_lea.vmem [#allocation14], %s4183_s18 }
 0xa27   : > { %2368 = vrot.lane.b32.xlu0 %v2008_v41, %s3843_s12 }
 0xa32   : > { %v2127_v52 = vpop.xlane.xlu1 %2126 }
 0xa33   : > { %v2133_v56 = vsub.f32 %v2096_v10, %v2127_v52 }
 0xa35   : > { %v2139_v62 = vmul.f32 1.442695, %v2133_v56 }
 0xa38   : > { %v2130_v38 = vpop.xlane.xlu0 %2129 }
 0xa39   : > { %v2134_v63 = vsub.f32 %v2115_v31, %v2130_v38 }
 0xa3a   : > { %v2124_v53 = vpop.xlane.xlu2 %2123 }
 0xa3b   : > { %v2132_v54 = vsub.f32 %v2077_v33, %v2124_v53  ;;  %v2141_v49 = vmul.f32 1.442695, %v2134_v63 }
 0xa3d   : > { %v2137_v59 = vmul.f32 1.442695, %v2132_v54 }
 0xa3f   : > { %3478 = vpow2.f32 %v2137_v59  ;;  %v2360_v59 = vpack.c.bf16 %v4536_v42, %v4536_v42 }
 0xa40   : > { %3480 = vpow2.f32 %v2139_v62 }
 0xa41   : > { %3482 = vpow2.f32 %v2141_v49 }
 0xa45   : > { %v4545_v61 = vpop.eup %3478 }
 0xa46   : > { %v2146_v32 = vsel %vm1235_vm4, %v4545_v61, 0.0  ;;  %v3481_v4 = vpop.eup %3480 }
 0xa47   : > { %2147 = vadd.xlane.f32.xlu2 %v2146_v32  ;;  %v2149_v6 = vsel %vm1235_vm4, %v3481_v4, 0.0  ;;  %v3483_v7 = vpop.eup %3482 }
 0xa48   : > { %v2152_v8 = vsel %vm1235_vm4, %v3483_v7, 0.0 }
 0xa4a   : > { %v2171_v60 = vpop.permute.xlu1 %2170 }
 0xa4b   : > { %v2176_v3 = vsel %vm1380_vm5, %v2171_v60, 0  ;;  %v2243_v23 = vpop.permute.xlu0 %2242 }
 0xa4c   : > { %v2248_v5 = vsel %vm1380_vm5, %v2243_v23, 0  ;;  %2185 = vmatpush.bf16.msrb.mxu3 %v2176_v3 }
 0xa4d   : > { %2257 = vmatpush.bf16.msra.mxu2 %v2248_v5 }
 0xa4f   : > { %2150 = vadd.xlane.f32.xlu2 %v2149_v6 }
 0xa50   : > { %2280 = vmatpush.bf16.msra.mxu3 %v4555_v12 }
 0xa51   : > { %2337 = vmatpush.bf16.msrb.mxu2 %v4575_v27 }
 0xa52   : > { %v2372_v0 = vpop.permute.xlu1 %2371 }
 0xa53   : > { %v4585_v40 = vpack.c.bf16 %v2372_v0, %v2372_v0 }
 0xa55   : > { %v2439_v51 = vsel %vm1235_vm4, %v4585_v40, 0 }
 0xa57   : > { %2153 = vadd.xlane.f32.xlu2 %v2152_v8 }
 0xa5a   : > { %v2366_v37 = vpop.permute.xlu1 %2365 }
 0xa5b   : > { %v4590_v46 = vpack.c.bf16 %v2366_v37, %v2366_v37 }
 0xa5d   : > { %v2401_v52 = vsel %vm1235_vm4, %v4590_v46, 0 }
 0xa62   : > { %v2352_v5 = vpop.permute.xlu1 %2351 }
 0xa63   : > { %v2361_v6 = vpack.c.bf16 %v2352_v5, %v2352_v5 }
 0xa6f   : > { %2194 = vrot.lane.b32.xlu2 %v2193_v14, %s3844_s17 }
 0xa76   : > { %v2145_v15 = vpop.xlane.xlu0 %2144 }
 0xa77   : > { %3484 = vrcp.f32 %v2145_v15  ;;  %2354 = vrot.lane.b32.xlu2 %v4536_v42, %s3843_s12 }
 0xa7d   : > { %v3485_v16 = vpop.eup %3484 }
 0xa7e   : > { %v2159_v17 = vmul.f32 %v3485_v16, %v3477_v47 }
 0xa80   : > { %v2163_v19 = vpack.c.bf16 %v2159_v17, %v2159_v17 }
 0xa82   : > { %3269 = vmatmul.msk.bf16.vlgmr.msrb.gmra.mxu3 %vm1235_vm4, %v2163_v19 }
 0xa83   : > { %2391 = vmatpush.bf16.xpose.msrb.mxu3 %v2382_v9 }
 0xa89   : > { %v2219_v22 = vpop.permute.xlu0 %2218 }
 0xa8a   : > { %v2224_v24 = vsel %vm1380_vm5, %v2219_v22, 0 }
 0xa8b   : > { %2233 = vmatpush.bf16.msra.mxu1 %v2224_v24 }
 0xa8f   : > { %2318 = vmatpush.bf16.msrb.mxu1 %v4570_v21 }
 0xa91   : > { %v2358_v29 = vpop.permute.xlu0 %2357 }
 0xa99   : > { %v2369_v10 = vpop.permute.xlu0 %2368 }
 0xa9a   : > { %v4578_v31 = vpack.c.bf16 %v2369_v10, %v2369_v10 }
 0xa9c   : > { %v2420_v35 = vsel %vm1235_vm4, %v4578_v31, 0 }
 0xaba   : > { %v2148_v28 = vpop.xlane.xlu2 %2147 }
 0xac2   : > { %v2151_v30 = vpop.xlane.xlu2 %2150 }
 0xac3   : > { %3486 = vrcp.f32 %v2151_v30 }
 0xac4   : > { %3488 = vrcp.f32 %v2148_v28 }
 0xac9   : > { %v3487_v58 = vpop.eup %3486 }
 0xaca   : > { %v2161_v43 = vmul.f32 %v3487_v58, %v3481_v4  ;;  %v2154_v57 = vpop.xlane.xlu2 %2153  ;;  %v3489_v34 = vpop.eup %3488 }
 0xacb   : > { %3490 = vrcp.f32 %v2154_v57  ;;  %v2160_v39 = vmul.f32 %v3489_v34, %v4545_v61 }
 0xacc   : > { %v2165_v33 = vpack.c.bf16 %v2161_v43, %v2161_v43 }
 0xacd   : > { %v2164_v50 = vpack.c.bf16 %v2160_v39, %v2160_v39 }
 0xace   : > { %3271 = vmatmul.msk.bf16.vlgmr.msra.gmra.mxu1 %vm1235_vm4, %v2165_v33  ;;  %v2503_v33 = vunpack.c.l.b16 %v4562_v18 }
 0xacf   : > { %2429 = vmatpush.bf16.xpose.msra.mxu1 %v2420_v35 }
 0xad0   : > { %v2504_v36 = vpack.c.b16 %v2503_v33, %v2503_v33 }
 0xad1   : > { %v3491_v20 = vpop.eup %3490 }
 0xad2   : > { %v2162_v41 = vmul.f32 %v3491_v20, %v3483_v7  ;;  %v2195_v44 = vpop.permute.xlu2 %2194  ;;  %v2363_v7 = vpack.c.bf16 %v2358_v29, %v2358_v29  ;;  %v2551_v20 = vunpack.c.l.b16 %v4578_v31 }
 0xad3   : > { %v2200_v47 = vsel %vm1380_vm5, %v2195_v44, 0 }
 0xad4   : > { %v2166_v48 = vpack.c.bf16 %v2162_v41, %v2162_v41  ;;  %2209 = vmatpush.bf16.msra.mxu0 %v2200_v47  ;;  %v2552_v39 = vpack.c.b16 %v2551_v20, %v2551_v20 }
 0xad6   : > { %3272 = vmatmul.msk.bf16.vlgmr.msra.gmra.mxu2 %vm1235_vm4, %v2166_v48 }
 0xad7   : > { %2448 = vmatpush.bf16.xpose.msra.mxu2 %v2439_v51  ;;  %3270 = vmatmul.msk.bf16.vlgmr.msra.gmra.mxu0 %vm1235_vm4, %v2164_v50  ;;  %v4624_v51 = vld [vmem:[%s4813_s16] ss:$0 sm:$0xff] }
 0xad8   : > { %2299 = vmatpush.bf16.msrb.mxu0 %v4588_v45 }
 0xada   : > { %v2355_v49 = vpop.permute.xlu2 %2354 }
 0xadb   : > { %v2362_v23 = vpack.c.bf16 %v2355_v49, %v2355_v49 }
 0xadc   : > { %2410 = vmatpush.bf16.xpose.msra.mxu0 %v2401_v52 }
 0xb05   : > { %v2187_v53 = vpop.f32.mrf.mxu3 }
 0xb06   : > { %v2263_v54 = vpack.c.bf16 %v2187_v53, %v2187_v53 }
 0xb08   : > { %3273 = vmatmul.msk.bf16.vlgmr.msra.gmra.mxu3 %vm1235_vm4, %v2263_v54 }
 0xb0d   : > { %v2189_v56 = vpop.f32.mrf.mxu3 }
 0xb18   : > { %3277 = vmatmul.msk.bf16.vlgmr.msrb.gmra.mxu3 %vm1235_vm4, %v2360_v59 }
 0xb4b   : > { %v2235_v62 = vpop.f32.mrf.mxu1 }
 0xb4c   : > { %v2265_v38 = vpack.c.bf16 %v2235_v62, %v2235_v62 }
 0xb4e   : > { %3275 = vmatmul.msk.bf16.vlgmr.msrb.gmra.mxu1 %vm1235_vm4, %v2265_v38 }
 0xb53   : > { %v2237_v61 = vpop.f32.mrf.mxu1 }
 0xb54   : > { %v2211_v63 = vpop.f32.mrf.mxu0 }
 0xb55   : > { %v2264_v32 = vpack.c.bf16 %v2211_v63, %v2211_v63 }
 0xb57   : > { %3274 = vmatmul.msk.bf16.vlgmr.msrb.gmra.mxu0 %vm1235_vm4, %v2264_v32 }
 0xb59   : > { %v2259_v60 = vpop.f32.mrf.mxu2 }
 0xb5a   : > { %v2266_v3 = vpack.c.bf16 %v2259_v60, %v2259_v60 }
 0xb5c   : > { %v2213_v4 = vpop.f32.mrf.mxu0  ;;  %3276 = vmatmul.msk.bf16.vlgmr.msrb.gmra.mxu2 %vm1235_vm4, %v2266_v3 }
 0xb5e   : > { %3279 = vmatmul.msk.bf16.vlgmr.msra.gmra.mxu1 %vm1235_vm4, %v2362_v23 }
 0xb61   : > { %v2261_v42 = vpop.f32.mrf.mxu2 }
 0xb67   : > { %3278 = vmatmul.msk.bf16.vlgmr.msra.gmra.mxu0 %vm1235_vm4, %v2361_v6 }
 0xb6c   : > { %3280 = vmatmul.msk.bf16.vlgmr.msra.gmra.mxu2 %vm1235_vm4, %v2363_v7 }
 0xb8b   : > { %v2282_v8 = vpop.f32.mrf.mxu3 }
 0xb8c   : > { %v2343_v9 = vsel %vm1193_vm3, %v2282_v8, 0.0 }
 0xb93   : > { %v2284_v11 = vpop.f32.mrf.mxu3 }
 0xb9b   : > { %v2393_v13 = vpop.f32.mrf.mxu3 }
 0xb9c   : > { %v2454_v14 = vsel %vm1235_vm4, %v2393_v13, -inf }
 0xb9d   : > { %2455 = vmax.xlane.f32.xlu0 %v2454_v14  ;;  %v2527_v14 = vunpack.c.l.b16 %v4590_v46 }
 0xba3   : > { %v2395_v15 = vpop.f32.mrf.mxu3 }
 0xba4   : > { %v2528_v15 = vpack.c.b16 %v2527_v14, %v2527_v14 }
 0xbcb   : > { %v2320_v16 = vpop.f32.mrf.mxu1 }
 0xbcc   : > { %v2346_v25 = vsel %vm1193_vm3, %v2320_v16, 0.0 }
 0xbd3   : > { %v2322_v17 = vpop.f32.mrf.mxu1 }
 0xbd4   : > { %v2301_v19 = vpop.f32.mrf.mxu0 }
 0xbd5   : > { %v2344_v22 = vsel %vm1193_vm3, %v2301_v19, 0.0 }
 0xbd6   : > { %v2345_v24 = vadd.f32 %v2344_v22, %v2343_v9 }
 0xbd8   : > { %v2347_v26 = vadd.f32 %v2346_v25, %v2345_v24 }
 0xbdb   : > { %v2431_v28 = vpop.f32.mrf.mxu1 }
 0xbdc   : > { %v2303_v29 = vpop.f32.mrf.mxu0  ;;  %v2460_v30 = vsel %vm1235_vm4, %v2431_v28, -inf }
 0xbdd   : > { %2461 = vmax.xlane.f32.xlu0 %v2460_v30 }
 0xbdf   : > { %v2339_v0 = vpop.f32.mrf.mxu2 }
 0xbe0   : > { %v2348_v18 = vsel %vm1193_vm3, %v2339_v0, 0.0 }
 0xbe1   : > { %v2349_v50 = vadd.f32 %v2348_v18, %v2347_v26 }
 0xbe3   : > { %v2433_v10 = vpop.f32.mrf.mxu1  ;;  %v2676_v53 = vadd.f32 %v4624_v51, %v2349_v50 }
 0xbe4   : > { %v2412_v58 = vpop.f32.mrf.mxu0 }
 0xbe5   : > { %v2457_v43 = vsel %vm1235_vm4, %v2412_v58, -inf  ;;  %v2678_v31 = vadd.f32 %v2676_v53, %v4497_v1 }
 0xbe6   : > { %2458 = vmax.xlane.f32.xlu2 %v2457_v43 }
 0xbe7   : > { %v2341_v57 = vpop.f32.mrf.mxu2  ;;  %v2682_v56 = vsel %vm1193_vm3, %v2678_v31, 0.0 }
 0xbec   : > { %v2414_v34 = vpop.f32.mrf.mxu0 }
 0xbef   : > { %v2450_v35 = vpop.f32.mrf.mxu2 }
 0xbf0   : > { %v2463_v37 = vsel %vm1235_vm4, %v2450_v35, -inf }
 0xbf1   : > { %2464 = vmax.xlane.f32.xlu1 %v2463_v37  ;;  %2505 = vrot.lane.b32.xlu0 %v2504_v36, %s3844_s17 }
 0xbf7   : > { %v2452_v41 = vpop.f32.mrf.mxu2 }
 0xbf9   : > { %2553 = vrot.lane.b32.xlu0 %v2552_v39, %s3844_s17 }
 0xc10   : > { %v2456_v44 = vpop.xlane.xlu0 %2455 }
 0xc11   : > { %v2466_v47 = vsub.f32 %v2393_v13, %v2456_v44 }
 0xc13   : > { %v2470_v48 = vmul.f32 1.442695, %v2466_v47 }
 0xc15   : > { %3492 = vpow2.f32 %v2470_v48 }
 0xc1b   : > { %v3493_v52 = vpop.eup %3492 }
 0xc1c   : > { %v2478_v54 = vsel %vm1235_vm4, %v3493_v52, 0.0 }
 0xc1d   : > { %2479 = vadd.xlane.f32.xlu2 %v2478_v54 }
 0xc23   : > { %2683 = vadd.xlane.f32.xlu0 %v2682_v56 }
 0xc50   : > { %v2462_v59 = vpop.xlane.xlu0 %2461 }
 0xc51   : > { %v2468_v61 = vsub.f32 %v2431_v28, %v2462_v59 }
 0xc53   : > { %v2474_v32 = vmul.f32 1.442695, %v2468_v61 }
 0xc59   : > { %v2459_v62 = vpop.xlane.xlu2 %2458 }
 0xc5a   : > { %v2467_v38 = vsub.f32 %v2412_v58, %v2459_v62 }
 0xc5c   : > { %v2472_v63 = vmul.f32 1.442695, %v2467_v38 }
 0xc5e   : > { %3494 = vpow2.f32 %v2472_v63 }
 0xc5f   : > { %3496 = vpow2.f32 %v2474_v32 }
 0xc63   : > { %v2506_v49 = vpop.permute.xlu0 %2505 }
 0xc64   : > { %v3495_v60 = vpop.eup %3494  ;;  %v2511_v3 = vsel %vm1380_vm5, %v2506_v49, 0  ;;  %v2465_v23 = vpop.xlane.xlu1 %2464 }
 0xc65   : > { %v2469_v4 = vsub.f32 %v2450_v35, %v2465_v23  ;;  %2520 = vmatpush.bf16.msra.mxu3 %v2511_v3  ;;  %v2481_v1 = vsel %vm1235_vm4, %v3495_v60, 0.0  ;;  %v3497_v5 = vpop.eup %3496 }
 0xc66   : > { %2482 = vadd.xlane.f32.xlu2 %v2481_v1  ;;  %v2484_v8 = vsel %vm1235_vm4, %v3497_v5, 0.0 }
 0xc67   : > { %v2476_v42 = vmul.f32 1.442695, %v2469_v4 }
 0xc69   : > { %2612 = vmatpush.bf16.msrb.mxu3 %v4555_v12  ;;  %3498 = vpow2.f32 %v2476_v42  ;;  %v2575_v12 = vunpack.c.l.b16 %v4585_v40 }
 0xc6b   : > { %v2554_v6 = vpop.permute.xlu0 %2553  ;;  %v2576_v16 = vpack.c.b16 %v2575_v12, %v2575_v12 }
 0xc6c   : > { %v2559_v7 = vsel %vm1380_vm5, %v2554_v6, 0 }
 0xc6d   : > { %2568 = vmatpush.bf16.msrb.mxu1 %v2559_v7 }
 0xc6e   : > { %2485 = vadd.xlane.f32.xlu2 %v2484_v8 }
 0xc6f   : > { %v3499_v11 = vpop.eup %3498 }
 0xc70   : > { %v2487_v13 = vsel %vm1235_vm4, %v3499_v11, 0.0 }
 0xc71   : > { %2644 = vmatpush.bf16.msra.mxu1 %v4570_v21  ;;  %2488 = vadd.xlane.f32.xlu1 %v2487_v13 }
 0xc86   : > { %2529 = vrot.lane.b32.xlu2 %v2528_v15, %s3844_s17 }
 0xc8a   : > { %2577 = vrot.lane.b32.xlu1 %v2576_v16, %s3844_s17 }
 0xc90   : > { %v2480_v17 = vpop.xlane.xlu2 %2479 }
 0xc91   : > { %3500 = vrcp.f32 %v2480_v17 }
 0xc96   : > { %v2684_v21 = vpop.xlane.xlu0 %2683 }
 0xc97   : > { %v3501_v19 = vpop.eup %3500  ;;  %v2688_v24 = vmul.f32 %v2684_v21, %v4444_v55 }
 0xc98   : > { %v2494_v9 = vmul.f32 %v3501_v19, %v3493_v52 }
 0xc99   : > { %v4643_v25 = vsub.f32 %v2678_v31, %v2688_v24 }
 0xc9a   : > { %v2498_v22 = vpack.c.bf16 %v2494_v9, %v2494_v9  ;;  %v3331_v9 = vld [vmem:[%s4204_s15] sm:$0xff] }
 0xc9b   : > { %v2692_v40 = vmul.f32 %v4643_v25, %v4643_v25 }
 0xc9c   : > { %3281 = vmatmul.msk.bf16.vlgmr.msra.gmra.mxu3 %vm1235_vm4, %v2498_v22 }
 0xc9d   : > { %v2694_v46 = vsel %vm1193_vm3, %v2692_v40, 0.0 }
 0xcaf   : > { %2695 = vadd.xlane.f32.xlu2 %v2694_v46 }
 0xcd9   : > { %v2483_v26 = vpop.xlane.xlu2 %2482 }
 0xcda   : > { %3502 = vrcp.f32 %v2483_v26 }
 0xce0   : > { %v3503_v29 = vpop.eup %3502 }
 0xce1   : > { %v2486_v28 = vpop.xlane.xlu2 %2485  ;;  %v2495_v0 = vmul.f32 %v3503_v29, %v3495_v60 }
 0xce2   : > { %3504 = vrcp.f32 %v2486_v28 }
 0xce3   : > { %v2499_v33 = vpack.c.bf16 %v2495_v0, %v2495_v0 }
 0xce4   : > { %v2489_v34 = vpop.xlane.xlu1 %2488 }
 0xce5   : > { %3506 = vrcp.f32 %v2489_v34 }
 0xce8   : > { %v3505_v30 = vpop.eup %3504 }
 0xce9   : > { %v2496_v10 = vmul.f32 %v3505_v30, %v3497_v5  ;;  %v2530_v58 = vpop.permute.xlu2 %2529 }
 0xcea   : > { %v2535_v43 = vsel %vm1380_vm5, %v2530_v58, 0 }
 0xceb   : > { %v2500_v57 = vpack.c.bf16 %v2496_v10, %v2496_v10  ;;  %2544 = vmatpush.bf16.msrb.mxu0 %v2535_v43  ;;  %v3507_v35 = vpop.eup %3506 }
 0xcec   : > { %v2497_v36 = vmul.f32 %v3507_v35, %v3499_v11 }
 0xced   : > { %3283 = vmatmul.msk.bf16.vlgmr.msrb.gmra.mxu1 %vm1235_vm4, %v2500_v57 }
 0xcee   : > { %3282 = vmatmul.msk.bf16.vlgmr.msrb.gmra.mxu0 %vm1235_vm4, %v2499_v33  ;;  %v2501_v39 = vpack.c.bf16 %v2497_v36, %v2497_v36 }
 0xcef   : > { %2628 = vmatpush.bf16.msra.mxu0 %v4588_v45 }
 0xcfc   : > { %v2578_v37 = vpop.permute.xlu1 %2577 }
 0xcfd   : > { %v2583_v20 = vsel %vm1380_vm5, %v2578_v37, 0  ;;  %v3433_v37 = vld [vmem:[%s4815_s11] ss:$0 sm:$0xff] }
 0xcfe   : > { %2592 = vmatpush.bf16.msrb.mxu2 %v2583_v20 }
 0xd01   : > { %3284 = vmatmul.msk.bf16.vlgmr.msrb.gmra.mxu2 %vm1235_vm4, %v2501_v39 }
 0xd02   : > { %2660 = vmatpush.bf16.msra.mxu2 %v4575_v27 }
 0xd1f   : > { %v2522_v41 = vpop.f32.mrf.mxu3 }
 0xd20   : > { %v2598_v44 = vpack.c.bf16 %v2522_v41, %v2522_v41 }
 0xd22   : > { %3285 = vmatmul.msk.bf16.vlgmr.msrb.gmra.mxu3 %vm1235_vm4, %v2598_v44  ;;  %v2696_v16 = vpop.xlane.xlu2 %2695 }
 0xd23   : > { %v2700_v17 = vmul.f32 %v2696_v16, %v4444_v55 }
 0xd25   : > { %v2702_v19 = vadd.f32 1e-05, %v2700_v17 }
 0xd27   : > { %v2524_v45 = vpop.f32.mrf.mxu3  ;;  %3508 = vrsqrt.f32 %v2702_v19  ;;  %vm2710_vm14 = vweird.f32 %v2702_v19 }
 0xd6a   : > { %v2570_v47 = vpop.f32.mrf.mxu1 }
 0xd6b   : > { %v2600_v48 = vpack.c.bf16 %v2570_v47, %v2570_v47  ;;  %v2546_v18 = vpop.f32.mrf.mxu0 }
 0xd6c   : > { %v2599_v50 = vpack.c.bf16 %v2546_v18, %v2546_v18  ;;  %v3334_v18 = vld [vmem:[%s4269_s24 + $0x8] sm:$0xff] }
 0xd6d   : > { %3287 = vmatmul.msk.bf16.vlgmr.msra.gmra.mxu1 %vm1235_vm4, %v2600_v48  ;;  %v3336_v48 = vld [vmem:[%s4269_s24 + $0x18] sm:$0xff] }
 0xd6e   : > { %3286 = vmatmul.msk.bf16.vlgmr.msra.gmra.mxu0 %vm1235_vm4, %v2599_v50  ;;  %v3333_v50 = vld [vmem:[%s4269_s24] sm:$0xff] }
 0xd6f   : > { %2821 = vmatpush.bf16.msrb.mxu0 %v3336_v48 }
 0xd72   : > { %v2572_v52 = vpop.f32.mrf.mxu1 }
 0xd73   : > { %v2548_v53 = vpop.f32.mrf.mxu0 }
 0xd74   : > { %v3434_v53 = vld [vmem:[%s4816_s6] ss:$0 sm:$0xff] }
 0xd84   : > { %v2594_v54 = vpop.f32.mrf.mxu2 }
 0xd85   : > { %v2601_v31 = vpack.c.bf16 %v2594_v54, %v2594_v54 }
 0xd87   : > { %3288 = vmatmul.msk.bf16.vlgmr.msra.gmra.mxu2 %vm1235_vm4, %v2601_v31  ;;  %vm2813_vm4 = vcmask 523264  }
 0xd8c   : > { %v2596_v27 = vpop.f32.mrf.mxu2 }
 0xda5   : > { %v2614_v56 = vpop.f32.mrf.mxu3 }
 0xda6   : > { %v2666_v49 = vsel %vm1193_vm3, %v2614_v56, 0.0 }
 0xdad   : > { %v2616_v59 = vpop.f32.mrf.mxu3 }
 0xdea   : > { %v2646_v62 = vpop.f32.mrf.mxu1 }
 0xdeb   : > { %v2630_v38 = vpop.f32.mrf.mxu0  ;;  %v2669_v3 = vsel %vm1193_vm3, %v2646_v62, 0.0 }
 0xdec   : > { %v2667_v32 = vsel %vm1193_vm3, %v2630_v38, 0.0  ;;  %v3435_v38 = vld [vmem:[%s4817_s9] ss:$0 sm:$0xff] }
 0xded   : > { %v2668_v60 = vadd.f32 %v2667_v32, %v2666_v49 }
 0xdef   : > { %v2670_v4 = vadd.f32 %v2669_v3, %v2668_v60 }
 0xdf2   : > { %v2648_v61 = vpop.f32.mrf.mxu1 }
 0xdf3   : > { %v2632_v63 = vpop.f32.mrf.mxu0 }
 0xe0a   : > { %v2662_v23 = vpop.f32.mrf.mxu2 }
 0xe0b   : > { %v2671_v1 = vsel %vm1193_vm3, %v2662_v23, 0.0 }
 0xe0c   : > { %v2672_v42 = vadd.f32 %v2671_v1, %v2670_v4 }
 0xe0e   : > { %v2677_v5 = vadd.f32 %v4624_v51, %v2672_v42  ;;  %v3332_v51 = vld [vmem:[%s4204_s15 + $0x8] sm:$0xff]  ;;  %s4814_s15 = scalar_lea.vmem [#allocation8], %s4183_s18 }
 0xe0f   : > { %2766 = vmatpush.bf16.msra.mxu3 %v3332_v51  ;;  %v3432_v33 = vld [vmem:[%s4814_s15] ss:$0 sm:$0xff] }
 0xe10   : > { %v2679_v6 = vadd.f32 %v2677_v5, %v4499_v2  ;;  %v3509_v2 = vpop.eup %3508 }
 0xe11   : > { %v2705_v22 = vmul.f32 %v3509_v2, %v2702_v19  ;;  %vm2711_vm13 = vweird.f32 %v3509_v2 }
 0xe12   : > { %v2664_v7 = vpop.f32.mrf.mxu2  ;;  %v2685_v8 = vsel %vm1193_vm3, %v2679_v6, 0.0  ;;  %vm2712_vm15 = vmor %vm2710_vm14, %vm2711_vm13 }
 0xe13   : > { %2686 = vadd.xlane.f32.xlu1 %v2685_v8  ;;  %2767 = vmatpush.bf16.msra.mxu3 %v3331_v9  ;;  %v2706_v21 = vmul.f32 %v3509_v2, %v2705_v22 }
 0xe15   : > { %v2707_v26 = vmul.f32 0.5, %v2706_v21 }
 0xe17   : > { %v2708_v28 = vsub.f32 1.5, %v2707_v26 }
 0xe19   : > { %v2709_v30 = vmul.f32 %v3509_v2, %v2708_v28 }
 0xe1b   : > { %v2713_v58 = vsel %vm2712_vm15, %v3509_v2, %v2709_v30 }
 0xe1c   : > { %v2724_v34 = vmul.f32 %v2713_v58, %v4643_v25  ;;  %v3335_v25 = vld [vmem:[%s4269_s24 + $0x10] sm:$0xff]  ;;  %s4818_s24 = scalar_lea.vmem [#allocation15], %s4183_s18 }
 0xe1d   : > { %2822 = vmatpush.bf16.msrb.mxu0 %v3335_v25 }
 0xe1e   : > { %v2729_v20 = vmul.f32 %v3432_v33, %v2724_v34 }
 0xe20   : > { %v2734_v44 = vadd.f32 %v3433_v37, %v2729_v20 }
 0xe21   : > { %2823 = vmatpush.bf16.msrb.mxu0 %v3334_v18 }
 0xe25   : > { %2824 = vmatpush.bf16.msrb.mxu0 %v3333_v50 }
 0xe86   : > { %v2687_v11 = vpop.xlane.xlu1 %2686 }
 0xe87   : > { %v2689_v13 = vmul.f32 %v2687_v11, %v4444_v55 }
 0xe89   : > { %v2691_v14 = vsub.f32 %v2679_v6, %v2689_v13 }
 0xe8b   : > { %v2693_v12 = vmul.f32 %v2691_v14, %v2691_v14 }
 0xe8d   : > { %v2697_v15 = vsel %vm1193_vm3, %v2693_v12, 0.0 }
 0xe8e   : > { %2698 = vadd.xlane.f32.xlu0 %v2697_v15 }
 0xf01   : > { %v2699_v24 = vpop.xlane.xlu0 %2698 }
 0xf02   : > { %v2701_v40 = vmul.f32 %v2699_v24, %v4444_v55 }
 0xf04   : > { %v2703_v46 = vadd.f32 1e-05, %v2701_v40 }
 0xf06   : > { %3510 = vrsqrt.f32 %v2703_v46  ;;  %vm2720_vm1 = vweird.f32 %v2703_v46 }
 0xf0c   : > { %v3511_v29 = vpop.eup %3510 }
 0xf0d   : > { %v2715_v0 = vmul.f32 %v3511_v29, %v2703_v46  ;;  %vm2721_vm0 = vweird.f32 %v3511_v29 }
 0xf0e   : > { %vm2722_vm2 = vmor %vm2720_vm1, %vm2721_vm0 }
 0xf0f   : > { %v2716_v10 = vmul.f32 %v3511_v29, %v2715_v0 }
 0xf11   : > { %v2717_v43 = vmul.f32 0.5, %v2716_v10 }
 0xf13   : > { %v2718_v57 = vsub.f32 1.5, %v2717_v43 }
 0xf15   : > { %v2719_v35 = vmul.f32 %v3511_v29, %v2718_v57 }
 0xf17   : > { %v2723_v36 = vsel %vm2722_vm2, %v3511_v29, %v2719_v35  ;;  %v3436_v29 = vld [vmem:[%s4818_s24] ss:$0 sm:$0xff] }
 0xf18   : > { %v2725_v39 = vmul.f32 %v2723_v36, %v2691_v14 }
 0xf1a   : > { %v2730_v41 = vmul.f32 %v3432_v33, %v2725_v39 }
 0xf1c   : > { %v2735_v45 = vadd.f32 %v3433_v37, %v2730_v41 }
 0xf1e   : > { %v2740_v47 = vpack.c.bf16 %v2735_v45, %v2734_v44 }
 0xf20   : > { %3297 = vmatmul.msk.bf16.vlgmr.msra.gmra.mxu3 %vm1193_vm3, %v2740_v47 }
 0xfa3   : > { %v2769_v52 = vpop.f32.mrf.mxu3 }
 0xfa4   : > { %v2770_v54 = vadd.f32 %v3434_v53, %v2769_v52 }
 0xfa6   : > { %v2774_v56 = vmax.f32 %v2770_v54, 0.0 }
 0xfab   : > { %v2771_v31 = vpop.f32.mrf.mxu3 }
 0xfac   : > { %v2772_v27 = vadd.f32 %v3434_v53, %v2771_v31 }
 0xfae   : > { %v2775_v59 = vmax.f32 %v2772_v27, 0.0 }
 0xfb0   : > { %v2784_v62 = vpack.c.bf16 %v2775_v59, %v2774_v56 }
 0xfb2   : > { %3314 = vmatmul.msk.bf16.vlgmr.msrb.gmra.mxu0 %vm2813_vm4, %v2784_v62 }
0x102f   : > { %v2826_v61 = vpop.f32.mrf.mxu0 }
0x1030   : > { %v2827_v63 = vadd.f32 %v3435_v38, %v2826_v61 }
0x1032   : > { %v2831_v32 = vadd.f32 %v2827_v63, %v2734_v44 }
0x1034   : > { %v2835_v49 = vsel %vm1193_vm3, %v2831_v32, 0.0 }
0x1035   : > { %2836 = vadd.xlane.f32.xlu1 %v2835_v49 }
0x1037   : > { %v2828_v60 = vpop.f32.mrf.mxu0 }
0x1038   : > { %v2829_v3 = vadd.f32 %v3435_v38, %v2828_v60 }
0x103a   : > { %v2832_v23 = vadd.f32 %v2829_v3, %v2735_v45 }
0x103c   : > { %v2838_v4 = vsel %vm1193_vm3, %v2832_v23, 0.0 }
0x103d   : > { %2839 = vadd.xlane.f32.xlu0 %v2838_v4 }
0x10a8   : > { %v2837_v1 = vpop.xlane.xlu1 %2836 }
0x10a9   : > { %v2841_v42 = vmul.f32 %v2837_v1, %v4444_v55 }
0x10ab   : > { %v2843_v5 = vsub.f32 %v2831_v32, %v2841_v42 }
0x10ad   : > { %v2845_v6 = vmul.f32 %v2843_v5, %v2843_v5 }
0x10af   : > { %v2847_v7 = vsel %vm1193_vm3, %v2845_v6, 0.0 }
0x10b0   : > { %v2840_v8 = vpop.xlane.xlu0 %2839  ;;  %2848 = vadd.xlane.f32.xlu1 %v2847_v7 }
0x10b1   : > { %v2842_v11 = vmul.f32 %v2840_v8, %v4444_v55 }
0x10b3   : > { %v2844_v13 = vsub.f32 %v2832_v23, %v2842_v11 }
0x10b5   : > { %v2846_v14 = vmul.f32 %v2844_v13, %v2844_v13 }
0x10b7   : > { %v2850_v12 = vsel %vm1193_vm3, %v2846_v14, 0.0 }
0x10b8   : > { %2851 = vadd.xlane.f32.xlu2 %v2850_v12 }
0x1123   : > { %v2849_v15 = vpop.xlane.xlu1 %2848 }
0x1124   : > { %v2853_v16 = vmul.f32 %v2849_v15, %v4444_v55 }
0x1126   : > { %v2855_v17 = vadd.f32 1e-05, %v2853_v16 }
0x1128   : > { %3512 = vrsqrt.f32 %v2855_v17  ;;  %vm2863_vm6 = vweird.f32 %v2855_v17 }
0x112b   : > { %v2852_v19 = vpop.xlane.xlu2 %2851 }
0x112c   : > { %v2854_v51 = vmul.f32 %v2852_v19, %v4444_v55  ;;  %v3437_v55 = vld [vmem:[%s970_s25] ss:$0 sm:$0xff] }
0x112e   : > { %v3513_v2 = vpop.eup %3512  ;;  %v2856_v9 = vadd.f32 1e-05, %v2854_v51 }
0x112f   : > { %v2858_v22 = vmul.f32 %v3513_v2, %v2855_v17  ;;  %vm2864_vm5 = vweird.f32 %v3513_v2 }
0x1130   : > { %3514 = vrsqrt.f32 %v2856_v9  ;;  %vm2865_vm7 = vmor %vm2863_vm6, %vm2864_vm5  ;;  %vm2873_vm9 = vweird.f32 %v2856_v9 }
0x1131   : > { %v2859_v21 = vmul.f32 %v3513_v2, %v2858_v22 }
0x1133   : > { %v2860_v24 = vmul.f32 0.5, %v2859_v21 }
0x1135   : > { %v2861_v40 = vsub.f32 1.5, %v2860_v24 }
0x1136   : > { %v3515_v46 = vpop.eup %3514 }
0x1137   : > { %v2862_v26 = vmul.f32 %v3513_v2, %v2861_v40  ;;  %v2868_v28 = vmul.f32 %v3515_v46, %v2856_v9  ;;  %vm2874_vm8 = vweird.f32 %v3515_v46 }
0x1138   : > { %vm2875_vm10 = vmor %vm2873_vm9, %vm2874_vm8 }
0x1139   : > { %v2866_v30 = vsel %vm2865_vm7, %v3513_v2, %v2862_v26  ;;  %v2869_v0 = vmul.f32 %v3515_v46, %v2868_v28 }
0x113a   : > { %v2877_v10 = vmul.f32 %v2866_v30, %v2843_v5 }
0x113b   : > { %v2870_v58 = vmul.f32 0.5, %v2869_v0 }
0x113c   : > { %v2882_v43 = vmul.f32 %v3436_v29, %v2877_v10 }
0x113d   : > { %v2871_v57 = vsub.f32 1.5, %v2870_v58 }
0x113e   : > { %v2887_v33 = vadd.f32 %v3437_v55, %v2882_v43 }
0x113f   : > { %v2872_v34 = vmul.f32 %v3515_v46, %v2871_v57 }
0x1140   : > { %2889 = vst.msk [vmem:[#allocation2] sm:$0xff] %vm1193_vm3, %v2887_v33 }
0x1141   : > { %v2876_v35 = vsel %vm2875_vm10, %v3515_v46, %v2872_v34 }
0x1142   : > { %v2878_v36 = vmul.f32 %v2876_v35, %v2844_v13 }
0x1144   : > { %v2883_v37 = vmul.f32 %v3436_v29, %v2878_v36  ;;  %2894 = sbr.rel (%p3315_p10) target bundleno = 4427 (0x114b), region = 152 }
0x1146   : > { %v2888_v20 = vadd.f32 %v3437_v55, %v2883_v37 }
0x1148   : > { %2890 = vst.msk [vmem:[#allocation2 + $0x8] sm:$0xff] %vm1193_vm3, %v2888_v20 }
0x1149   : > { %2895 = vst.msk [vmem:[%s4819_s14] sm:$0xff] %vm1193_vm3, %v2887_v33 }
0x114a   : > { %2896 = vst.msk [vmem:[%s4819_s14 + $0x8] sm:$0xff] %vm1193_vm3, %v2888_v20 }
0x114b PF: > { %s4820_s30 = sld [smem:[#allocation24_spill]]  ;;  %s4823_s3 = smov %s3828_s28 }
0x114c   : > { %s4821_s2 = sld [smem:[#allocation23_spill]] }
0x114d   : > { %s4822_s29 = sld [smem:[#allocation25_spill]] }
0x1151   : > { %p44_p5 = scmp.ge.s32.totalorder %s4820_s30, 4  }
0x1152   : > { %s4824_s28 = smov %s4821_s2 }
0x1153   :  { %46 = sbr.rel (!%p44_p5) target bundleno = 32 (0x20), region = 281 }
0x1158   :  { %2908 = vsyncpa [#allocation5], 1 }
0x1159   :  { %2910 = vsyncpa [#allocation5 + $0x1], 1 }
0x115a   :  { %2911 = vsyncpa [#allocation7], 1 }
0x115b   :  { %2913 = vsyncpa [#allocation7 + $0x1], 1 }
0x115c   :  { %2914 = vsyncpa [#allocation10], 1 }
0x115d   :  { %2916 = vsyncpa [#allocation10 + $0x1], 1 }
0x115e   :  { %2917 = vsyncpa [#allocation13], 1 }
0x115f   :  { %2919 = vsyncpa [#allocation13 + $0x1], 1 }
0x1160   :  { %2920 = vsyncpa [#allocation16], 1 }
0x1161   :  { %2922 = vsyncpa [#allocation16 + $0x1], 1 }

</bundles_post_ra>
